<compile_context>
chip_gen: v7x
topology: tpu7x:2x2x1
jax: 0.10.0
libtpu: 0.0.40
codegen_flags: <defaults>
</compile_context>

<pallas_src>
import jax
import jax.numpy as jnp
from jax.experimental import pallas as pl
from jax.experimental.pallas import tpu as pltpu

# MXU operand dtype (accumulation is always f32). bf16 is MXU-native on
# v5e/v6e/v7x; use jnp.float32 for exact-PyTorch-style numerics.
MXU_DTYPE = jnp.bfloat16


# ---------------------------------------------------------------------------
# Fused kernel: all layers + all timesteps + fc head in one invocation.
# ---------------------------------------------------------------------------
def _make_fused_lstm_kernel(T, B, H, num_layers):
    """Ref layout (positional):
      refs[0]                    : x_tb     (T*B, F)  MXU_DTYPE, time-major rows
      refs[1 + 3*l + 0]          : W_ih_l^T (F_l, 4H) MXU_DTYPE
      refs[1 + 3*l + 1]          : W_hh_l^T (H, 4H)   MXU_DTYPE
      refs[1 + 3*l + 2]          : b_l      (1, 4H)   f32  (= b_ih + b_hh)
      refs[1 + 3*L]              : w_fc     (1, H)    f32
      refs[2 + 3*L]              : b_fc     (1, 1)    f32
      refs[3 + 3*L]              : out      (B, 1)    f32   (output)
      refs[4 + 3*L]              : xproj    (T*B, 4H) f32   (VMEM scratch)
      refs[5 + 3*L]              : hseq     (T*B, H)  MXU_DTYPE (VMEM scratch)
    """

    def kernel(*refs):
        x_ref = refs[0]
        w_fc_ref = refs[1 + 3 * num_layers]
        b_fc_ref = refs[2 + 3 * num_layers]
        out_ref = refs[3 + 3 * num_layers]
        xproj_ref = refs[4 + 3 * num_layers]
        hseq_ref = refs[5 + 3 * num_layers]

        h = None
        for layer in range(num_layers):
            w_ih_ref = refs[1 + 3 * layer]
            w_hh_ref = refs[2 + 3 * layer]
            b_ref = refs[3 + 3 * layer]

            # ---- batched, hoisted input projection -----------------------
            # One (T*B, F_l) @ (F_l, 4H) push per layer; bias added once to
            # the whole slab (single broadcast). Result staged in VMEM so the
            # recurrence reads small (B, 4H) slices instead of keeping T
            # partially-filled vregs live.
            src_ref = x_ref if layer == 0 else hseq_ref
            xproj_ref[...] = (
                jnp.dot(src_ref[...], w_ih_ref[...],
                        preferred_element_type=jnp.float32)
                + b_ref[...]
            )

            # ---- recurrence (serial in t) --------------------------------
            h = jnp.zeros((B, H), jnp.float32)
            c = jnp.zeros((B, H), jnp.float32)
            for t in range(T):
                gates = xproj_ref[t * B:(t + 1) * B, :] + jnp.dot(
                    h.astype(w_hh_ref.dtype), w_hh_ref[...],
                    preferred_element_type=jnp.float32)
                # PyTorch gate order: input, forget, cell(g), output.
                # One EUP pass over the contiguous i|f slab; H is a multiple
                # of 128 so all slices are lane-aligned.
                if_g = jax.nn.sigmoid(gates[:, :2 * H])
                i_g = if_g[:, :H]
                f_g = if_g[:, H:]
                g_g = jnp.tanh(gates[:, 2 * H:3 * H])
                o_g = jax.nn.sigmoid(gates[:, 3 * H:])
                c = f_g * c + i_g * g_g
                h = o_g * jnp.tanh(c)
                if layer + 1 < num_layers:
                    # stage hidden state for the next layer's batched projection
                    hseq_ref[t * B:(t + 1) * B, :] = h.astype(hseq_ref.dtype)

        # ---- fused fc head on the last timestep of the last layer --------
        # N=1: VPU multiply + lane reduce instead of a 1-column MXU push.
        out = jnp.sum(h * w_fc_ref[...], axis=-1, keepdims=True) + b_fc_ref[...]
        out_ref[...] = out.astype(out_ref.dtype)

    return kernel


# ---------------------------------------------------------------------------
# Wrapper (== LSTM.forward in the PyTorch module)
# ---------------------------------------------------------------------------
@jax.jit
def lstm_forward(x, layer_params, fc_params):
    """x: (B, T, input_size) batch-first, like PyTorch. Returns (B, 1) f32."""
    B, T, F = x.shape
    H = layer_params[0][1].shape[0]
    num_layers = len(layer_params)
    G = 4 * H

    # Time-major, row-contiguous layout for the batched projections:
    # (B, T, F) -> (T, B, F) -> (T*B, F). Tiny (512 B) wrapper-side reshape.
    x_tb = jnp.transpose(x, (1, 0, 2)).reshape(T * B, F).astype(MXU_DTYPE)

    flat_inputs = [x_tb]
    for (w_ih_t, w_hh_t, b) in layer_params:
        flat_inputs += [w_ih_t.astype(MXU_DTYPE), w_hh_t.astype(MXU_DTYPE), b]
    w_fc_row, b_fc = fc_params
    flat_inputs += [w_fc_row, b_fc]

    kernel = _make_fused_lstm_kernel(T, B, H, num_layers)
    return pl.pallas_call(
        kernel,
        out_shape=jax.ShapeDtypeStruct((B, 1), jnp.float32),
        # Grid-less call: whole arrays land in VMEM once (single-buffered
        # weights, ~0.2 MiB in bf16), well under the limit on all generations.
        scratch_shapes=[
            pltpu.VMEM((T * B, G), jnp.float32),   # staged x-projections (~32 KiB)
            pltpu.VMEM((T * B, H), MXU_DTYPE),     # hidden sequence for next layer
        ],
        compiler_params=pltpu.CompilerParams(vmem_limit_bytes=32 * 1024 * 1024),
    )(*flat_inputs)


# ---------------------------------------------------------------------------
# Parameter init (deterministic, mirrors PyTorch uniform(-1/sqrt(H), 1/sqrt(H)))
# ---------------------------------------------------------------------------
def init_params(key, input_size, hidden_size, num_layers):
    bound = 1.0 / float(hidden_size) ** 0.5
    layer_params = []
    for layer in range(num_layers):
        in_f = input_size if layer == 0 else hidden_size
        key, k1, k2, k3, k4 = jax.random.split(key, 5)
        w_ih = jax.random.uniform(k1, (4 * hidden_size, in_f), jnp.float32, -bound, bound)
        w_hh = jax.random.uniform(k2, (4 * hidden_size, hidden_size), jnp.float32, -bound, bound)
        b_ih = jax.random.uniform(k3, (4 * hidden_size,), jnp.float32, -bound, bound)
        b_hh = jax.random.uniform(k4, (4 * hidden_size,), jnp.float32, -bound, bound)
        # pre-transpose weights and fuse biases for the kernel
        layer_params.append((w_ih.T, w_hh.T, (b_ih + b_hh)[None, :]))
    key, k5, k6 = jax.random.split(key, 3)
    w_fc = jax.random.uniform(k5, (1, hidden_size), jnp.float32, -bound, bound)
    b_fc = jax.random.uniform(k6, (1,), jnp.float32, -bound, bound)
    return layer_params, (w_fc, b_fc[None, :])   # fc kept as a (1, H) row for the VPU head


# ---------------------------------------------------------------------------
# Pure-JAX reference (f32, for numerics sanity check against the kernel)
# ---------------------------------------------------------------------------
def lstm_reference(x, layer_params, fc_params):
    B, T, _ = x.shape
    seq = jnp.transpose(x, (1, 0, 2))  # (T, B, F)
    for (w_ih_t, w_hh_t, b) in layer_params:
        H = w_hh_t.shape[0]

        def step(carry, x_t):
            h, c = carry
            gates = x_t @ w_ih_t + h @ w_hh_t + b
            i = jax.nn.sigmoid(gates[:, 0 * H:1 * H])
            f = jax.nn.sigmoid(gates[:, 1 * H:2 * H])
            g = jnp.tanh(gates[:, 2 * H:3 * H])
            o = jax.nn.sigmoid(gates[:, 3 * H:4 * H])
            c = f * c + i * g
            h = o * jnp.tanh(c)
            return (h, c), h

        init = (jnp.zeros((B, H), jnp.float32), jnp.zeros((B, H), jnp.float32))
        _, seq = jax.lax.scan(step, init, seq)
    w_fc_row, b_fc = fc_params
    return seq[-1] @ w_fc_row.T + b_fc


if __name__ == "__main__":
    B, T, INPUT, HIDDEN, LAYERS = 2, 8, 8, 128, 2  # HIDDEN multiple of 128 -> lane-aligned gates
    key = jax.random.PRNGKey(0)
    kx, kp = jax.random.split(key)
    x = jax.random.normal(kx, (B, T, INPUT), dtype=jnp.float32)
    layer_params, fc_params = init_params(kp, INPUT, HIDDEN, LAYERS)

    out = lstm_forward(x, layer_params, fc_params)
    jax.block_until_ready(out)
    assert out.shape == (B, 1) and out.dtype == jnp.float32
    assert bool(jnp.all(jnp.isfinite(out)))

    ref = lstm_reference(x, layer_params, fc_params)
    # Tolerance accounts for bf16 MXU operands (f32 accumulation); with
    # MXU_DTYPE = jnp.float32 this passes at 5e-3 as well.
    assert bool(jnp.allclose(out, ref, atol=1e-2, rtol=1e-2)), (out, ref)
    print("KERNEL_OK")
</pallas_src>

<mosaic_0001>
module attributes {stable_mosaic.version = 11 : i64} {
  func.func @kernel(%arg0: memref<16x8xbf16, #tpu.memory_space<vmem>>, %arg1: memref<8x512xbf16, #tpu.memory_space<vmem>>, %arg2: memref<128x512xbf16, #tpu.memory_space<vmem>>, %arg3: memref<1x512xf32, #tpu.memory_space<vmem>>, %arg4: memref<128x512xbf16, #tpu.memory_space<vmem>>, %arg5: memref<128x512xbf16, #tpu.memory_space<vmem>>, %arg6: memref<1x512xf32, #tpu.memory_space<vmem>>, %arg7: memref<1x128xf32, #tpu.memory_space<vmem>>, %arg8: memref<1x1xf32, #tpu.memory_space<vmem>>, %arg9: memref<2x1xf32, #tpu.memory_space<vmem>>, %arg10: memref<16x512xf32, #tpu.memory_space<vmem>>, %arg11: memref<16x128xbf16, #tpu.memory_space<vmem>>) attributes {dimension_semantics = [], scalar_prefetch = 0 : i64, scratch_operands = 2 : i64, tpu.core_type = #tpu.core_type<tc>} {
    %c0 = arith.constant 0 : index
    %c0_0 = arith.constant 0 : index
    %0 = vector.load %arg0[%c0, %c0_0] : memref<16x8xbf16, #tpu.memory_space<vmem>>, vector<16x8xbf16>
    %c0_1 = arith.constant 0 : index
    %c0_2 = arith.constant 0 : index
    %1 = vector.load %arg1[%c0_1, %c0_2] : memref<8x512xbf16, #tpu.memory_space<vmem>>, vector<8x512xbf16>
    %cst = arith.constant dense<0.000000e+00> : vector<16x512xf32>
    %2 = tpu.matmul %0, %1, %cst {dimension_numbers = #tpu.dot_dimension_numbers<[1], [0], [0], [1], [0, 0, 1, 1], [], []>} : vector<16x8xbf16>, vector<8x512xbf16>, vector<16x512xf32> -> vector<16x512xf32>
    %c0_3 = arith.constant 0 : index
    %c0_4 = arith.constant 0 : index
    %3 = vector.load %arg3[%c0_3, %c0_4] : memref<1x512xf32, #tpu.memory_space<vmem>>, vector<1x512xf32>
    %4 = vector.broadcast %3 : vector<1x512xf32> to vector<16x512xf32>
    %5 = arith.addf %2, %4 : vector<16x512xf32>
    %c0_5 = arith.constant 0 : index
    %c0_6 = arith.constant 0 : index
    %6 = vector.load %arg10[%c0_5, %c0_6] : memref<16x512xf32, #tpu.memory_space<vmem>>, vector<16x512xf32>
    tpu.vector_store %arg10[%c0_5, %c0_6], %5 {strides = array<i32>} : memref<16x512xf32, #tpu.memory_space<vmem>>, vector<16x512xf32>,
    %cst_7 = arith.constant 0.000000e+00 : f32
    %7 = vector.broadcast %cst_7 : f32 to vector<2x128xf32>
    %cst_8 = arith.constant 0.000000e+00 : f32
    %8 = vector.broadcast %cst_8 : f32 to vector<2x128xf32>
    %c0_9 = arith.constant 0 : index
    %c0_10 = arith.constant 0 : index
    %9 = vector.load %arg10[%c0_9, %c0_10] : memref<16x512xf32, #tpu.memory_space<vmem>>, vector<2x512xf32>
    %10 = arith.truncf %7 : vector<2x128xf32> to vector<2x128xbf16>
    %c0_11 = arith.constant 0 : index
    %c0_12 = arith.constant 0 : index
    %11 = vector.load %arg2[%c0_11, %c0_12] : memref<128x512xbf16, #tpu.memory_space<vmem>>, vector<128x512xbf16>
    %cst_13 = arith.constant dense<0.000000e+00> : vector<2x512xf32>
    %12 = tpu.matmul %10, %11, %cst_13 {dimension_numbers = #tpu.dot_dimension_numbers<[1], [0], [0], [1], [0, 0, 1, 1], [], []>} : vector<2x128xbf16>, vector<128x512xbf16>, vector<2x512xf32> -> vector<2x512xf32>
    %13 = arith.addf %9, %12 : vector<2x512xf32>
    %14 = vector.extract_strided_slice %13 {offsets = [0, 0], sizes = [2, 256], strides = [1, 1]} : vector<2x512xf32> to vector<2x256xf32>
    %15 = arith.negf %14 : vector<2x256xf32>
    %16 = math.exp %15 : vector<2x256xf32>
    %cst_14 = arith.constant 1.000000e+00 : f32
    %17 = vector.broadcast %cst_14 : f32 to vector<2x256xf32>
    %18 = arith.addf %17, %16 : vector<2x256xf32>
    %19 = arith.divf %17, %18 : vector<2x256xf32>
    %20 = vector.extract_strided_slice %19 {offsets = [0, 0], sizes = [2, 128], strides = [1, 1]} : vector<2x256xf32> to vector<2x128xf32>
    %21 = vector.extract_strided_slice %19 {offsets = [0, 128], sizes = [2, 128], strides = [1, 1]} : vector<2x256xf32> to vector<2x128xf32>
    %22 = vector.extract_strided_slice %13 {offsets = [0, 256], sizes = [2, 128], strides = [1, 1]} : vector<2x512xf32> to vector<2x128xf32>
    %23 = math.tanh %22 : vector<2x128xf32>
    %24 = vector.extract_strided_slice %13 {offsets = [0, 384], sizes = [2, 128], strides = [1, 1]} : vector<2x512xf32> to vector<2x128xf32>
    %25 = arith.negf %24 : vector<2x128xf32>
    %26 = math.exp %25 : vector<2x128xf32>
    %cst_15 = arith.constant 1.000000e+00 : f32
    %27 = vector.broadcast %cst_15 : f32 to vector<2x128xf32>
    %28 = arith.addf %27, %26 : vector<2x128xf32>
    %29 = arith.divf %27, %28 : vector<2x128xf32>
    %30 = arith.mulf %21, %8 : vector<2x128xf32>
    %31 = arith.mulf %20, %23 : vector<2x128xf32>
    %32 = arith.addf %30, %31 : vector<2x128xf32>
    %33 = math.tanh %32 : vector<2x128xf32>
    %34 = arith.mulf %29, %33 : vector<2x128xf32>
    %35 = arith.truncf %34 : vector<2x128xf32> to vector<2x128xbf16>
    %c0_16 = arith.constant 0 : index
    %c0_17 = arith.constant 0 : index
    %36 = vector.load %arg11[%c0_16, %c0_17] : memref<16x128xbf16, #tpu.memory_space<vmem>>, vector<2x128xbf16>
    tpu.vector_store %arg11[%c0_16, %c0_17], %35 {strides = array<i32>} : memref<16x128xbf16, #tpu.memory_space<vmem>>, vector<2x128xbf16>,
    %c2 = arith.constant 2 : index
    %c0_18 = arith.constant 0 : index
    %37 = vector.load %arg10[%c2, %c0_18] : memref<16x512xf32, #tpu.memory_space<vmem>>, vector<2x512xf32>
    %38 = arith.truncf %34 : vector<2x128xf32> to vector<2x128xbf16>
    %c0_19 = arith.constant 0 : index
    %c0_20 = arith.constant 0 : index
    %39 = vector.load %arg2[%c0_19, %c0_20] : memref<128x512xbf16, #tpu.memory_space<vmem>>, vector<128x512xbf16>
    %cst_21 = arith.constant dense<0.000000e+00> : vector<2x512xf32>
    %40 = tpu.matmul %38, %39, %cst_21 {dimension_numbers = #tpu.dot_dimension_numbers<[1], [0], [0], [1], [0, 0, 1, 1], [], []>} : vector<2x128xbf16>, vector<128x512xbf16>, vector<2x512xf32> -> vector<2x512xf32>
    %41 = arith.addf %37, %40 : vector<2x512xf32>
    %42 = vector.extract_strided_slice %41 {offsets = [0, 0], sizes = [2, 256], strides = [1, 1]} : vector<2x512xf32> to vector<2x256xf32>
    %43 = arith.negf %42 : vector<2x256xf32>
    %44 = math.exp %43 : vector<2x256xf32>
    %cst_22 = arith.constant 1.000000e+00 : f32
    %45 = vector.broadcast %cst_22 : f32 to vector<2x256xf32>
    %46 = arith.addf %45, %44 : vector<2x256xf32>
    %47 = arith.divf %45, %46 : vector<2x256xf32>
    %48 = vector.extract_strided_slice %47 {offsets = [0, 0], sizes = [2, 128], strides = [1, 1]} : vector<2x256xf32> to vector<2x128xf32>
    %49 = vector.extract_strided_slice %47 {offsets = [0, 128], sizes = [2, 128], strides = [1, 1]} : vector<2x256xf32> to vector<2x128xf32>
    %50 = vector.extract_strided_slice %41 {offsets = [0, 256], sizes = [2, 128], strides = [1, 1]} : vector<2x512xf32> to vector<2x128xf32>
    %51 = math.tanh %50 : vector<2x128xf32>
    %52 = vector.extract_strided_slice %41 {offsets = [0, 384], sizes = [2, 128], strides = [1, 1]} : vector<2x512xf32> to vector<2x128xf32>
    %53 = arith.negf %52 : vector<2x128xf32>
    %54 = math.exp %53 : vector<2x128xf32>
    %cst_23 = arith.constant 1.000000e+00 : f32
    %55 = vector.broadcast %cst_23 : f32 to vector<2x128xf32>
    %56 = arith.addf %55, %54 : vector<2x128xf32>
    %57 = arith.divf %55, %56 : vector<2x128xf32>
    %58 = arith.mulf %49, %32 : vector<2x128xf32>
    %59 = arith.mulf %48, %51 : vector<2x128xf32>
    %60 = arith.addf %58, %59 : vector<2x128xf32>
    %61 = math.tanh %60 : vector<2x128xf32>
    %62 = arith.mulf %57, %61 : vector<2x128xf32>
    %63 = arith.truncf %62 : vector<2x128xf32> to vector<2x128xbf16>
    %c2_24 = arith.constant 2 : index
    %c0_25 = arith.constant 0 : index
    %64 = vector.load %arg11[%c2_24, %c0_25] : memref<16x128xbf16, #tpu.memory_space<vmem>>, vector<2x128xbf16>
    tpu.vector_store %arg11[%c2_24, %c0_25], %63 {strides = array<i32>} : memref<16x128xbf16, #tpu.memory_space<vmem>>, vector<2x128xbf16>,
    %c4 = arith.constant 4 : index
    %c0_26 = arith.constant 0 : index
    %65 = vector.load %arg10[%c4, %c0_26] : memref<16x512xf32, #tpu.memory_space<vmem>>, vector<2x512xf32>
    %66 = arith.truncf %62 : vector<2x128xf32> to vector<2x128xbf16>
    %c0_27 = arith.constant 0 : index
    %c0_28 = arith.constant 0 : index
    %67 = vector.load %arg2[%c0_27, %c0_28] : memref<128x512xbf16, #tpu.memory_space<vmem>>, vector<128x512xbf16>
    %cst_29 = arith.constant dense<0.000000e+00> : vector<2x512xf32>
    %68 = tpu.matmul %66, %67, %cst_29 {dimension_numbers = #tpu.dot_dimension_numbers<[1], [0], [0], [1], [0, 0, 1, 1], [], []>} : vector<2x128xbf16>, vector<128x512xbf16>, vector<2x512xf32> -> vector<2x512xf32>
    %69 = arith.addf %65, %68 : vector<2x512xf32>
    %70 = vector.extract_strided_slice %69 {offsets = [0, 0], sizes = [2, 256], strides = [1, 1]} : vector<2x512xf32> to vector<2x256xf32>
    %71 = arith.negf %70 : vector<2x256xf32>
    %72 = math.exp %71 : vector<2x256xf32>
    %cst_30 = arith.constant 1.000000e+00 : f32
    %73 = vector.broadcast %cst_30 : f32 to vector<2x256xf32>
    %74 = arith.addf %73, %72 : vector<2x256xf32>
    %75 = arith.divf %73, %74 : vector<2x256xf32>
    %76 = vector.extract_strided_slice %75 {offsets = [0, 0], sizes = [2, 128], strides = [1, 1]} : vector<2x256xf32> to vector<2x128xf32>
    %77 = vector.extract_strided_slice %75 {offsets = [0, 128], sizes = [2, 128], strides = [1, 1]} : vector<2x256xf32> to vector<2x128xf32>
    %78 = vector.extract_strided_slice %69 {offsets = [0, 256], sizes = [2, 128], strides = [1, 1]} : vector<2x512xf32> to vector<2x128xf32>
    %79 = math.tanh %78 : vector<2x128xf32>
    %80 = vector.extract_strided_slice %69 {offsets = [0, 384], sizes = [2, 128], strides = [1, 1]} : vector<2x512xf32> to vector<2x128xf32>
    %81 = arith.negf %80 : vector<2x128xf32>
    %82 = math.exp %81 : vector<2x128xf32>
    %cst_31 = arith.constant 1.000000e+00 : f32
    %83 = vector.broadcast %cst_31 : f32 to vector<2x128xf32>
    %84 = arith.addf %83, %82 : vector<2x128xf32>
    %85 = arith.divf %83, %84 : vector<2x128xf32>
    %86 = arith.mulf %77, %60 : vector<2x128xf32>
    %87 = arith.mulf %76, %79 : vector<2x128xf32>
    %88 = arith.addf %86, %87 : vector<2x128xf32>
    %89 = math.tanh %88 : vector<2x128xf32>
    %90 = arith.mulf %85, %89 : vector<2x128xf32>
    %91 = arith.truncf %90 : vector<2x128xf32> to vector<2x128xbf16>
    %c4_32 = arith.constant 4 : index
    %c0_33 = arith.constant 0 : index
    %92 = vector.load %arg11[%c4_32, %c0_33] : memref<16x128xbf16, #tpu.memory_space<vmem>>, vector<2x128xbf16>
    tpu.vector_store %arg11[%c4_32, %c0_33], %91 {strides = array<i32>} : memref<16x128xbf16, #tpu.memory_space<vmem>>, vector<2x128xbf16>,
    %c6 = arith.constant 6 : index
    %c0_34 = arith.constant 0 : index
    %93 = vector.load %arg10[%c6, %c0_34] : memref<16x512xf32, #tpu.memory_space<vmem>>, vector<2x512xf32>
    %94 = arith.truncf %90 : vector<2x128xf32> to vector<2x128xbf16>
    %c0_35 = arith.constant 0 : index
    %c0_36 = arith.constant 0 : index
    %95 = vector.load %arg2[%c0_35, %c0_36] : memref<128x512xbf16, #tpu.memory_space<vmem>>, vector<128x512xbf16>
    %cst_37 = arith.constant dense<0.000000e+00> : vector<2x512xf32>
    %96 = tpu.matmul %94, %95, %cst_37 {dimension_numbers = #tpu.dot_dimension_numbers<[1], [0], [0], [1], [0, 0, 1, 1], [], []>} : vector<2x128xbf16>, vector<128x512xbf16>, vector<2x512xf32> -> vector<2x512xf32>
    %97 = arith.addf %93, %96 : vector<2x512xf32>
    %98 = vector.extract_strided_slice %97 {offsets = [0, 0], sizes = [2, 256], strides = [1, 1]} : vector<2x512xf32> to vector<2x256xf32>
    %99 = arith.negf %98 : vector<2x256xf32>
    %100 = math.exp %99 : vector<2x256xf32>
    %cst_38 = arith.constant 1.000000e+00 : f32
    %101 = vector.broadcast %cst_38 : f32 to vector<2x256xf32>
    %102 = arith.addf %101, %100 : vector<2x256xf32>
    %103 = arith.divf %101, %102 : vector<2x256xf32>
    %104 = vector.extract_strided_slice %103 {offsets = [0, 0], sizes = [2, 128], strides = [1, 1]} : vector<2x256xf32> to vector<2x128xf32>
    %105 = vector.extract_strided_slice %103 {offsets = [0, 128], sizes = [2, 128], strides = [1, 1]} : vector<2x256xf32> to vector<2x128xf32>
    %106 = vector.extract_strided_slice %97 {offsets = [0, 256], sizes = [2, 128], strides = [1, 1]} : vector<2x512xf32> to vector<2x128xf32>
    %107 = math.tanh %106 : vector<2x128xf32>
    %108 = vector.extract_strided_slice %97 {offsets = [0, 384], sizes = [2, 128], strides = [1, 1]} : vector<2x512xf32> to vector<2x128xf32>
    %109 = arith.negf %108 : vector<2x128xf32>
    %110 = math.exp %109 : vector<2x128xf32>
    %cst_39 = arith.constant 1.000000e+00 : f32
    %111 = vector.broadcast %cst_39 : f32 to vector<2x128xf32>
    %112 = arith.addf %111, %110 : vector<2x128xf32>
    %113 = arith.divf %111, %112 : vector<2x128xf32>
    %114 = arith.mulf %105, %88 : vector<2x128xf32>
    %115 = arith.mulf %104, %107 : vector<2x128xf32>
    %116 = arith.addf %114, %115 : vector<2x128xf32>
    %117 = math.tanh %116 : vector<2x128xf32>
    %118 = arith.mulf %113, %117 : vector<2x128xf32>
    %119 = arith.truncf %118 : vector<2x128xf32> to vector<2x128xbf16>
    %c6_40 = arith.constant 6 : index
    %c0_41 = arith.constant 0 : index
    %120 = vector.load %arg11[%c6_40, %c0_41] : memref<16x128xbf16, #tpu.memory_space<vmem>>, vector<2x128xbf16>
    tpu.vector_store %arg11[%c6_40, %c0_41], %119 {strides = array<i32>} : memref<16x128xbf16, #tpu.memory_space<vmem>>, vector<2x128xbf16>,
    %c8 = arith.constant 8 : index
    %c0_42 = arith.constant 0 : index
    %121 = vector.load %arg10[%c8, %c0_42] : memref<16x512xf32, #tpu.memory_space<vmem>>, vector<2x512xf32>
    %122 = arith.truncf %118 : vector<2x128xf32> to vector<2x128xbf16>
    %c0_43 = arith.constant 0 : index
    %c0_44 = arith.constant 0 : index
    %123 = vector.load %arg2[%c0_43, %c0_44] : memref<128x512xbf16, #tpu.memory_space<vmem>>, vector<128x512xbf16>
    %cst_45 = arith.constant dense<0.000000e+00> : vector<2x512xf32>
    %124 = tpu.matmul %122, %123, %cst_45 {dimension_numbers = #tpu.dot_dimension_numbers<[1], [0], [0], [1], [0, 0, 1, 1], [], []>} : vector<2x128xbf16>, vector<128x512xbf16>, vector<2x512xf32> -> vector<2x512xf32>
    %125 = arith.addf %121, %124 : vector<2x512xf32>
    %126 = vector.extract_strided_slice %125 {offsets = [0, 0], sizes = [2, 256], strides = [1, 1]} : vector<2x512xf32> to vector<2x256xf32>
    %127 = arith.negf %126 : vector<2x256xf32>
    %128 = math.exp %127 : vector<2x256xf32>
    %cst_46 = arith.constant 1.000000e+00 : f32
    %129 = vector.broadcast %cst_46 : f32 to vector<2x256xf32>
    %130 = arith.addf %129, %128 : vector<2x256xf32>
    %131 = arith.divf %129, %130 : vector<2x256xf32>
    %132 = vector.extract_strided_slice %131 {offsets = [0, 0], sizes = [2, 128], strides = [1, 1]} : vector<2x256xf32> to vector<2x128xf32>
    %133 = vector.extract_strided_slice %131 {offsets = [0, 128], sizes = [2, 128], strides = [1, 1]} : vector<2x256xf32> to vector<2x128xf32>
    %134 = vector.extract_strided_slice %125 {offsets = [0, 256], sizes = [2, 128], strides = [1, 1]} : vector<2x512xf32> to vector<2x128xf32>
    %135 = math.tanh %134 : vector<2x128xf32>
    %136 = vector.extract_strided_slice %125 {offsets = [0, 384], sizes = [2, 128], strides = [1, 1]} : vector<2x512xf32> to vector<2x128xf32>
    %137 = arith.negf %136 : vector<2x128xf32>
    %138 = math.exp %137 : vector<2x128xf32>
    %cst_47 = arith.constant 1.000000e+00 : f32
    %139 = vector.broadcast %cst_47 : f32 to vector<2x128xf32>
    %140 = arith.addf %139, %138 : vector<2x128xf32>
    %141 = arith.divf %139, %140 : vector<2x128xf32>
    %142 = arith.mulf %133, %116 : vector<2x128xf32>
    %143 = arith.mulf %132, %135 : vector<2x128xf32>
    %144 = arith.addf %142, %143 : vector<2x128xf32>
    %145 = math.tanh %144 : vector<2x128xf32>
    %146 = arith.mulf %141, %145 : vector<2x128xf32>
    %147 = arith.truncf %146 : vector<2x128xf32> to vector<2x128xbf16>
    %c8_48 = arith.constant 8 : index
    %c0_49 = arith.constant 0 : index
    %148 = vector.load %arg11[%c8_48, %c0_49] : memref<16x128xbf16, #tpu.memory_space<vmem>>, vector<2x128xbf16>
    tpu.vector_store %arg11[%c8_48, %c0_49], %147 {strides = array<i32>} : memref<16x128xbf16, #tpu.memory_space<vmem>>, vector<2x128xbf16>,
    %c10 = arith.constant 10 : index
    %c0_50 = arith.constant 0 : index
    %149 = vector.load %arg10[%c10, %c0_50] : memref<16x512xf32, #tpu.memory_space<vmem>>, vector<2x512xf32>
    %150 = arith.truncf %146 : vector<2x128xf32> to vector<2x128xbf16>
    %c0_51 = arith.constant 0 : index
    %c0_52 = arith.constant 0 : index
    %151 = vector.load %arg2[%c0_51, %c0_52] : memref<128x512xbf16, #tpu.memory_space<vmem>>, vector<128x512xbf16>
    %cst_53 = arith.constant dense<0.000000e+00> : vector<2x512xf32>
    %152 = tpu.matmul %150, %151, %cst_53 {dimension_numbers = #tpu.dot_dimension_numbers<[1], [0], [0], [1], [0, 0, 1, 1], [], []>} : vector<2x128xbf16>, vector<128x512xbf16>, vector<2x512xf32> -> vector<2x512xf32>
    %153 = arith.addf %149, %152 : vector<2x512xf32>
    %154 = vector.extract_strided_slice %153 {offsets = [0, 0], sizes = [2, 256], strides = [1, 1]} : vector<2x512xf32> to vector<2x256xf32>
    %155 = arith.negf %154 : vector<2x256xf32>
    %156 = math.exp %155 : vector<2x256xf32>
    %cst_54 = arith.constant 1.000000e+00 : f32
    %157 = vector.broadcast %cst_54 : f32 to vector<2x256xf32>
    %158 = arith.addf %157, %156 : vector<2x256xf32>
    %159 = arith.divf %157, %158 : vector<2x256xf32>
    %160 = vector.extract_strided_slice %159 {offsets = [0, 0], sizes = [2, 128], strides = [1, 1]} : vector<2x256xf32> to vector<2x128xf32>
    %161 = vector.extract_strided_slice %159 {offsets = [0, 128], sizes = [2, 128], strides = [1, 1]} : vector<2x256xf32> to vector<2x128xf32>
    %162 = vector.extract_strided_slice %153 {offsets = [0, 256], sizes = [2, 128], strides = [1, 1]} : vector<2x512xf32> to vector<2x128xf32>
    %163 = math.tanh %162 : vector<2x128xf32>
    %164 = vector.extract_strided_slice %153 {offsets = [0, 384], sizes = [2, 128], strides = [1, 1]} : vector<2x512xf32> to vector<2x128xf32>
    %165 = arith.negf %164 : vector<2x128xf32>
    %166 = math.exp %165 : vector<2x128xf32>
    %cst_55 = arith.constant 1.000000e+00 : f32
    %167 = vector.broadcast %cst_55 : f32 to vector<2x128xf32>
    %168 = arith.addf %167, %166 : vector<2x128xf32>
    %169 = arith.divf %167, %168 : vector<2x128xf32>
    %170 = arith.mulf %161, %144 : vector<2x128xf32>
    %171 = arith.mulf %160, %163 : vector<2x128xf32>
    %172 = arith.addf %170, %171 : vector<2x128xf32>
    %173 = math.tanh %172 : vector<2x128xf32>
    %174 = arith.mulf %169, %173 : vector<2x128xf32>
    %175 = arith.truncf %174 : vector<2x128xf32> to vector<2x128xbf16>
    %c10_56 = arith.constant 10 : index
    %c0_57 = arith.constant 0 : index
    %176 = vector.load %arg11[%c10_56, %c0_57] : memref<16x128xbf16, #tpu.memory_space<vmem>>, vector<2x128xbf16>
    tpu.vector_store %arg11[%c10_56, %c0_57], %175 {strides = array<i32>} : memref<16x128xbf16, #tpu.memory_space<vmem>>, vector<2x128xbf16>,
    %c12 = arith.constant 12 : index
    %c0_58 = arith.constant 0 : index
    %177 = vector.load %arg10[%c12, %c0_58] : memref<16x512xf32, #tpu.memory_space<vmem>>, vector<2x512xf32>
    %178 = arith.truncf %174 : vector<2x128xf32> to vector<2x128xbf16>
    %c0_59 = arith.constant 0 : index
    %c0_60 = arith.constant 0 : index
    %179 = vector.load %arg2[%c0_59, %c0_60] : memref<128x512xbf16, #tpu.memory_space<vmem>>, vector<128x512xbf16>
    %cst_61 = arith.constant dense<0.000000e+00> : vector<2x512xf32>
    %180 = tpu.matmul %178, %179, %cst_61 {dimension_numbers = #tpu.dot_dimension_numbers<[1], [0], [0], [1], [0, 0, 1, 1], [], []>} : vector<2x128xbf16>, vector<128x512xbf16>, vector<2x512xf32> -> vector<2x512xf32>
    %181 = arith.addf %177, %180 : vector<2x512xf32>
    %182 = vector.extract_strided_slice %181 {offsets = [0, 0], sizes = [2, 256], strides = [1, 1]} : vector<2x512xf32> to vector<2x256xf32>
    %183 = arith.negf %182 : vector<2x256xf32>
    %184 = math.exp %183 : vector<2x256xf32>
    %cst_62 = arith.constant 1.000000e+00 : f32
    %185 = vector.broadcast %cst_62 : f32 to vector<2x256xf32>
    %186 = arith.addf %185, %184 : vector<2x256xf32>
    %187 = arith.divf %185, %186 : vector<2x256xf32>
    %188 = vector.extract_strided_slice %187 {offsets = [0, 0], sizes = [2, 128], strides = [1, 1]} : vector<2x256xf32> to vector<2x128xf32>
    %189 = vector.extract_strided_slice %187 {offsets = [0, 128], sizes = [2, 128], strides = [1, 1]} : vector<2x256xf32> to vector<2x128xf32>
    %190 = vector.extract_strided_slice %181 {offsets = [0, 256], sizes = [2, 128], strides = [1, 1]} : vector<2x512xf32> to vector<2x128xf32>
    %191 = math.tanh %190 : vector<2x128xf32>
    %192 = vector.extract_strided_slice %181 {offsets = [0, 384], sizes = [2, 128], strides = [1, 1]} : vector<2x512xf32> to vector<2x128xf32>
    %193 = arith.negf %192 : vector<2x128xf32>
    %194 = math.exp %193 : vector<2x128xf32>
    %cst_63 = arith.constant 1.000000e+00 : f32
    %195 = vector.broadcast %cst_63 : f32 to vector<2x128xf32>
    %196 = arith.addf %195, %194 : vector<2x128xf32>
    %197 = arith.divf %195, %196 : vector<2x128xf32>
    %198 = arith.mulf %189, %172 : vector<2x128xf32>
    %199 = arith.mulf %188, %191 : vector<2x128xf32>
    %200 = arith.addf %198, %199 : vector<2x128xf32>
    %201 = math.tanh %200 : vector<2x128xf32>
    %202 = arith.mulf %197, %201 : vector<2x128xf32>
    %203 = arith.truncf %202 : vector<2x128xf32> to vector<2x128xbf16>
    %c12_64 = arith.constant 12 : index
    %c0_65 = arith.constant 0 : index
    %204 = vector.load %arg11[%c12_64, %c0_65] : memref<16x128xbf16, #tpu.memory_space<vmem>>, vector<2x128xbf16>
    tpu.vector_store %arg11[%c12_64, %c0_65], %203 {strides = array<i32>} : memref<16x128xbf16, #tpu.memory_space<vmem>>, vector<2x128xbf16>,
    %c14 = arith.constant 14 : index
    %c0_66 = arith.constant 0 : index
    %205 = vector.load %arg10[%c14, %c0_66] : memref<16x512xf32, #tpu.memory_space<vmem>>, vector<2x512xf32>
    %206 = arith.truncf %202 : vector<2x128xf32> to vector<2x128xbf16>
    %c0_67 = arith.constant 0 : index
    %c0_68 = arith.constant 0 : index
    %207 = vector.load %arg2[%c0_67, %c0_68] : memref<128x512xbf16, #tpu.memory_space<vmem>>, vector<128x512xbf16>
    %cst_69 = arith.constant dense<0.000000e+00> : vector<2x512xf32>
    %208 = tpu.matmul %206, %207, %cst_69 {dimension_numbers = #tpu.dot_dimension_numbers<[1], [0], [0], [1], [0, 0, 1, 1], [], []>} : vector<2x128xbf16>, vector<128x512xbf16>, vector<2x512xf32> -> vector<2x512xf32>
    %209 = arith.addf %205, %208 : vector<2x512xf32>
    %210 = vector.extract_strided_slice %209 {offsets = [0, 0], sizes = [2, 256], strides = [1, 1]} : vector<2x512xf32> to vector<2x256xf32>
    %211 = arith.negf %210 : vector<2x256xf32>
    %212 = math.exp %211 : vector<2x256xf32>
    %cst_70 = arith.constant 1.000000e+00 : f32
    %213 = vector.broadcast %cst_70 : f32 to vector<2x256xf32>
    %214 = arith.addf %213, %212 : vector<2x256xf32>
    %215 = arith.divf %213, %214 : vector<2x256xf32>
    %216 = vector.extract_strided_slice %215 {offsets = [0, 0], sizes = [2, 128], strides = [1, 1]} : vector<2x256xf32> to vector<2x128xf32>
    %217 = vector.extract_strided_slice %215 {offsets = [0, 128], sizes = [2, 128], strides = [1, 1]} : vector<2x256xf32> to vector<2x128xf32>
    %218 = vector.extract_strided_slice %209 {offsets = [0, 256], sizes = [2, 128], strides = [1, 1]} : vector<2x512xf32> to vector<2x128xf32>
    %219 = math.tanh %218 : vector<2x128xf32>
    %220 = vector.extract_strided_slice %209 {offsets = [0, 384], sizes = [2, 128], strides = [1, 1]} : vector<2x512xf32> to vector<2x128xf32>
    %221 = arith.negf %220 : vector<2x128xf32>
    %222 = math.exp %221 : vector<2x128xf32>
    %cst_71 = arith.constant 1.000000e+00 : f32
    %223 = vector.broadcast %cst_71 : f32 to vector<2x128xf32>
    %224 = arith.addf %223, %222 : vector<2x128xf32>
    %225 = arith.divf %223, %224 : vector<2x128xf32>
    %226 = arith.mulf %217, %200 : vector<2x128xf32>
    %227 = arith.mulf %216, %219 : vector<2x128xf32>
    %228 = arith.addf %226, %227 : vector<2x128xf32>
    %229 = math.tanh %228 : vector<2x128xf32>
    %230 = arith.mulf %225, %229 : vector<2x128xf32>
    %231 = arith.truncf %230 : vector<2x128xf32> to vector<2x128xbf16>
    %c14_72 = arith.constant 14 : index
    %c0_73 = arith.constant 0 : index
    %232 = vector.load %arg11[%c14_72, %c0_73] : memref<16x128xbf16, #tpu.memory_space<vmem>>, vector<2x128xbf16>
    tpu.vector_store %arg11[%c14_72, %c0_73], %231 {strides = array<i32>} : memref<16x128xbf16, #tpu.memory_space<vmem>>, vector<2x128xbf16>,
    %c0_74 = arith.constant 0 : index
    %c0_75 = arith.constant 0 : index
    %233 = vector.load %arg11[%c0_74, %c0_75] : memref<16x128xbf16, #tpu.memory_space<vmem>>, vector<16x128xbf16>
    %c0_76 = arith.constant 0 : index
    %c0_77 = arith.constant 0 : index
    %234 = vector.load %arg4[%c0_76, %c0_77] : memref<128x512xbf16, #tpu.memory_space<vmem>>, vector<128x512xbf16>
    %cst_78 = arith.constant dense<0.000000e+00> : vector<16x512xf32>
    %235 = tpu.matmul %233, %234, %cst_78 {dimension_numbers = #tpu.dot_dimension_numbers<[1], [0], [0], [1], [0, 0, 1, 1], [], []>} : vector<16x128xbf16>, vector<128x512xbf16>, vector<16x512xf32> -> vector<16x512xf32>
    %c0_79 = arith.constant 0 : index
    %c0_80 = arith.constant 0 : index
    %236 = vector.load %arg6[%c0_79, %c0_80] : memref<1x512xf32, #tpu.memory_space<vmem>>, vector<1x512xf32>
    %237 = vector.broadcast %236 : vector<1x512xf32> to vector<16x512xf32>
    %238 = arith.addf %235, %237 : vector<16x512xf32>
    %c0_81 = arith.constant 0 : index
    %c0_82 = arith.constant 0 : index
    %239 = vector.load %arg10[%c0_81, %c0_82] : memref<16x512xf32, #tpu.memory_space<vmem>>, vector<16x512xf32>
    tpu.vector_store %arg10[%c0_81, %c0_82], %238 {strides = array<i32>} : memref<16x512xf32, #tpu.memory_space<vmem>>, vector<16x512xf32>,
    %cst_83 = arith.constant 0.000000e+00 : f32
    %240 = vector.broadcast %cst_83 : f32 to vector<2x128xf32>
    %cst_84 = arith.constant 0.000000e+00 : f32
    %241 = vector.broadcast %cst_84 : f32 to vector<2x128xf32>
    %c0_85 = arith.constant 0 : index
    %c0_86 = arith.constant 0 : index
    %242 = vector.load %arg10[%c0_85, %c0_86] : memref<16x512xf32, #tpu.memory_space<vmem>>, vector<2x512xf32>
    %243 = arith.truncf %240 : vector<2x128xf32> to vector<2x128xbf16>
    %c0_87 = arith.constant 0 : index
    %c0_88 = arith.constant 0 : index
    %244 = vector.load %arg5[%c0_87, %c0_88] : memref<128x512xbf16, #tpu.memory_space<vmem>>, vector<128x512xbf16>
    %cst_89 = arith.constant dense<0.000000e+00> : vector<2x512xf32>
    %245 = tpu.matmul %243, %244, %cst_89 {dimension_numbers = #tpu.dot_dimension_numbers<[1], [0], [0], [1], [0, 0, 1, 1], [], []>} : vector<2x128xbf16>, vector<128x512xbf16>, vector<2x512xf32> -> vector<2x512xf32>
    %246 = arith.addf %242, %245 : vector<2x512xf32>
    %247 = vector.extract_strided_slice %246 {offsets = [0, 0], sizes = [2, 256], strides = [1, 1]} : vector<2x512xf32> to vector<2x256xf32>
    %248 = arith.negf %247 : vector<2x256xf32>
    %249 = math.exp %248 : vector<2x256xf32>
    %cst_90 = arith.constant 1.000000e+00 : f32
    %250 = vector.broadcast %cst_90 : f32 to vector<2x256xf32>
    %251 = arith.addf %250, %249 : vector<2x256xf32>
    %252 = arith.divf %250, %251 : vector<2x256xf32>
    %253 = vector.extract_strided_slice %252 {offsets = [0, 0], sizes = [2, 128], strides = [1, 1]} : vector<2x256xf32> to vector<2x128xf32>
    %254 = vector.extract_strided_slice %252 {offsets = [0, 128], sizes = [2, 128], strides = [1, 1]} : vector<2x256xf32> to vector<2x128xf32>
    %255 = vector.extract_strided_slice %246 {offsets = [0, 256], sizes = [2, 128], strides = [1, 1]} : vector<2x512xf32> to vector<2x128xf32>
    %256 = math.tanh %255 : vector<2x128xf32>
    %257 = vector.extract_strided_slice %246 {offsets = [0, 384], sizes = [2, 128], strides = [1, 1]} : vector<2x512xf32> to vector<2x128xf32>
    %258 = arith.negf %257 : vector<2x128xf32>
    %259 = math.exp %258 : vector<2x128xf32>
    %cst_91 = arith.constant 1.000000e+00 : f32
    %260 = vector.broadcast %cst_91 : f32 to vector<2x128xf32>
    %261 = arith.addf %260, %259 : vector<2x128xf32>
    %262 = arith.divf %260, %261 : vector<2x128xf32>
    %263 = arith.mulf %254, %241 : vector<2x128xf32>
    %264 = arith.mulf %253, %256 : vector<2x128xf32>
    %265 = arith.addf %263, %264 : vector<2x128xf32>
    %266 = math.tanh %265 : vector<2x128xf32>
    %267 = arith.mulf %262, %266 : vector<2x128xf32>
    %c2_92 = arith.constant 2 : index
    %c0_93 = arith.constant 0 : index
    %268 = vector.load %arg10[%c2_92, %c0_93] : memref<16x512xf32, #tpu.memory_space<vmem>>, vector<2x512xf32>
    %269 = arith.truncf %267 : vector<2x128xf32> to vector<2x128xbf16>
    %c0_94 = arith.constant 0 : index
    %c0_95 = arith.constant 0 : index
    %270 = vector.load %arg5[%c0_94, %c0_95] : memref<128x512xbf16, #tpu.memory_space<vmem>>, vector<128x512xbf16>
    %cst_96 = arith.constant dense<0.000000e+00> : vector<2x512xf32>
    %271 = tpu.matmul %269, %270, %cst_96 {dimension_numbers = #tpu.dot_dimension_numbers<[1], [0], [0], [1], [0, 0, 1, 1], [], []>} : vector<2x128xbf16>, vector<128x512xbf16>, vector<2x512xf32> -> vector<2x512xf32>
    %272 = arith.addf %268, %271 : vector<2x512xf32>
    %273 = vector.extract_strided_slice %272 {offsets = [0, 0], sizes = [2, 256], strides = [1, 1]} : vector<2x512xf32> to vector<2x256xf32>
    %274 = arith.negf %273 : vector<2x256xf32>
    %275 = math.exp %274 : vector<2x256xf32>
    %cst_97 = arith.constant 1.000000e+00 : f32
    %276 = vector.broadcast %cst_97 : f32 to vector<2x256xf32>
    %277 = arith.addf %276, %275 : vector<2x256xf32>
    %278 = arith.divf %276, %277 : vector<2x256xf32>
    %279 = vector.extract_strided_slice %278 {offsets = [0, 0], sizes = [2, 128], strides = [1, 1]} : vector<2x256xf32> to vector<2x128xf32>
    %280 = vector.extract_strided_slice %278 {offsets = [0, 128], sizes = [2, 128], strides = [1, 1]} : vector<2x256xf32> to vector<2x128xf32>
    %281 = vector.extract_strided_slice %272 {offsets = [0, 256], sizes = [2, 128], strides = [1, 1]} : vector<2x512xf32> to vector<2x128xf32>
    %282 = math.tanh %281 : vector<2x128xf32>
    %283 = vector.extract_strided_slice %272 {offsets = [0, 384], sizes = [2, 128], strides = [1, 1]} : vector<2x512xf32> to vector<2x128xf32>
    %284 = arith.negf %283 : vector<2x128xf32>
    %285 = math.exp %284 : vector<2x128xf32>
    %cst_98 = arith.constant 1.000000e+00 : f32
    %286 = vector.broadcast %cst_98 : f32 to vector<2x128xf32>
    %287 = arith.addf %286, %285 : vector<2x128xf32>
    %288 = arith.divf %286, %287 : vector<2x128xf32>
    %289 = arith.mulf %280, %265 : vector<2x128xf32>
    %290 = arith.mulf %279, %282 : vector<2x128xf32>
    %291 = arith.addf %289, %290 : vector<2x128xf32>
    %292 = math.tanh %291 : vector<2x128xf32>
    %293 = arith.mulf %288, %292 : vector<2x128xf32>
    %c4_99 = arith.constant 4 : index
    %c0_100 = arith.constant 0 : index
    %294 = vector.load %arg10[%c4_99, %c0_100] : memref<16x512xf32, #tpu.memory_space<vmem>>, vector<2x512xf32>
    %295 = arith.truncf %293 : vector<2x128xf32> to vector<2x128xbf16>
    %c0_101 = arith.constant 0 : index
    %c0_102 = arith.constant 0 : index
    %296 = vector.load %arg5[%c0_101, %c0_102] : memref<128x512xbf16, #tpu.memory_space<vmem>>, vector<128x512xbf16>
    %cst_103 = arith.constant dense<0.000000e+00> : vector<2x512xf32>
    %297 = tpu.matmul %295, %296, %cst_103 {dimension_numbers = #tpu.dot_dimension_numbers<[1], [0], [0], [1], [0, 0, 1, 1], [], []>} : vector<2x128xbf16>, vector<128x512xbf16>, vector<2x512xf32> -> vector<2x512xf32>
    %298 = arith.addf %294, %297 : vector<2x512xf32>
    %299 = vector.extract_strided_slice %298 {offsets = [0, 0], sizes = [2, 256], strides = [1, 1]} : vector<2x512xf32> to vector<2x256xf32>
    %300 = arith.negf %299 : vector<2x256xf32>
    %301 = math.exp %300 : vector<2x256xf32>
    %cst_104 = arith.constant 1.000000e+00 : f32
    %302 = vector.broadcast %cst_104 : f32 to vector<2x256xf32>
    %303 = arith.addf %302, %301 : vector<2x256xf32>
    %304 = arith.divf %302, %303 : vector<2x256xf32>
    %305 = vector.extract_strided_slice %304 {offsets = [0, 0], sizes = [2, 128], strides = [1, 1]} : vector<2x256xf32> to vector<2x128xf32>
    %306 = vector.extract_strided_slice %304 {offsets = [0, 128], sizes = [2, 128], strides = [1, 1]} : vector<2x256xf32> to vector<2x128xf32>
    %307 = vector.extract_strided_slice %298 {offsets = [0, 256], sizes = [2, 128], strides = [1, 1]} : vector<2x512xf32> to vector<2x128xf32>
    %308 = math.tanh %307 : vector<2x128xf32>
    %309 = vector.extract_strided_slice %298 {offsets = [0, 384], sizes = [2, 128], strides = [1, 1]} : vector<2x512xf32> to vector<2x128xf32>
    %310 = arith.negf %309 : vector<2x128xf32>
    %311 = math.exp %310 : vector<2x128xf32>
    %cst_105 = arith.constant 1.000000e+00 : f32
    %312 = vector.broadcast %cst_105 : f32 to vector<2x128xf32>
    %313 = arith.addf %312, %311 : vector<2x128xf32>
    %314 = arith.divf %312, %313 : vector<2x128xf32>
    %315 = arith.mulf %306, %291 : vector<2x128xf32>
    %316 = arith.mulf %305, %308 : vector<2x128xf32>
    %317 = arith.addf %315, %316 : vector<2x128xf32>
    %318 = math.tanh %317 : vector<2x128xf32>
    %319 = arith.mulf %314, %318 : vector<2x128xf32>
    %c6_106 = arith.constant 6 : index
    %c0_107 = arith.constant 0 : index
    %320 = vector.load %arg10[%c6_106, %c0_107] : memref<16x512xf32, #tpu.memory_space<vmem>>, vector<2x512xf32>
    %321 = arith.truncf %319 : vector<2x128xf32> to vector<2x128xbf16>
    %c0_108 = arith.constant 0 : index
    %c0_109 = arith.constant 0 : index
    %322 = vector.load %arg5[%c0_108, %c0_109] : memref<128x512xbf16, #tpu.memory_space<vmem>>, vector<128x512xbf16>
    %cst_110 = arith.constant dense<0.000000e+00> : vector<2x512xf32>
    %323 = tpu.matmul %321, %322, %cst_110 {dimension_numbers = #tpu.dot_dimension_numbers<[1], [0], [0], [1], [0, 0, 1, 1], [], []>} : vector<2x128xbf16>, vector<128x512xbf16>, vector<2x512xf32> -> vector<2x512xf32>
    %324 = arith.addf %320, %323 : vector<2x512xf32>
    %325 = vector.extract_strided_slice %324 {offsets = [0, 0], sizes = [2, 256], strides = [1, 1]} : vector<2x512xf32> to vector<2x256xf32>
    %326 = arith.negf %325 : vector<2x256xf32>
    %327 = math.exp %326 : vector<2x256xf32>
    %cst_111 = arith.constant 1.000000e+00 : f32
    %328 = vector.broadcast %cst_111 : f32 to vector<2x256xf32>
    %329 = arith.addf %328, %327 : vector<2x256xf32>
    %330 = arith.divf %328, %329 : vector<2x256xf32>
    %331 = vector.extract_strided_slice %330 {offsets = [0, 0], sizes = [2, 128], strides = [1, 1]} : vector<2x256xf32> to vector<2x128xf32>
    %332 = vector.extract_strided_slice %330 {offsets = [0, 128], sizes = [2, 128], strides = [1, 1]} : vector<2x256xf32> to vector<2x128xf32>
    %333 = vector.extract_strided_slice %324 {offsets = [0, 256], sizes = [2, 128], strides = [1, 1]} : vector<2x512xf32> to vector<2x128xf32>
    %334 = math.tanh %333 : vector<2x128xf32>
    %335 = vector.extract_strided_slice %324 {offsets = [0, 384], sizes = [2, 128], strides = [1, 1]} : vector<2x512xf32> to vector<2x128xf32>
    %336 = arith.negf %335 : vector<2x128xf32>
    %337 = math.exp %336 : vector<2x128xf32>
    %cst_112 = arith.constant 1.000000e+00 : f32
    %338 = vector.broadcast %cst_112 : f32 to vector<2x128xf32>
    %339 = arith.addf %338, %337 : vector<2x128xf32>
    %340 = arith.divf %338, %339 : vector<2x128xf32>
    %341 = arith.mulf %332, %317 : vector<2x128xf32>
    %342 = arith.mulf %331, %334 : vector<2x128xf32>
    %343 = arith.addf %341, %342 : vector<2x128xf32>
    %344 = math.tanh %343 : vector<2x128xf32>
    %345 = arith.mulf %340, %344 : vector<2x128xf32>
    %c8_113 = arith.constant 8 : index
    %c0_114 = arith.constant 0 : index
    %346 = vector.load %arg10[%c8_113, %c0_114] : memref<16x512xf32, #tpu.memory_space<vmem>>, vector<2x512xf32>
    %347 = arith.truncf %345 : vector<2x128xf32> to vector<2x128xbf16>
    %c0_115 = arith.constant 0 : index
    %c0_116 = arith.constant 0 : index
    %348 = vector.load %arg5[%c0_115, %c0_116] : memref<128x512xbf16, #tpu.memory_space<vmem>>, vector<128x512xbf16>
    %cst_117 = arith.constant dense<0.000000e+00> : vector<2x512xf32>
    %349 = tpu.matmul %347, %348, %cst_117 {dimension_numbers = #tpu.dot_dimension_numbers<[1], [0], [0], [1], [0, 0, 1, 1], [], []>} : vector<2x128xbf16>, vector<128x512xbf16>, vector<2x512xf32> -> vector<2x512xf32>
    %350 = arith.addf %346, %349 : vector<2x512xf32>
    %351 = vector.extract_strided_slice %350 {offsets = [0, 0], sizes = [2, 256], strides = [1, 1]} : vector<2x512xf32> to vector<2x256xf32>
    %352 = arith.negf %351 : vector<2x256xf32>
    %353 = math.exp %352 : vector<2x256xf32>
    %cst_118 = arith.constant 1.000000e+00 : f32
    %354 = vector.broadcast %cst_118 : f32 to vector<2x256xf32>
    %355 = arith.addf %354, %353 : vector<2x256xf32>
    %356 = arith.divf %354, %355 : vector<2x256xf32>
    %357 = vector.extract_strided_slice %356 {offsets = [0, 0], sizes = [2, 128], strides = [1, 1]} : vector<2x256xf32> to vector<2x128xf32>
    %358 = vector.extract_strided_slice %356 {offsets = [0, 128], sizes = [2, 128], strides = [1, 1]} : vector<2x256xf32> to vector<2x128xf32>
    %359 = vector.extract_strided_slice %350 {offsets = [0, 256], sizes = [2, 128], strides = [1, 1]} : vector<2x512xf32> to vector<2x128xf32>
    %360 = math.tanh %359 : vector<2x128xf32>
    %361 = vector.extract_strided_slice %350 {offsets = [0, 384], sizes = [2, 128], strides = [1, 1]} : vector<2x512xf32> to vector<2x128xf32>
    %362 = arith.negf %361 : vector<2x128xf32>
    %363 = math.exp %362 : vector<2x128xf32>
    %cst_119 = arith.constant 1.000000e+00 : f32
    %364 = vector.broadcast %cst_119 : f32 to vector<2x128xf32>
    %365 = arith.addf %364, %363 : vector<2x128xf32>
    %366 = arith.divf %364, %365 : vector<2x128xf32>
    %367 = arith.mulf %358, %343 : vector<2x128xf32>
    %368 = arith.mulf %357, %360 : vector<2x128xf32>
    %369 = arith.addf %367, %368 : vector<2x128xf32>
    %370 = math.tanh %369 : vector<2x128xf32>
    %371 = arith.mulf %366, %370 : vector<2x128xf32>
    %c10_120 = arith.constant 10 : index
    %c0_121 = arith.constant 0 : index
    %372 = vector.load %arg10[%c10_120, %c0_121] : memref<16x512xf32, #tpu.memory_space<vmem>>, vector<2x512xf32>
    %373 = arith.truncf %371 : vector<2x128xf32> to vector<2x128xbf16>
    %c0_122 = arith.constant 0 : index
    %c0_123 = arith.constant 0 : index
    %374 = vector.load %arg5[%c0_122, %c0_123] : memref<128x512xbf16, #tpu.memory_space<vmem>>, vector<128x512xbf16>
    %cst_124 = arith.constant dense<0.000000e+00> : vector<2x512xf32>
    %375 = tpu.matmul %373, %374, %cst_124 {dimension_numbers = #tpu.dot_dimension_numbers<[1], [0], [0], [1], [0, 0, 1, 1], [], []>} : vector<2x128xbf16>, vector<128x512xbf16>, vector<2x512xf32> -> vector<2x512xf32>
    %376 = arith.addf %372, %375 : vector<2x512xf32>
    %377 = vector.extract_strided_slice %376 {offsets = [0, 0], sizes = [2, 256], strides = [1, 1]} : vector<2x512xf32> to vector<2x256xf32>
    %378 = arith.negf %377 : vector<2x256xf32>
    %379 = math.exp %378 : vector<2x256xf32>
    %cst_125 = arith.constant 1.000000e+00 : f32
    %380 = vector.broadcast %cst_125 : f32 to vector<2x256xf32>
    %381 = arith.addf %380, %379 : vector<2x256xf32>
    %382 = arith.divf %380, %381 : vector<2x256xf32>
    %383 = vector.extract_strided_slice %382 {offsets = [0, 0], sizes = [2, 128], strides = [1, 1]} : vector<2x256xf32> to vector<2x128xf32>
    %384 = vector.extract_strided_slice %382 {offsets = [0, 128], sizes = [2, 128], strides = [1, 1]} : vector<2x256xf32> to vector<2x128xf32>
    %385 = vector.extract_strided_slice %376 {offsets = [0, 256], sizes = [2, 128], strides = [1, 1]} : vector<2x512xf32> to vector<2x128xf32>
    %386 = math.tanh %385 : vector<2x128xf32>
    %387 = vector.extract_strided_slice %376 {offsets = [0, 384], sizes = [2, 128], strides = [1, 1]} : vector<2x512xf32> to vector<2x128xf32>
    %388 = arith.negf %387 : vector<2x128xf32>
    %389 = math.exp %388 : vector<2x128xf32>
    %cst_126 = arith.constant 1.000000e+00 : f32
    %390 = vector.broadcast %cst_126 : f32 to vector<2x128xf32>
    %391 = arith.addf %390, %389 : vector<2x128xf32>
    %392 = arith.divf %390, %391 : vector<2x128xf32>
    %393 = arith.mulf %384, %369 : vector<2x128xf32>
    %394 = arith.mulf %383, %386 : vector<2x128xf32>
    %395 = arith.addf %393, %394 : vector<2x128xf32>
    %396 = math.tanh %395 : vector<2x128xf32>
    %397 = arith.mulf %392, %396 : vector<2x128xf32>
    %c12_127 = arith.constant 12 : index
    %c0_128 = arith.constant 0 : index
    %398 = vector.load %arg10[%c12_127, %c0_128] : memref<16x512xf32, #tpu.memory_space<vmem>>, vector<2x512xf32>
    %399 = arith.truncf %397 : vector<2x128xf32> to vector<2x128xbf16>
    %c0_129 = arith.constant 0 : index
    %c0_130 = arith.constant 0 : index
    %400 = vector.load %arg5[%c0_129, %c0_130] : memref<128x512xbf16, #tpu.memory_space<vmem>>, vector<128x512xbf16>
    %cst_131 = arith.constant dense<0.000000e+00> : vector<2x512xf32>
    %401 = tpu.matmul %399, %400, %cst_131 {dimension_numbers = #tpu.dot_dimension_numbers<[1], [0], [0], [1], [0, 0, 1, 1], [], []>} : vector<2x128xbf16>, vector<128x512xbf16>, vector<2x512xf32> -> vector<2x512xf32>
    %402 = arith.addf %398, %401 : vector<2x512xf32>
    %403 = vector.extract_strided_slice %402 {offsets = [0, 0], sizes = [2, 256], strides = [1, 1]} : vector<2x512xf32> to vector<2x256xf32>
    %404 = arith.negf %403 : vector<2x256xf32>
    %405 = math.exp %404 : vector<2x256xf32>
    %cst_132 = arith.constant 1.000000e+00 : f32
    %406 = vector.broadcast %cst_132 : f32 to vector<2x256xf32>
    %407 = arith.addf %406, %405 : vector<2x256xf32>
    %408 = arith.divf %406, %407 : vector<2x256xf32>
    %409 = vector.extract_strided_slice %408 {offsets = [0, 0], sizes = [2, 128], strides = [1, 1]} : vector<2x256xf32> to vector<2x128xf32>
    %410 = vector.extract_strided_slice %408 {offsets = [0, 128], sizes = [2, 128], strides = [1, 1]} : vector<2x256xf32> to vector<2x128xf32>
    %411 = vector.extract_strided_slice %402 {offsets = [0, 256], sizes = [2, 128], strides = [1, 1]} : vector<2x512xf32> to vector<2x128xf32>
    %412 = math.tanh %411 : vector<2x128xf32>
    %413 = vector.extract_strided_slice %402 {offsets = [0, 384], sizes = [2, 128], strides = [1, 1]} : vector<2x512xf32> to vector<2x128xf32>
    %414 = arith.negf %413 : vector<2x128xf32>
    %415 = math.exp %414 : vector<2x128xf32>
    %cst_133 = arith.constant 1.000000e+00 : f32
    %416 = vector.broadcast %cst_133 : f32 to vector<2x128xf32>
    %417 = arith.addf %416, %415 : vector<2x128xf32>
    %418 = arith.divf %416, %417 : vector<2x128xf32>
    %419 = arith.mulf %410, %395 : vector<2x128xf32>
    %420 = arith.mulf %409, %412 : vector<2x128xf32>
    %421 = arith.addf %419, %420 : vector<2x128xf32>
    %422 = math.tanh %421 : vector<2x128xf32>
    %423 = arith.mulf %418, %422 : vector<2x128xf32>
    %c14_134 = arith.constant 14 : index
    %c0_135 = arith.constant 0 : index
    %424 = vector.load %arg10[%c14_134, %c0_135] : memref<16x512xf32, #tpu.memory_space<vmem>>, vector<2x512xf32>
    %425 = arith.truncf %423 : vector<2x128xf32> to vector<2x128xbf16>
    %c0_136 = arith.constant 0 : index
    %c0_137 = arith.constant 0 : index
    %426 = vector.load %arg5[%c0_136, %c0_137] : memref<128x512xbf16, #tpu.memory_space<vmem>>, vector<128x512xbf16>
    %cst_138 = arith.constant dense<0.000000e+00> : vector<2x512xf32>
    %427 = tpu.matmul %425, %426, %cst_138 {dimension_numbers = #tpu.dot_dimension_numbers<[1], [0], [0], [1], [0, 0, 1, 1], [], []>} : vector<2x128xbf16>, vector<128x512xbf16>, vector<2x512xf32> -> vector<2x512xf32>
    %428 = arith.addf %424, %427 : vector<2x512xf32>
    %429 = vector.extract_strided_slice %428 {offsets = [0, 0], sizes = [2, 256], strides = [1, 1]} : vector<2x512xf32> to vector<2x256xf32>
    %430 = arith.negf %429 : vector<2x256xf32>
    %431 = math.exp %430 : vector<2x256xf32>
    %cst_139 = arith.constant 1.000000e+00 : f32
    %432 = vector.broadcast %cst_139 : f32 to vector<2x256xf32>
    %433 = arith.addf %432, %431 : vector<2x256xf32>
    %434 = arith.divf %432, %433 : vector<2x256xf32>
    %435 = vector.extract_strided_slice %434 {offsets = [0, 0], sizes = [2, 128], strides = [1, 1]} : vector<2x256xf32> to vector<2x128xf32>
    %436 = vector.extract_strided_slice %434 {offsets = [0, 128], sizes = [2, 128], strides = [1, 1]} : vector<2x256xf32> to vector<2x128xf32>
    %437 = vector.extract_strided_slice %428 {offsets = [0, 256], sizes = [2, 128], strides = [1, 1]} : vector<2x512xf32> to vector<2x128xf32>
    %438 = math.tanh %437 : vector<2x128xf32>
    %439 = vector.extract_strided_slice %428 {offsets = [0, 384], sizes = [2, 128], strides = [1, 1]} : vector<2x512xf32> to vector<2x128xf32>
    %440 = arith.negf %439 : vector<2x128xf32>
    %441 = math.exp %440 : vector<2x128xf32>
    %cst_140 = arith.constant 1.000000e+00 : f32
    %442 = vector.broadcast %cst_140 : f32 to vector<2x128xf32>
    %443 = arith.addf %442, %441 : vector<2x128xf32>
    %444 = arith.divf %442, %443 : vector<2x128xf32>
    %445 = arith.mulf %436, %421 : vector<2x128xf32>
    %446 = arith.mulf %435, %438 : vector<2x128xf32>
    %447 = arith.addf %445, %446 : vector<2x128xf32>
    %448 = math.tanh %447 : vector<2x128xf32>
    %449 = arith.mulf %444, %448 : vector<2x128xf32>
    %c0_141 = arith.constant 0 : index
    %c0_142 = arith.constant 0 : index
    %450 = vector.load %arg7[%c0_141, %c0_142] : memref<1x128xf32, #tpu.memory_space<vmem>>, vector<1x128xf32>
    %451 = vector.broadcast %450 : vector<1x128xf32> to vector<2x128xf32>
    %452 = arith.mulf %449, %451 : vector<2x128xf32>
    %cst_143 = arith.constant dense<0.000000e+00> : vector<2xf32>
    %453 = vector.multi_reduction <add>, %452, %cst_143 [1] : vector<2x128xf32> to vector<2xf32>
    %454 = vector.shape_cast %453 : vector<2xf32> to vector<2x1xf32>
    %c0_144 = arith.constant 0 : index
    %c0_145 = arith.constant 0 : index
    %455 = vector.load %arg8[%c0_144, %c0_145] : memref<1x1xf32, #tpu.memory_space<vmem>>, vector<1x1xf32>
    %456 = vector.broadcast %455 : vector<1x1xf32> to vector<2x1xf32>
    %457 = arith.addf %454, %456 : vector<2x1xf32>
    %c0_146 = arith.constant 0 : index
    %c0_147 = arith.constant 0 : index
    %458 = vector.load %arg9[%c0_146, %c0_147] : memref<2x1xf32, #tpu.memory_space<vmem>>, vector<2x1xf32>
    tpu.vector_store %arg9[%c0_146, %c0_147], %457 {strides = array<i32>} : memref<2x1xf32, #tpu.memory_space<vmem>>, vector<2x1xf32>,
    return
  }
}

</mosaic_0001>

<bundles_post_ra>
// kernel: lstm_forward.1
= control target key start
LH: loop header
LB: loop body
LE: loop exit
PB: predicated region body
PF: predicated region fallthrough
CT: control target
= control target key end

     0   :  { %vm80_vm0 = vcmask 1043456   ;;  %v5188_v2 = vmov 0   ;;  %vm76_vm1 = vcmask 64512   ;;  %v41_v42 = vlaneseq  ;;  %s6547_s1 = inlined_call_operand.vmem [shape: bf16[8,512], index: 1, kind: input, shape index: {}]   ;;  %s6548_s0 = inlined_call_operand.vmem [shape: bf16[16,8], index: 0, kind: input, shape index: {}]   ;;  %s6549_s2 = inlined_call_operand.vmem [shape: bf16[128,512], index: 2, kind: input, shape index: {}]   ;;  %s6550_s3 = inlined_call_operand.vmem [shape: f32[1,512], index: 3, kind: input, shape index: {}]   ;;  %s6551_s4 = inlined_call_operand.vmem [shape: bf16[128,512], index: 4, kind: input, shape index: {}]   ;;  %s6552_s5 = inlined_call_operand.vmem [shape: bf16[128,512], index: 5, kind: input, shape index: {}]   ;;  %s6553_s6 = inlined_call_operand.vmem [shape: f32[1,512], index: 6, kind: input, shape index: {}]   ;;  %s6554_s8 = inlined_call_operand.<no memory space> [shape: f32[1,1], index: 8, kind: input, shape index: {}]   ;;  %s6555_s7 = inlined_call_operand.vmem [shape: f32[1,128], index: 7, kind: input, shape index: {}]   ;;  %s6556_s9 = inlined_call_operand.vmem [shape: f32[2,1], index: 9, kind: output, shape index: {}]  }
   0x1   :  { %v37_v0 = vld [vmem:[%s6547_s1] sm:$0xff]  ;;  %v38_v1 = vld [vmem:[%s6547_s1 + $0x8] sm:$0xff]  ;;  %125 = vmatprep.mubr.bf16.mxu0 %v5188_v2  ;;  %168 = vmatprep.mubr.bf16.mxu1 %v5188_v2  ;;  %vm4305_vm2 = vcmask 1047558   ;;  %vm4317_vm3 = vcmask 7174  }
   0x2   :  { %v4325_v3 = vcombine.high %v37_v0, %v37_v0  ;;  %v4327_v4 = vcombine.high %v38_v1, %v38_v1  ;;  %v4324_v5 = vcombine.low %v37_v0, %v37_v0  ;;  %v4326_v6 = vcombine.low %v38_v1, %v38_v1  ;;  %v4707_v7 = vld [vmem:[%s6548_s0] sm:$0xff]   ;;  %v5263_v12 = vld [vmem:[%s6549_s2 + $0x8] ss:$16 sps:$4 sm:$0xff]   ;;  %v5268_v13 = vld [vmem:[%s6549_s2 + $0xc] ss:$16 sps:$4 sm:$0xff]  }
   0x3   :  { %v5253_v8 = vld [vmem:[%s6549_s2] ss:$16 sps:$4 sm:$0xff]   ;;  %v5258_v9 = vld [vmem:[%s6549_s2 + $0x4] ss:$16 sps:$4 sm:$0xff]   ;;  %v5280_v15 = vld [vmem:[%s6549_s2 + $0x2c] ss:$16 sps:$4 sm:$0xff]  }
   0x4   :  { %4328 = vmatprep.subr.msk.bf16.mxu0 %vm80_vm0, %v4325_v3  ;;  %4330 = vmatprep.subr.msk.bf16.mxu1 %vm80_vm0, %v4327_v4  ;;  %v82_v10 = vsel %vm80_vm0, %v4324_v5, 0  ;;  %v88_v11 = vsel %vm80_vm0, %v4326_v6, 0  ;;  %v5274_v14 = vld [vmem:[%s6549_s2 + $0x24] ss:$16 sps:$4 sm:$0xff]   ;;  %v5285_v16 = vld [vmem:[%s6549_s2 + $0x20] ss:$16 sps:$4 sm:$0xff]  }
   0x5   :  { %94 = vmatpush1.bf16.msra.mxu0 %v82_v10  ;;  %137 = vmatpush1.bf16.msra.mxu1 %v88_v11  ;;  %v5292_v17 = vld [vmem:[%s6549_s2 + $0x28] ss:$16 sps:$4 sm:$0xff]   ;;  %v5299_v18 = vld [vmem:[%s6549_s2 + $0x44] ss:$16 sps:$4 sm:$0xff]   ;;  %v5304_v19 = vld [vmem:[%s6549_s2 + $0x4c] ss:$16 sps:$4 sm:$0xff]  }
   0x6   :  { %383 = vmatprep.subr.bf16.mxu0 %v5258_v9  ;;  %424 = vmatprep.subr.bf16.mxu1 %v5268_v13  ;;  %v5311_v20 = vld [vmem:[%s6549_s2 + $0x40] ss:$16 sps:$4 sm:$0xff]   ;;  %v5318_v21 = vld [vmem:[%s6549_s2 + $0x48] ss:$16 sps:$4 sm:$0xff]   ;;  %v5325_v22 = vld [vmem:[%s6549_s2 + $0x64] ss:$16 sps:$4 sm:$0xff]  }
   0x7   :  { %v5330_v23 = vld [vmem:[%s6549_s2 + $0x6c] ss:$16 sps:$4 sm:$0xff]   ;;  %v5335_v24 = vld [vmem:[%s6549_s2 + $0x60] ss:$16 sps:$4 sm:$0xff]   ;;  %v5342_v25 = vld [vmem:[%s6549_s2 + $0x68] ss:$16 sps:$4 sm:$0xff]  }
   0x8   :  { %4329 = vmatmul.mubr.msk.bf16.vlgmr.msra.gmra.mrb[0].mxu0 %vm76_vm1, %v4707_v7  ;;  %4331 = vmatmul.mubr.msk.bf16.vlgmr.msra.gmra.mrb[0].mxu1 %vm76_vm1, %v4707_v7  ;;  %v5349_v26 = vld [vmem:[%s6549_s2 + $0x84] ss:$16 sps:$4 sm:$0xff]   ;;  %v5354_v27 = vld [vmem:[%s6549_s2 + $0x8c] ss:$16 sps:$4 sm:$0xff]   ;;  %v5359_v28 = vld [vmem:[%s6549_s2 + $0x80] ss:$16 sps:$4 sm:$0xff]  }
   0x9   :  { %384 = vmatpush1.bf16.msra.mxu0 %v5253_v8  ;;  %425 = vmatpush1.bf16.msra.mxu1 %v5263_v12  ;;  %v5366_v29 = vld [vmem:[%s6549_s2 + $0x88] ss:$16 sps:$4 sm:$0xff]   ;;  %v5373_v30 = vld [vmem:[%s6549_s2 + $0xa4] ss:$16 sps:$4 sm:$0xff]   ;;  %v5378_v31 = vld [vmem:[%s6549_s2 + $0xac] ss:$16 sps:$4 sm:$0xff]  }
   0xa   :  { %385 = vmatprep.subr.bf16.mxu0 %v5274_v14  ;;  %426 = vmatprep.subr.bf16.mxu1 %v5280_v15  ;;  %v5383_v32 = vld [vmem:[%s6549_s2 + $0xa0] ss:$16 sps:$4 sm:$0xff]   ;;  %v5388_v33 = vld [vmem:[%s6549_s2 + $0xa8] ss:$16 sps:$4 sm:$0xff]   ;;  %v5393_v34 = vld [vmem:[%s6549_s2 + $0xc4] ss:$16 sps:$4 sm:$0xff]  }
   0xb   :  { %415 = vmatprep.mubr.bf16.mxu0 %v5188_v2  ;;  %456 = vmatprep.mubr.bf16.mxu1 %v5188_v2  ;;  %v5398_v35 = vld [vmem:[%s6549_s2 + $0xcc] ss:$16 sps:$4 sm:$0xff]   ;;  %v5407_v36 = vld [vmem:[%s6549_s2 + $0xc0] ss:$16 sps:$4 sm:$0xff]   ;;  %v5412_v37 = vld [vmem:[%s6549_s2 + $0xc8] ss:$16 sps:$4 sm:$0xff]  }
   0xc   :  { %v5417_v38 = vld [vmem:[%s6549_s2 + $0xe4] ss:$16 sps:$4 sm:$0xff]   ;;  %v5422_v39 = vld [vmem:[%s6549_s2 + $0xec] ss:$16 sps:$4 sm:$0xff]   ;;  %v5431_v40 = vld [vmem:[%s6549_s2 + $0xe0] ss:$16 sps:$4 sm:$0xff]  }
   0xd   :  { %386 = vmatpush1.bf16.msra.mxu0 %v5285_v16  ;;  %427 = vmatpush1.bf16.msra.mxu1 %v5292_v17  ;;  %v5436_v41 = vld [vmem:[%s6549_s2 + $0xe8] ss:$16 sps:$4 sm:$0xff]   ;;  %v5482_v43 = vshrl.u32 %v41_v42, 7  ;;  %v39_v46 = vld [vmem:[%s6550_s3] sm:$0xf] }
   0xe   :  { %387 = vmatprep.subr.bf16.mxu0 %v5299_v18  ;;  %428 = vmatprep.subr.bf16.mxu1 %v5304_v19 }
   0xf   :  { %v43_v44 = vsub.s32 0, %v5482_v43  ;;  %v51_v45 = vsub.s32 2, %v5482_v43  ;;  %v47_v47 = vsub.s32 1, %v5482_v43  ;;  %v55_v48 = vsub.s32 3, %v5482_v43 }
  0x11   :  { %388 = vmatpush1.bf16.msra.mxu0 %v5311_v20  ;;  %429 = vmatpush1.bf16.msra.mxu1 %v5318_v21  ;;  %v44_v49 = vrot.slane %v39_v46, %v43_v44  ;;  %v52_v50 = vrot.slane %v39_v46, %v51_v45  ;;  %v48_v51 = vrot.slane %v39_v46, %v47_v47 }
  0x12   :  { %389 = vmatprep.subr.bf16.mxu0 %v5325_v22  ;;  %430 = vmatprep.subr.bf16.mxu1 %v5330_v23  ;;  %v56_v52 = vrot.slane %v39_v46, %v55_v48 }
  0x15   :  { %390 = vmatpush1.bf16.msra.mxu0 %v5335_v24  ;;  %431 = vmatpush1.bf16.msra.mxu1 %v5342_v25 }
  0x16   :  { %391 = vmatprep.subr.bf16.mxu0 %v5349_v26  ;;  %432 = vmatprep.subr.bf16.mxu1 %v5354_v27 }
  0x19   :  { %392 = vmatpush1.bf16.msra.mxu0 %v5359_v28  ;;  %433 = vmatpush1.bf16.msra.mxu1 %v5366_v29 }
  0x1a   :  { %393 = vmatprep.subr.bf16.mxu0 %v5373_v30  ;;  %434 = vmatprep.subr.bf16.mxu1 %v5378_v31 }
  0x1d   :  { %394 = vmatpush1.bf16.msra.mxu0 %v5383_v32  ;;  %435 = vmatpush1.bf16.msra.mxu1 %v5388_v33 }
  0x1e   :  { %395 = vmatprep.subr.bf16.mxu0 %v5393_v34  ;;  %436 = vmatprep.subr.bf16.mxu1 %v5398_v35 }
  0x21   :  { %396 = vmatpush1.bf16.msra.mxu0 %v5407_v36  ;;  %437 = vmatpush1.bf16.msra.mxu1 %v5412_v37 }
  0x22   :  { %397 = vmatprep.subr.bf16.mxu0 %v5417_v38  ;;  %438 = vmatprep.subr.bf16.mxu1 %v5422_v39 }
  0x25   :  { %398 = vmatpush1.bf16.msra.mxu0 %v5431_v40  ;;  %439 = vmatpush1.bf16.msra.mxu1 %v5436_v41 }
  0x26   :  { %691 = vmatprep.subr.bf16.mxu0 %v5258_v9  ;;  %732 = vmatprep.subr.bf16.mxu1 %v5268_v13 }
  0x28   :  { %416 = vmatmul.mubr.bf16.vlgmr.msra.gmra.mrb[4].mxu0 %v5188_v2  ;;  %457 = vmatmul.mubr.bf16.vlgmr.msra.gmra.mrb[4].mxu1 %v5188_v2 }
  0x29   :  { %692 = vmatpush1.bf16.msra.mxu0 %v5253_v8  ;;  %733 = vmatpush1.bf16.msra.mxu1 %v5263_v12 }
  0x2a   :  { %693 = vmatprep.subr.bf16.mxu0 %v5274_v14  ;;  %734 = vmatprep.subr.bf16.mxu1 %v5280_v15 }
  0x2b   :  { %723 = vmatprep.mubr.bf16.mxu0 %v5188_v2  ;;  %764 = vmatprep.mubr.bf16.mxu1 %v5188_v2 }
  0x2d   :  { %694 = vmatpush1.bf16.msra.mxu0 %v5285_v16  ;;  %735 = vmatpush1.bf16.msra.mxu1 %v5292_v17 }
  0x2e   :  { %695 = vmatprep.subr.bf16.mxu0 %v5299_v18  ;;  %736 = vmatprep.subr.bf16.mxu1 %v5304_v19 }
  0x31   :  { %696 = vmatpush1.bf16.msra.mxu0 %v5311_v20  ;;  %737 = vmatpush1.bf16.msra.mxu1 %v5318_v21 }
  0x32   :  { %697 = vmatprep.subr.bf16.mxu0 %v5325_v22  ;;  %738 = vmatprep.subr.bf16.mxu1 %v5330_v23 }
  0x35   :  { %698 = vmatpush1.bf16.msra.mxu0 %v5335_v24  ;;  %739 = vmatpush1.bf16.msra.mxu1 %v5342_v25 }
  0x36   :  { %699 = vmatprep.subr.bf16.mxu0 %v5349_v26  ;;  %740 = vmatprep.subr.bf16.mxu1 %v5354_v27 }
  0x39   :  { %700 = vmatpush1.bf16.msra.mxu0 %v5359_v28  ;;  %741 = vmatpush1.bf16.msra.mxu1 %v5366_v29 }
  0x3a   :  { %701 = vmatprep.subr.bf16.mxu0 %v5373_v30  ;;  %742 = vmatprep.subr.bf16.mxu1 %v5378_v31 }
  0x3d   :  { %702 = vmatpush1.bf16.msra.mxu0 %v5383_v32  ;;  %743 = vmatpush1.bf16.msra.mxu1 %v5388_v33 }
  0x3e   :  { %703 = vmatprep.subr.bf16.mxu0 %v5393_v34  ;;  %744 = vmatprep.subr.bf16.mxu1 %v5398_v35 }
  0x41   :  { %704 = vmatpush1.bf16.msra.mxu0 %v5407_v36  ;;  %745 = vmatpush1.bf16.msra.mxu1 %v5412_v37 }
  0x42   :  { %705 = vmatprep.subr.bf16.mxu0 %v5417_v38  ;;  %746 = vmatprep.subr.bf16.mxu1 %v5422_v39 }
  0x45   :  { %706 = vmatpush1.bf16.msra.mxu0 %v5431_v40  ;;  %747 = vmatpush1.bf16.msra.mxu1 %v5436_v41 }
  0x46   :  { %1017 = vmatprep.subr.bf16.mxu0 %v5258_v9  ;;  %1058 = vmatprep.subr.bf16.mxu1 %v5268_v13 }
  0xdb   :  { %v127_v53 = vpop.f32.mrb[0].mxu0  ;;  %v170_v54 = vpop.f32.mrb[0].mxu1 }
  0xdc   :  { %v128_v55 = vadd.f32 %v127_v53, %v44_v49  ;;  %v129_v56 = vpop.f32.mrb[1].mxu0  ;;  %v171_v57 = vadd.f32 %v170_v54, %v52_v50  ;;  %v172_v58 = vpop.f32.mrb[1].mxu1 }
  0xdd   :  { %v130_v59 = vadd.f32 %v129_v56, %v48_v51  ;;  %v131_v60 = vpop.f32.mrb[2].mxu0  ;;  %v173_v61 = vadd.f32 %v172_v58, %v56_v52  ;;  %v174_v62 = vpop.f32.mrb[2].mxu1 }
  0xde   :  { %179 = vst [vmem:[#allocation2] sm:$0xff] %v128_v55  ;;  %v132_v63 = vadd.f32 %v131_v60, %v44_v49  ;;  %v133_v0 = vpop.f32.mrb[3].mxu0  ;;  %181 = vst [vmem:[#allocation2 + $0x10] sm:$0xff] %v171_v57  ;;  %v175_v1 = vadd.f32 %v174_v62, %v52_v50  ;;  %v176_v3 = vpop.f32.mrb[3].mxu1 }
  0xdf   :  { %180 = vst [vmem:[#allocation2 + $0x8] sm:$0xff] %v130_v59  ;;  %v134_v4 = vadd.f32 %v133_v0, %v48_v51  ;;  %182 = vst [vmem:[#allocation2 + $0x18] sm:$0xff] %v173_v61  ;;  %v177_v5 = vadd.f32 %v176_v3, %v56_v52 }
  0xe0   :  { %183 = vst [vmem:[#allocation2 + $0x20] sm:$0xff] %v132_v63  ;;  %185 = vst [vmem:[#allocation2 + $0x30] sm:$0xff] %v175_v1 }
  0xe1   :  { %184 = vst [vmem:[#allocation2 + $0x28] sm:$0xff] %v134_v4  ;;  %186 = vst [vmem:[#allocation2 + $0x38] sm:$0xff] %v177_v5 }
  0xe5   :  { %v187_v6 = vld [vmem:[#allocation2] sm:$0x3]  ;;  %v189_v59 = vld [vmem:[#allocation2 + $0x10] sm:$0x3] }
  0xe6   :  { %v188_v42 = vld [vmem:[#allocation2 + $0x8] sm:$0x3]  ;;  %v190_v52 = vld [vmem:[#allocation2 + $0x18] sm:$0x3] }
  0xfb   :  { %v417_v7 = vpop.f32.mrb[4].mxu0  ;;  %v458_v10 = vpop.f32.mrb[4].mxu1 }
  0xfc   :  { %v465_v11 = vadd.f32 %v417_v7, %v187_v6  ;;  %v419_v46 = vpop.f32.mrb[5].mxu0  ;;  %v460_v53 = vpop.f32.mrb[5].mxu1  ;;  %v467_v61 = vadd.f32 %v458_v10, %v189_v59 }
  0xfd   :  { %v466_v49 = vadd.f32 %v419_v46, %v188_v42  ;;  %v421_v54 = vpop.f32.mrb[6].mxu0  ;;  %v462_v55 = vpop.f32.mrb[6].mxu1  ;;  %v468_v58 = vadd.f32 %v460_v53, %v190_v52  ;;  %v495_v52 = vld [vmem:[#allocation2] sm:$0xc] }
  0xfe   :  { %v4364_v50 = vmul.f32 -1.442695, %v465_v11  ;;  %v422_v56 = vpop.f32.mrb[7].mxu0  ;;  %v463_v57 = vpop.f32.mrb[7].mxu1 }
  0xff   :  { %v4365_v51 = vmul.f32 -1.442695, %v466_v49  ;;  %v4366_v60 = vmul.f32 -1.442695, %v468_v58 }
 0x100   :  { %4900 = vpow2.f32 %v4364_v50 }
 0x101   :  { %4902 = vpow2.f32 %v4365_v51 }
 0x102   :  { %4904 = vpow2.f32 %v4366_v60 }
 0x103   :  { %4906 = vtanh.f32 %v467_v61 }
 0x10a   :  { %v4901_v62 = vpop.eup %4900 }
 0x10b   :  { %v4903_v63 = vpop.eup %4902  ;;  %v475_v0 = vadd.f32 1.0, %v4901_v62  ;;  %v496_v62 = vld [vmem:[#allocation2 + $0x8] sm:$0xc] }
 0x10c   :  { %v476_v1 = vadd.f32 1.0, %v4903_v63  ;;  %v4905_v3 = vpop.eup %4904 }
 0x10d   :  { %4908 = vrcp.f32 %v475_v0  ;;  %v4907_v4 = vpop.eup %4906  ;;  %v485_v11 = vadd.f32 1.0, %v4905_v3 }
 0x10e   :  { %4910 = vrcp.f32 %v476_v1 }
 0x10f   :  { %4912 = vrcp.f32 %v485_v11 }
 0x117   :  { %v4909_v5 = vpop.eup %4908 }
 0x118   :  { %v4911_v6 = vpop.eup %4910  ;;  %v489_v7 = vmul.f32 %v4909_v5, %v4907_v4 }
 0x119   :  { %v488_v42 = vmul.f32 0.0, %v4911_v6  ;;  %v4913_v10 = vpop.eup %4912 }
 0x11b   :  { %v5499_v46 = vadd.f32 %v489_v7, %v488_v42  ;;  %v497_v7 = vld [vmem:[#allocation2 + $0x10] sm:$0xc] }
 0x11d   :  { %4914 = vtanh.f32 %v5499_v46 }
 0x127   :  { %v4915_v53 = vpop.eup %4914 }
 0x128   :  { %v492_v49 = vmul.f32 %v4915_v53, %v4913_v10 }
 0x12a   :  { %v493_v54 = vpack.c.bf16 %v492_v49, %v492_v49 }
 0x12c   :  { %494 = vst [vmem:[#allocation3] sm:$0x1] %v493_v54  ;;  %724 = vmatmul.mubr.bf16.vlgmr.msra.gmra.mrb[8].mxu0 %v493_v54  ;;  %765 = vmatmul.mubr.bf16.vlgmr.msra.gmra.mrb[8].mxu1 %v493_v54 }
 0x12d   :  { %1018 = vmatpush1.bf16.msra.mxu0 %v5253_v8  ;;  %1059 = vmatpush1.bf16.msra.mxu1 %v5263_v12 }
 0x12e   :  { %1019 = vmatprep.subr.bf16.mxu0 %v5274_v14  ;;  %1060 = vmatprep.subr.bf16.mxu1 %v5280_v15 }
 0x12f   :  { %1049 = vmatprep.mubr.bf16.mxu0 %v5188_v2  ;;  %1090 = vmatprep.mubr.bf16.mxu1 %v5188_v2 }
 0x131   :  { %1020 = vmatpush1.bf16.msra.mxu0 %v5285_v16  ;;  %1061 = vmatpush1.bf16.msra.mxu1 %v5292_v17 }
 0x132   :  { %1021 = vmatprep.subr.bf16.mxu0 %v5299_v18  ;;  %1062 = vmatprep.subr.bf16.mxu1 %v5304_v19 }
 0x135   :  { %1022 = vmatpush1.bf16.msra.mxu0 %v5311_v20  ;;  %1063 = vmatpush1.bf16.msra.mxu1 %v5318_v21 }
 0x136   :  { %1023 = vmatprep.subr.bf16.mxu0 %v5325_v22  ;;  %1064 = vmatprep.subr.bf16.mxu1 %v5330_v23 }
 0x139   :  { %1024 = vmatpush1.bf16.msra.mxu0 %v5335_v24  ;;  %1065 = vmatpush1.bf16.msra.mxu1 %v5342_v25 }
 0x13a   :  { %1025 = vmatprep.subr.bf16.mxu0 %v5349_v26  ;;  %1066 = vmatprep.subr.bf16.mxu1 %v5354_v27 }
 0x13d   :  { %1026 = vmatpush1.bf16.msra.mxu0 %v5359_v28  ;;  %1067 = vmatpush1.bf16.msra.mxu1 %v5366_v29 }
 0x13e   :  { %1027 = vmatprep.subr.bf16.mxu0 %v5373_v30  ;;  %1068 = vmatprep.subr.bf16.mxu1 %v5378_v31 }
 0x141   :  { %1028 = vmatpush1.bf16.msra.mxu0 %v5383_v32  ;;  %1069 = vmatpush1.bf16.msra.mxu1 %v5388_v33 }
 0x142   :  { %1029 = vmatprep.subr.bf16.mxu0 %v5393_v34  ;;  %1070 = vmatprep.subr.bf16.mxu1 %v5398_v35 }
 0x145   :  { %1030 = vmatpush1.bf16.msra.mxu0 %v5407_v36  ;;  %1071 = vmatpush1.bf16.msra.mxu1 %v5412_v37 }
 0x146   :  { %1031 = vmatprep.subr.bf16.mxu0 %v5417_v38  ;;  %1072 = vmatprep.subr.bf16.mxu1 %v5422_v39 }
 0x149   :  { %1032 = vmatpush1.bf16.msra.mxu0 %v5431_v40  ;;  %1073 = vmatpush1.bf16.msra.mxu1 %v5436_v41 }
 0x14a   :  { %1343 = vmatprep.subr.bf16.mxu0 %v5258_v9  ;;  %1384 = vmatprep.subr.bf16.mxu1 %v5268_v13  ;;  %v498_v9 = vld [vmem:[#allocation2 + $0x18] sm:$0xc] }
 0x1ff   :  { %v725_v55 = vpop.f32.mrb[8].mxu0  ;;  %v766_v50 = vpop.f32.mrb[8].mxu1 }
 0x200   :  { %v777_v56 = vrot.slane %v725_v55, 6  ;;  %v727_v57 = vpop.f32.mrb[9].mxu0  ;;  %v768_v51 = vpop.f32.mrb[9].mxu1  ;;  %v779_v6 = vrot.slane %v766_v50, 6 }
 0x201   :  { %v778_v58 = vrot.slane %v727_v57, 6  ;;  %v729_v59 = vpop.f32.mrb[10].mxu0  ;;  %v770_v60 = vpop.f32.mrb[10].mxu1  ;;  %v780_v5 = vrot.slane %v768_v51, 6  ;;  %v809_v51 = vrot.slane %v5499_v46, 6 }
 0x202   :  { %v785_v61 = vadd.f32 %v777_v56, %v495_v52  ;;  %v730_v63 = vpop.f32.mrb[11].mxu0  ;;  %v771_v0 = vpop.f32.mrb[11].mxu1  ;;  %v787_v42 = vadd.f32 %v779_v6, %v497_v7 }
 0x203   :  { %v786_v1 = vadd.f32 %v778_v58, %v496_v62  ;;  %v788_v13 = vadd.f32 %v780_v5, %v498_v9 }
 0x204   :  { %v4399_v3 = vmul.f32 -1.442695, %v785_v61 }
 0x205   :  { %v4400_v4 = vmul.f32 -1.442695, %v786_v1  ;;  %v4401_v11 = vmul.f32 -1.442695, %v788_v13 }
 0x206   :  { %4916 = vpow2.f32 %v4399_v3 }
 0x207   :  { %4918 = vpow2.f32 %v4400_v4 }
 0x208   :  { %4920 = vpow2.f32 %v4401_v11 }
 0x209   :  { %4922 = vtanh.f32 %v787_v42 }
 0x210   :  { %v4917_v10 = vpop.eup %4916 }
 0x211   :  { %v4919_v53 = vpop.eup %4918  ;;  %v795_v49 = vadd.f32 1.0, %v4917_v10 }
 0x212   :  { %v796_v54 = vadd.f32 1.0, %v4919_v53  ;;  %v4921_v55 = vpop.eup %4920  ;;  %v5581_v53 = vld [vmem:[%s6549_s2 + $0x4] ss:$16 sps:$4 sm:$0xff]  }
 0x213   :  { %4924 = vrcp.f32 %v795_v49  ;;  %v4923_v56 = vpop.eup %4922  ;;  %v805_v59 = vadd.f32 1.0, %v4921_v55  ;;  %v5586_v49 = vld [vmem:[%s6549_s2 + $0xc] ss:$16 sps:$4 sm:$0xff]   ;;  %v5596_v55 = vld [vmem:[%s6549_s2 + $0x8] ss:$16 sps:$4 sm:$0xff]  }
 0x214   :  { %4926 = vrcp.f32 %v796_v54  ;;  %v5591_v54 = vld [vmem:[%s6549_s2] ss:$16 sps:$4 sm:$0xff]  }
 0x215   :  { %4928 = vrcp.f32 %v805_v59  ;;  %v5634_v59 = vld [vmem:[%s6549_s2 + $0x4c] ss:$16 sps:$4 sm:$0xff]  }
 0x21d   :  { %v4925_v57 = vpop.eup %4924 }
 0x21e   :  { %v4927_v52 = vpop.eup %4926  ;;  %v812_v58 = vmul.f32 %v4925_v57, %v4923_v56  ;;  %v5605_v56 = vld [vmem:[%s6549_s2 + $0x24] ss:$16 sps:$4 sm:$0xff]   ;;  %v5610_v57 = vld [vmem:[%s6549_s2 + $0x2c] ss:$16 sps:$4 sm:$0xff]  }
 0x21f   :  { %v811_v50 = vmul.f32 %v4927_v52, %v809_v51  ;;  %v4929_v61 = vpop.eup %4928  ;;  %v5615_v51 = vld [vmem:[%s6549_s2 + $0x20] ss:$16 sps:$4 sm:$0xff]   ;;  %v5620_v52 = vld [vmem:[%s6549_s2 + $0x28] ss:$16 sps:$4 sm:$0xff]  }
 0x221   :  { %v5537_v60 = vadd.f32 %v812_v58, %v811_v50  ;;  %v5629_v58 = vld [vmem:[%s6549_s2 + $0x44] ss:$16 sps:$4 sm:$0xff]   ;;  %v5639_v50 = vld [vmem:[%s6549_s2 + $0x40] ss:$16 sps:$4 sm:$0xff]  }
 0x223   :  { %4930 = vtanh.f32 %v5537_v60  ;;  %v1135_v46 = vrot.slane %v5537_v60, 6  ;;  %v5644_v60 = vld [vmem:[%s6549_s2 + $0x48] ss:$16 sps:$4 sm:$0xff]  }
 0x22d   :  { %v4931_v62 = vpop.eup %4930 }
 0x22e   :  { %v815_v63 = vmul.f32 %v4931_v62, %v4929_v61  ;;  %v5653_v61 = vld [vmem:[%s6549_s2 + $0x60] ss:$16 sps:$4 sm:$0xff]   ;;  %v5658_v62 = vld [vmem:[%s6549_s2 + $0x64] ss:$16 sps:$4 sm:$0xff]  }
 0x230   :  { %v816_v0 = vpack.c.bf16 %v815_v63, %v815_v63  ;;  %v5663_v63 = vld [vmem:[%s6549_s2 + $0x68] ss:$16 sps:$4 sm:$0xff]  }
 0x232   :  { %817 = vst [vmem:[#allocation3] sm:$0x2] %v816_v0  ;;  %v855_v1 = vrot.slane %v816_v0, 1  ;;  %v5668_v0 = vld [vmem:[%s6549_s2 + $0x6c] ss:$16 sps:$4 sm:$0xff]  }
 0x234   :  { %1050 = vmatmul.mubr.bf16.vlgmr.msra.gmra.mrb[12].mxu0 %v855_v1  ;;  %1091 = vmatmul.mubr.bf16.vlgmr.msra.gmra.mrb[12].mxu1 %v855_v1  ;;  %v5673_v1 = vld [vmem:[%s6549_s2 + $0x84] ss:$16 sps:$4 sm:$0xff]  }
 0x235   :  { %1344 = vmatpush1.bf16.msra.mxu0 %v5253_v8  ;;  %1385 = vmatpush1.bf16.msra.mxu1 %v5263_v12 }
 0x236   :  { %1345 = vmatprep.subr.bf16.mxu0 %v5274_v14  ;;  %1386 = vmatprep.subr.bf16.mxu1 %v5280_v15 }
 0x237   :  { %1375 = vmatprep.mubr.bf16.mxu0 %v5188_v2  ;;  %1416 = vmatprep.mubr.bf16.mxu1 %v5188_v2 }
 0x239   :  { %1346 = vmatpush1.bf16.msra.mxu0 %v5285_v16  ;;  %1387 = vmatpush1.bf16.msra.mxu1 %v5292_v17  ;;  %v818_v17 = vld [vmem:[#allocation2] sm:$0x30] }
 0x23a   :  { %1347 = vmatprep.subr.bf16.mxu0 %v5299_v18  ;;  %1388 = vmatprep.subr.bf16.mxu1 %v5304_v19 }
 0x23d   :  { %1348 = vmatpush1.bf16.msra.mxu0 %v5311_v20  ;;  %1389 = vmatpush1.bf16.msra.mxu1 %v5318_v21 }
 0x23e   :  { %1349 = vmatprep.subr.bf16.mxu0 %v5325_v22  ;;  %1390 = vmatprep.subr.bf16.mxu1 %v5330_v23  ;;  %v819_v22 = vld [vmem:[#allocation2 + $0x8] sm:$0x30] }
 0x241   :  { %1350 = vmatpush1.bf16.msra.mxu0 %v5335_v24  ;;  %1391 = vmatpush1.bf16.msra.mxu1 %v5342_v25 }
 0x242   :  { %1351 = vmatprep.subr.bf16.mxu0 %v5349_v26  ;;  %1392 = vmatprep.subr.bf16.mxu1 %v5354_v27 }
 0x245   :  { %1352 = vmatpush1.bf16.msra.mxu0 %v5359_v28  ;;  %1393 = vmatpush1.bf16.msra.mxu1 %v5366_v29  ;;  %v821_v29 = vld [vmem:[#allocation2 + $0x18] sm:$0x30] }
 0x246   :  { %1353 = vmatprep.subr.bf16.mxu0 %v5373_v30  ;;  %1394 = vmatprep.subr.bf16.mxu1 %v5378_v31 }
 0x249   :  { %1354 = vmatpush1.bf16.msra.mxu0 %v5383_v32  ;;  %1395 = vmatpush1.bf16.msra.mxu1 %v5388_v33  ;;  %v820_v32 = vld [vmem:[#allocation2 + $0x10] sm:$0x30] }
 0x24a   :  { %1355 = vmatprep.subr.bf16.mxu0 %v5393_v34  ;;  %1396 = vmatprep.subr.bf16.mxu1 %v5398_v35 }
 0x24d   :  { %1356 = vmatpush1.bf16.msra.mxu0 %v5407_v36  ;;  %1397 = vmatpush1.bf16.msra.mxu1 %v5412_v37 }
 0x24e   :  { %1357 = vmatprep.subr.bf16.mxu0 %v5417_v38  ;;  %1398 = vmatprep.subr.bf16.mxu1 %v5422_v39 }
 0x251   :  { %1358 = vmatpush1.bf16.msra.mxu0 %v5431_v40  ;;  %1399 = vmatpush1.bf16.msra.mxu1 %v5436_v41 }
 0x252   :  { %1669 = vmatprep.subr.bf16.mxu0 %v5581_v53  ;;  %1710 = vmatprep.subr.bf16.mxu1 %v5586_v49 }
 0x307   :  { %v1051_v8 = vpop.f32.mrb[12].mxu0  ;;  %v1092_v12 = vpop.f32.mrb[12].mxu1 }
 0x308   :  { %v1103_v14 = vrot.slane %v1051_v8, 4  ;;  %v1053_v15 = vpop.f32.mrb[13].mxu0  ;;  %v1094_v16 = vpop.f32.mrb[13].mxu1  ;;  %v1105_v31 = vrot.slane %v1092_v12, 4  ;;  %v5679_v8 = vld [vmem:[%s6549_s2 + $0x8c] ss:$16 sps:$4 sm:$0xff]  }
 0x309   :  { %v1104_v18 = vrot.slane %v1053_v15, 4  ;;  %v1055_v19 = vpop.f32.mrb[14].mxu0  ;;  %v1096_v20 = vpop.f32.mrb[14].mxu1  ;;  %v1106_v28 = vrot.slane %v1094_v16, 4  ;;  %v5686_v12 = vld [vmem:[%s6549_s2 + $0x80] ss:$16 sps:$4 sm:$0xff]  }
 0x30a   :  { %v1111_v21 = vadd.f32 %v1103_v14, %v818_v17  ;;  %v1056_v23 = vpop.f32.mrb[15].mxu0  ;;  %v1097_v24 = vpop.f32.mrb[15].mxu1  ;;  %v1113_v34 = vadd.f32 %v1105_v31, %v820_v32  ;;  %v5693_v14 = vld [vmem:[%s6549_s2 + $0x88] ss:$16 sps:$4 sm:$0xff]   ;;  %v5698_v15 = vld [vmem:[%s6549_s2 + $0xa4] ss:$16 sps:$4 sm:$0xff]  }
 0x30b   :  { %v1112_v25 = vadd.f32 %v1104_v18, %v819_v22  ;;  %v1114_v30 = vadd.f32 %v1106_v28, %v821_v29  ;;  %v5704_v16 = vld [vmem:[%s6549_s2 + $0xac] ss:$16 sps:$4 sm:$0xff]   ;;  %v5710_v17 = vld [vmem:[%s6549_s2 + $0xa0] ss:$16 sps:$4 sm:$0xff]   ;;  %v5717_v18 = vld [vmem:[%s6549_s2 + $0xa8] ss:$16 sps:$4 sm:$0xff]  }
 0x30c   :  { %v4434_v26 = vmul.f32 -1.442695, %v1111_v21  ;;  %v5722_v19 = vld [vmem:[%s6549_s2 + $0xc4] ss:$16 sps:$4 sm:$0xff]   ;;  %v5728_v20 = vld [vmem:[%s6549_s2 + $0xcc] ss:$16 sps:$4 sm:$0xff]  }
 0x30d   :  { %v4435_v27 = vmul.f32 -1.442695, %v1112_v25  ;;  %v4436_v33 = vmul.f32 -1.442695, %v1114_v30  ;;  %v5734_v21 = vld [vmem:[%s6549_s2 + $0xc0] ss:$16 sps:$4 sm:$0xff]  }
 0x30e   :  { %4932 = vpow2.f32 %v4434_v26  ;;  %v5741_v22 = vld [vmem:[%s6549_s2 + $0xc8] ss:$16 sps:$4 sm:$0xff]   ;;  %v5746_v23 = vld [vmem:[%s6549_s2 + $0xe4] ss:$16 sps:$4 sm:$0xff]   ;;  %v5752_v24 = vld [vmem:[%s6549_s2 + $0xec] ss:$16 sps:$4 sm:$0xff]  }
 0x30f   :  { %4934 = vpow2.f32 %v4435_v27  ;;  %v5758_v25 = vld [vmem:[%s6549_s2 + $0xe0] ss:$16 sps:$4 sm:$0xff]   ;;  %v5765_v26 = vld [vmem:[%s6549_s2 + $0xe8] ss:$16 sps:$4 sm:$0xff]   ;;  %v1144_v32 = vld [vmem:[#allocation2] sm:$0xc0] }
 0x310   :  { %4936 = vpow2.f32 %v4436_v33 }
 0x311   :  { %4938 = vtanh.f32 %v1113_v34 }
 0x318   :  { %v4933_v35 = vpop.eup %4932 }
 0x319   :  { %v4935_v36 = vpop.eup %4934  ;;  %v1121_v37 = vadd.f32 1.0, %v4933_v35 }
 0x31a   :  { %v1122_v38 = vadd.f32 1.0, %v4935_v36  ;;  %v4937_v39 = vpop.eup %4936 }
 0x31b   :  { %4940 = vrcp.f32 %v1121_v37  ;;  %v4939_v40 = vpop.eup %4938  ;;  %v1131_v5 = vadd.f32 1.0, %v4937_v39  ;;  %v1145_v37 = vld [vmem:[#allocation2 + $0x8] sm:$0xc0] }
 0x31c   :  { %4942 = vrcp.f32 %v1122_v38 }
 0x31d   :  { %4944 = vrcp.f32 %v1131_v5 }
 0x325   :  { %v4941_v41 = vpop.eup %4940 }
 0x326   :  { %v4943_v3 = vpop.eup %4942  ;;  %v1138_v4 = vmul.f32 %v4941_v41, %v4939_v40 }
 0x327   :  { %v1137_v9 = vmul.f32 %v4943_v3, %v1135_v46  ;;  %v4945_v6 = vpop.eup %4944 }
 0x329   :  { %v5573_v13 = vadd.f32 %v1138_v4, %v1137_v9  ;;  %v1147_v4 = vld [vmem:[#allocation2 + $0x18] sm:$0xc0] }
 0x32b   :  { %4946 = vtanh.f32 %v5573_v13 }
 0x335   :  { %v4947_v7 = vpop.eup %4946 }
 0x336   :  { %v1141_v11 = vmul.f32 %v4947_v7, %v4945_v6  ;;  %v1146_v6 = vld [vmem:[#allocation2 + $0x10] sm:$0xc0] }
 0x338   :  { %v1142_v42 = vpack.c.bf16 %v1141_v11, %v1141_v11 }
 0x33a   :  { %1143 = vst [vmem:[#allocation3] sm:$0x4] %v1142_v42  ;;  %v1181_v10 = vrot.slane %v1142_v42, 2 }
 0x33c   :  { %1376 = vmatmul.mubr.bf16.vlgmr.msra.gmra.mrb[16].mxu0 %v1181_v10  ;;  %1417 = vmatmul.mubr.bf16.vlgmr.msra.gmra.mrb[16].mxu1 %v1181_v10 }
 0x33d   :  { %1701 = vmatprep.mubr.bf16.mxu0 %v5188_v2  ;;  %1742 = vmatprep.mubr.bf16.mxu1 %v5188_v2 }
 0x33e   :  { %1670 = vmatpush1.bf16.msra.mxu0 %v5591_v54  ;;  %1711 = vmatpush1.bf16.msra.mxu1 %v5596_v55 }
 0x33f   :  { %1671 = vmatprep.subr.bf16.mxu0 %v5605_v56  ;;  %1712 = vmatprep.subr.bf16.mxu1 %v5610_v57 }
 0x342   :  { %1672 = vmatpush1.bf16.msra.mxu0 %v5615_v51  ;;  %1713 = vmatpush1.bf16.msra.mxu1 %v5620_v52 }
 0x343   :  { %1673 = vmatprep.subr.bf16.mxu0 %v5629_v58  ;;  %1714 = vmatprep.subr.bf16.mxu1 %v5634_v59 }
 0x346   :  { %1674 = vmatpush1.bf16.msra.mxu0 %v5639_v50  ;;  %1715 = vmatpush1.bf16.msra.mxu1 %v5644_v60 }
 0x347   :  { %1675 = vmatprep.subr.bf16.mxu0 %v5658_v62  ;;  %1716 = vmatprep.subr.bf16.mxu1 %v5668_v0 }
 0x34a   :  { %1676 = vmatpush1.bf16.msra.mxu0 %v5653_v61  ;;  %1717 = vmatpush1.bf16.msra.mxu1 %v5663_v63 }
 0x34b   :  { %1677 = vmatprep.subr.bf16.mxu0 %v5673_v1  ;;  %1718 = vmatprep.subr.bf16.mxu1 %v5679_v8 }
 0x34e   :  { %1678 = vmatpush1.bf16.msra.mxu0 %v5686_v12  ;;  %1719 = vmatpush1.bf16.msra.mxu1 %v5693_v14 }
 0x34f   :  { %1679 = vmatprep.subr.bf16.mxu0 %v5698_v15  ;;  %1720 = vmatprep.subr.bf16.mxu1 %v5704_v16 }
 0x352   :  { %1680 = vmatpush1.bf16.msra.mxu0 %v5710_v17  ;;  %1721 = vmatpush1.bf16.msra.mxu1 %v5717_v18 }
 0x353   :  { %1681 = vmatprep.subr.bf16.mxu0 %v5722_v19  ;;  %1722 = vmatprep.subr.bf16.mxu1 %v5728_v20 }
 0x356   :  { %1682 = vmatpush1.bf16.msra.mxu0 %v5734_v21  ;;  %1723 = vmatpush1.bf16.msra.mxu1 %v5741_v22 }
 0x357   :  { %1683 = vmatprep.subr.bf16.mxu0 %v5746_v23  ;;  %1724 = vmatprep.subr.bf16.mxu1 %v5752_v24 }
 0x35a   :  { %1684 = vmatpush1.bf16.msra.mxu0 %v5758_v25  ;;  %1725 = vmatpush1.bf16.msra.mxu1 %v5765_v26 }
 0x35b   :  { %1983 = vmatprep.subr.bf16.mxu0 %v5581_v53  ;;  %2024 = vmatprep.subr.bf16.mxu1 %v5586_v49 }
 0x40f   :  { %v1377_v27 = vpop.f32.mrb[16].mxu0  ;;  %v1418_v28 = vpop.f32.mrb[16].mxu1 }
 0x410   :  { %v1429_v29 = vrot.slane %v1377_v27, 2  ;;  %v1379_v30 = vpop.f32.mrb[17].mxu0  ;;  %v1420_v31 = vpop.f32.mrb[17].mxu1  ;;  %v1431_v9 = vrot.slane %v1418_v28, 2 }
 0x411   :  { %v1430_v33 = vrot.slane %v1379_v30, 2  ;;  %v1381_v34 = vpop.f32.mrb[18].mxu0  ;;  %v1422_v35 = vpop.f32.mrb[18].mxu1  ;;  %v1432_v3 = vrot.slane %v1420_v31, 2  ;;  %v1461_v31 = vrot.slane %v5573_v13, 6 }
 0x412   :  { %v1437_v36 = vadd.f32 %v1429_v29, %v1144_v32  ;;  %v1382_v38 = vpop.f32.mrb[19].mxu0  ;;  %v1423_v39 = vpop.f32.mrb[19].mxu1  ;;  %v1439_v11 = vadd.f32 %v1431_v9, %v1146_v6  ;;  %v1470_v13 = vld [vmem:[#allocation2 + $0x20] sm:$0x3]  ;;  %v1471_v9 = vld [vmem:[#allocation2 + $0x28] sm:$0x3] }
 0x413   :  { %v1438_v40 = vadd.f32 %v1430_v33, %v1145_v37  ;;  %v1440_v5 = vadd.f32 %v1432_v3, %v1147_v4 }
 0x414   :  { %v4469_v41 = vmul.f32 -1.442695, %v1437_v36 }
 0x415   :  { %v4470_v46 = vmul.f32 -1.442695, %v1438_v40  ;;  %v4471_v7 = vmul.f32 -1.442695, %v1440_v5 }
 0x416   :  { %4948 = vpow2.f32 %v4469_v41 }
 0x417   :  { %4950 = vpow2.f32 %v4470_v46 }
 0x418   :  { %4952 = vpow2.f32 %v4471_v7 }
 0x419   :  { %4954 = vtanh.f32 %v1439_v11 }
 0x420   :  { %v4949_v42 = vpop.eup %4948 }
 0x421   :  { %v4951_v10 = vpop.eup %4950  ;;  %v1447_v27 = vadd.f32 1.0, %v4949_v42 }
 0x422   :  { %v1448_v29 = vadd.f32 1.0, %v4951_v10  ;;  %v4953_v30 = vpop.eup %4952 }
 0x423   :  { %4956 = vrcp.f32 %v1447_v27  ;;  %v4955_v32 = vpop.eup %4954  ;;  %v1457_v36 = vadd.f32 1.0, %v4953_v30 }
 0x424   :  { %4958 = vrcp.f32 %v1448_v29 }
 0x425   :  { %4960 = vrcp.f32 %v1457_v36 }
 0x42d   :  { %v4957_v33 = vpop.eup %4956 }
 0x42e   :  { %v4959_v34 = vpop.eup %4958  ;;  %v1464_v35 = vmul.f32 %v4957_v33, %v4955_v32  ;;  %v1473_v33 = vld [vmem:[#allocation2 + $0x38] sm:$0x3] }
 0x42f   :  { %v1463_v28 = vmul.f32 %v4959_v34, %v1461_v31  ;;  %v4961_v38 = vpop.eup %4960  ;;  %v1472_v34 = vld [vmem:[#allocation2 + $0x30] sm:$0x3] }
 0x431   :  { %v5773_v37 = vadd.f32 %v1464_v35, %v1463_v28 }
 0x433   :  { %4962 = vtanh.f32 %v5773_v37 }
 0x43d   :  { %v4963_v39 = vpop.eup %4962 }
 0x43e   :  { %v1467_v40 = vmul.f32 %v4963_v39, %v4961_v38 }
 0x440   :  { %v1468_v41 = vpack.c.bf16 %v1467_v40, %v1467_v40 }
 0x442   :  { %1469 = vst [vmem:[#allocation3] sm:$0x8] %v1468_v41  ;;  %v1507_v46 = vrot.slane %v1468_v41, 3 }
 0x444   :  { %1702 = vmatmul.mubr.bf16.vlgmr.msra.gmra.mrb[20].mxu0 %v1507_v46  ;;  %1743 = vmatmul.mubr.bf16.vlgmr.msra.gmra.mrb[20].mxu1 %v1507_v46 }
 0x445   :  { %1984 = vmatpush1.bf16.msra.mxu0 %v5591_v54  ;;  %2025 = vmatpush1.bf16.msra.mxu1 %v5596_v55 }
 0x446   :  { %1985 = vmatprep.subr.bf16.mxu0 %v5605_v56  ;;  %2026 = vmatprep.subr.bf16.mxu1 %v5610_v57 }
 0x447   :  { %2015 = vmatprep.mubr.bf16.mxu0 %v5188_v2  ;;  %2056 = vmatprep.mubr.bf16.mxu1 %v5188_v2 }
 0x449   :  { %1986 = vmatpush1.bf16.msra.mxu0 %v5615_v51  ;;  %2027 = vmatpush1.bf16.msra.mxu1 %v5620_v52 }
 0x44a   :  { %1987 = vmatprep.subr.bf16.mxu0 %v5629_v58  ;;  %2028 = vmatprep.subr.bf16.mxu1 %v5634_v59 }
 0x44d   :  { %1988 = vmatpush1.bf16.msra.mxu0 %v5639_v50  ;;  %2029 = vmatpush1.bf16.msra.mxu1 %v5644_v60 }
 0x44e   :  { %1989 = vmatprep.subr.bf16.mxu0 %v5658_v62  ;;  %2030 = vmatprep.subr.bf16.mxu1 %v5668_v0 }
 0x451   :  { %1990 = vmatpush1.bf16.msra.mxu0 %v5653_v61  ;;  %2031 = vmatpush1.bf16.msra.mxu1 %v5663_v63 }
 0x452   :  { %1991 = vmatprep.subr.bf16.mxu0 %v5673_v1  ;;  %2032 = vmatprep.subr.bf16.mxu1 %v5679_v8 }
 0x455   :  { %1992 = vmatpush1.bf16.msra.mxu0 %v5686_v12  ;;  %2033 = vmatpush1.bf16.msra.mxu1 %v5693_v14 }
 0x456   :  { %1993 = vmatprep.subr.bf16.mxu0 %v5698_v15  ;;  %2034 = vmatprep.subr.bf16.mxu1 %v5704_v16 }
 0x459   :  { %1994 = vmatpush1.bf16.msra.mxu0 %v5710_v17  ;;  %2035 = vmatpush1.bf16.msra.mxu1 %v5717_v18 }
 0x45a   :  { %1995 = vmatprep.subr.bf16.mxu0 %v5722_v19  ;;  %2036 = vmatprep.subr.bf16.mxu1 %v5728_v20 }
 0x45d   :  { %1996 = vmatpush1.bf16.msra.mxu0 %v5734_v21  ;;  %2037 = vmatpush1.bf16.msra.mxu1 %v5741_v22 }
 0x45e   :  { %1997 = vmatprep.subr.bf16.mxu0 %v5746_v23  ;;  %2038 = vmatprep.subr.bf16.mxu1 %v5752_v24 }
 0x461   :  { %1998 = vmatpush1.bf16.msra.mxu0 %v5758_v25  ;;  %2039 = vmatpush1.bf16.msra.mxu1 %v5765_v26 }
 0x462   :  { %2311 = vmatprep.subr.bf16.mxu0 %v5581_v53  ;;  %2352 = vmatprep.subr.bf16.mxu1 %v5586_v49 }
 0x517   :  { %v1703_v3 = vpop.f32.mrb[20].mxu0  ;;  %v1744_v4 = vpop.f32.mrb[20].mxu1 }
 0x518   :  { %v1751_v5 = vadd.f32 %v1703_v3, %v1470_v13  ;;  %v1705_v6 = vpop.f32.mrb[21].mxu0  ;;  %v1746_v7 = vpop.f32.mrb[21].mxu1  ;;  %v1753_v36 = vadd.f32 %v1744_v4, %v1472_v34  ;;  %v1775_v3 = vrot.slane %v5773_v37, 6  ;;  %v1787_v34 = vld [vmem:[#allocation2 + $0x20] sm:$0xc] }
 0x519   :  { %v1752_v11 = vadd.f32 %v1705_v6, %v1471_v9  ;;  %v1707_v42 = vpop.f32.mrb[22].mxu0  ;;  %v1748_v10 = vpop.f32.mrb[22].mxu1  ;;  %v1754_v31 = vadd.f32 %v1746_v7, %v1473_v33 }
 0x51a   :  { %v4504_v27 = vmul.f32 -1.442695, %v1751_v5  ;;  %v1708_v29 = vpop.f32.mrb[23].mxu0  ;;  %v1749_v30 = vpop.f32.mrb[23].mxu1 }
 0x51b   :  { %v4505_v32 = vmul.f32 -1.442695, %v1752_v11  ;;  %v4506_v35 = vmul.f32 -1.442695, %v1754_v31 }
 0x51c   :  { %4964 = vpow2.f32 %v4504_v27 }
 0x51d   :  { %4966 = vpow2.f32 %v4505_v32 }
 0x51e   :  { %4968 = vpow2.f32 %v4506_v35 }
 0x51f   :  { %4970 = vtanh.f32 %v1753_v36 }
 0x526   :  { %v4965_v28 = vpop.eup %4964 }
 0x527   :  { %v4967_v38 = vpop.eup %4966  ;;  %v1761_v39 = vadd.f32 1.0, %v4965_v28 }
 0x528   :  { %v1762_v40 = vadd.f32 1.0, %v4967_v38  ;;  %v4969_v41 = vpop.eup %4968 }
 0x529   :  { %4972 = vrcp.f32 %v1761_v39  ;;  %v4971_v46 = vpop.eup %4970  ;;  %v1771_v6 = vadd.f32 1.0, %v4969_v41  ;;  %v1788_v39 = vld [vmem:[#allocation2 + $0x28] sm:$0xc] }
 0x52a   :  { %4974 = vrcp.f32 %v1762_v40 }
 0x52b   :  { %4976 = vrcp.f32 %v1771_v6  ;;  %v1789_v6 = vld [vmem:[#allocation2 + $0x30] sm:$0xc] }
 0x533   :  { %v4973_v13 = vpop.eup %4972 }
 0x534   :  { %v4975_v5 = vpop.eup %4974  ;;  %v1778_v9 = vmul.f32 %v4973_v13, %v4971_v46 }
 0x535   :  { %v1777_v7 = vmul.f32 %v4975_v5, %v1775_v3  ;;  %v4977_v4 = vpop.eup %4976 }
 0x537   :  { %v5811_v11 = vadd.f32 %v1778_v9, %v1777_v7 }
 0x539   :  { %4978 = vtanh.f32 %v5811_v11 }
 0x543   :  { %v4979_v42 = vpop.eup %4978 }
 0x544   :  { %v1781_v10 = vmul.f32 %v4979_v42, %v4977_v4 }
 0x546   :  { %v1782_v27 = vpack.c.bf16 %v1781_v10, %v1781_v10 }
 0x548   :  { %v1784_v29 = vrot.slane %v1782_v27, 4  ;;  %2016 = vmatmul.mubr.bf16.vlgmr.msra.gmra.mrb[24].mxu0 %v1782_v27  ;;  %2057 = vmatmul.mubr.bf16.vlgmr.msra.gmra.mrb[24].mxu1 %v1782_v27 }
 0x549   :  { %2312 = vmatpush1.bf16.msra.mxu0 %v5591_v54  ;;  %2353 = vmatpush1.bf16.msra.mxu1 %v5596_v55 }
 0x54a   :  { %1786 = vst [vmem:[#allocation3] sm:$0x10] %v1784_v29  ;;  %2313 = vmatprep.subr.bf16.mxu0 %v5605_v56  ;;  %2354 = vmatprep.subr.bf16.mxu1 %v5610_v57 }
 0x54b   :  { %2343 = vmatprep.mubr.bf16.mxu0 %v5188_v2  ;;  %2384 = vmatprep.mubr.bf16.mxu1 %v5188_v2 }
 0x54d   :  { %2314 = vmatpush1.bf16.msra.mxu0 %v5615_v51  ;;  %2355 = vmatpush1.bf16.msra.mxu1 %v5620_v52 }
 0x54e   :  { %2315 = vmatprep.subr.bf16.mxu0 %v5629_v58  ;;  %2356 = vmatprep.subr.bf16.mxu1 %v5634_v59 }
 0x551   :  { %2316 = vmatpush1.bf16.msra.mxu0 %v5639_v50  ;;  %2357 = vmatpush1.bf16.msra.mxu1 %v5644_v60 }
 0x552   :  { %2317 = vmatprep.subr.bf16.mxu0 %v5658_v62  ;;  %2358 = vmatprep.subr.bf16.mxu1 %v5668_v0 }
 0x555   :  { %2318 = vmatpush1.bf16.msra.mxu0 %v5653_v61  ;;  %2359 = vmatpush1.bf16.msra.mxu1 %v5663_v63 }
 0x556   :  { %2319 = vmatprep.subr.bf16.mxu0 %v5673_v1  ;;  %2360 = vmatprep.subr.bf16.mxu1 %v5679_v8 }
 0x559   :  { %2320 = vmatpush1.bf16.msra.mxu0 %v5686_v12  ;;  %2361 = vmatpush1.bf16.msra.mxu1 %v5693_v14 }
 0x55a   :  { %2321 = vmatprep.subr.bf16.mxu0 %v5698_v15  ;;  %2362 = vmatprep.subr.bf16.mxu1 %v5704_v16 }
 0x55d   :  { %2322 = vmatpush1.bf16.msra.mxu0 %v5710_v17  ;;  %2363 = vmatpush1.bf16.msra.mxu1 %v5717_v18 }
 0x55e   :  { %2323 = vmatprep.subr.bf16.mxu0 %v5722_v19  ;;  %2364 = vmatprep.subr.bf16.mxu1 %v5728_v20 }
 0x561   :  { %2324 = vmatpush1.bf16.msra.mxu0 %v5734_v21  ;;  %2365 = vmatpush1.bf16.msra.mxu1 %v5741_v22 }
 0x562   :  { %2325 = vmatprep.subr.bf16.mxu0 %v5746_v23  ;;  %2366 = vmatprep.subr.bf16.mxu1 %v5752_v24 }
 0x565   :  { %2326 = vmatpush1.bf16.msra.mxu0 %v5758_v25  ;;  %2367 = vmatpush1.bf16.msra.mxu1 %v5765_v26 }
 0x566   :  { %2639 = vmatprep.subr.bf16.mxu0 %v5581_v53  ;;  %2680 = vmatprep.subr.bf16.mxu1 %v5586_v49  ;;  %v1790_v53 = vld [vmem:[#allocation2 + $0x38] sm:$0xc] }
 0x61b   :  { %v2017_v37 = vpop.f32.mrb[24].mxu0  ;;  %v2058_v30 = vpop.f32.mrb[24].mxu1 }
 0x61c   :  { %v2069_v32 = vrot.slane %v2017_v37, 6  ;;  %v2019_v33 = vpop.f32.mrb[25].mxu0  ;;  %v2060_v31 = vpop.f32.mrb[25].mxu1  ;;  %v2071_v9 = vrot.slane %v2058_v30, 6 }
 0x61d   :  { %v2070_v35 = vrot.slane %v2019_v33, 6  ;;  %v2021_v36 = vpop.f32.mrb[26].mxu0  ;;  %v2062_v28 = vpop.f32.mrb[26].mxu1  ;;  %v2072_v5 = vrot.slane %v2060_v31, 6  ;;  %v2101_v31 = vrot.slane %v5811_v11, 6 }
 0x61e   :  { %v2077_v38 = vadd.f32 %v2069_v32, %v1787_v34  ;;  %v2022_v40 = vpop.f32.mrb[27].mxu0  ;;  %v2063_v41 = vpop.f32.mrb[27].mxu1  ;;  %v2079_v4 = vadd.f32 %v2071_v9, %v1789_v6 }
 0x61f   :  { %v2078_v46 = vadd.f32 %v2070_v35, %v1788_v39  ;;  %v2080_v49 = vadd.f32 %v2072_v5, %v1790_v53 }
 0x620   :  { %v4539_v13 = vmul.f32 -1.442695, %v2077_v38 }
 0x621   :  { %v4540_v3 = vmul.f32 -1.442695, %v2078_v46  ;;  %v4541_v7 = vmul.f32 -1.442695, %v2080_v49 }
 0x622   :  { %4980 = vpow2.f32 %v4539_v13 }
 0x623   :  { %4982 = vpow2.f32 %v4540_v3 }
 0x624   :  { %4984 = vpow2.f32 %v4541_v7 }
 0x625   :  { %4986 = vtanh.f32 %v2079_v4 }
 0x62c   :  { %v4981_v42 = vpop.eup %4980 }
 0x62d   :  { %v4983_v10 = vpop.eup %4982  ;;  %v2087_v27 = vadd.f32 1.0, %v4981_v42 }
 0x62e   :  { %v2088_v29 = vadd.f32 1.0, %v4983_v10  ;;  %v4985_v37 = vpop.eup %4984 }
 0x62f   :  { %4988 = vrcp.f32 %v2087_v27  ;;  %v4987_v32 = vpop.eup %4986  ;;  %v2097_v36 = vadd.f32 1.0, %v4985_v37  ;;  %v4804_v37 = vld [vmem:[%s6551_s4] ss:$16 sps:$4 sm:$0xff]  }
 0x630   :  { %4990 = vrcp.f32 %v2088_v29  ;;  %v4806_v29 = vld [vmem:[%s6551_s4 + $0x4] ss:$16 sps:$4 sm:$0xff]  }
 0x631   :  { %4992 = vrcp.f32 %v2097_v36  ;;  %v4813_v36 = vld [vmem:[%s6551_s4 + $0x28] ss:$16 sps:$4 sm:$0xff]  }
 0x639   :  { %v4989_v33 = vpop.eup %4988 }
 0x63a   :  { %v4991_v34 = vpop.eup %4990  ;;  %v2104_v35 = vmul.f32 %v4989_v33, %v4987_v32  ;;  %v4807_v32 = vld [vmem:[%s6551_s4 + $0x8] ss:$16 sps:$4 sm:$0xff]   ;;  %v4809_v33 = vld [vmem:[%s6551_s4 + $0xc] ss:$16 sps:$4 sm:$0xff]  }
 0x63b   :  { %v2103_v30 = vmul.f32 %v4991_v34, %v2101_v31  ;;  %v4993_v38 = vpop.eup %4992  ;;  %v4812_v31 = vld [vmem:[%s6551_s4 + $0x24] ss:$16 sps:$4 sm:$0xff]   ;;  %v4815_v34 = vld [vmem:[%s6551_s4 + $0x2c] ss:$16 sps:$4 sm:$0xff]  }
 0x63d   :  { %v5849_v28 = vadd.f32 %v2104_v35, %v2103_v30  ;;  %v4810_v35 = vld [vmem:[%s6551_s4 + $0x20] ss:$16 sps:$4 sm:$0xff]   ;;  %v4818_v30 = vld [vmem:[%s6551_s4 + $0x44] ss:$16 sps:$4 sm:$0xff]  }
 0x63f   :  { %4994 = vtanh.f32 %v5849_v28  ;;  %v2429_v11 = vrot.slane %v5849_v28, 6  ;;  %v4821_v28 = vld [vmem:[%s6551_s4 + $0x4c] ss:$16 sps:$4 sm:$0xff]  }
 0x649   :  { %v4995_v39 = vpop.eup %4994 }
 0x64a   :  { %v2107_v40 = vmul.f32 %v4995_v39, %v4993_v38  ;;  %v4816_v38 = vld [vmem:[%s6551_s4 + $0x40] ss:$16 sps:$4 sm:$0xff]   ;;  %v4819_v39 = vld [vmem:[%s6551_s4 + $0x48] ss:$16 sps:$4 sm:$0xff]  }
 0x64c   :  { %v2108_v41 = vpack.c.bf16 %v2107_v40, %v2107_v40  ;;  %v4824_v40 = vld [vmem:[%s6551_s4 + $0x64] ss:$16 sps:$4 sm:$0xff]  }
 0x64e   :  { %v2110_v46 = vrot.slane %v2108_v41, 4  ;;  %v2149_v13 = vrot.slane %v2108_v41, 1  ;;  %v4827_v41 = vld [vmem:[%s6551_s4 + $0x6c] ss:$16 sps:$4 sm:$0xff]  }
 0x650   :  { %2112 = vst [vmem:[#allocation3] sm:$0x20] %v2110_v46  ;;  %2344 = vmatmul.mubr.bf16.vlgmr.msra.gmra.mrb[28].mxu0 %v2149_v13  ;;  %2385 = vmatmul.mubr.bf16.vlgmr.msra.gmra.mrb[28].mxu1 %v2149_v13  ;;  %v4822_v46 = vld [vmem:[%s6551_s4 + $0x60] ss:$16 sps:$4 sm:$0xff]   ;;  %v4825_v13 = vld [vmem:[%s6551_s4 + $0x68] ss:$16 sps:$4 sm:$0xff]  }
 0x651   :  { %2640 = vmatpush1.bf16.msra.mxu0 %v5591_v54  ;;  %2681 = vmatpush1.bf16.msra.mxu1 %v5596_v55 }
 0x652   :  { %2641 = vmatprep.subr.bf16.mxu0 %v5605_v56  ;;  %2682 = vmatprep.subr.bf16.mxu1 %v5610_v57 }
 0x653   :  { %2671 = vmatprep.mubr.bf16.mxu0 %v5188_v2  ;;  %2712 = vmatprep.mubr.bf16.mxu1 %v5188_v2 }
 0x655   :  { %2642 = vmatpush1.bf16.msra.mxu0 %v5615_v51  ;;  %2683 = vmatpush1.bf16.msra.mxu1 %v5620_v52  ;;  %v2113_v52 = vld [vmem:[#allocation2 + $0x20] sm:$0x30] }
 0x656   :  { %2643 = vmatprep.subr.bf16.mxu0 %v5629_v58  ;;  %2684 = vmatprep.subr.bf16.mxu1 %v5634_v59 }
 0x659   :  { %2644 = vmatpush1.bf16.msra.mxu0 %v5639_v50  ;;  %2685 = vmatpush1.bf16.msra.mxu1 %v5644_v60 }
 0x65a   :  { %2645 = vmatprep.subr.bf16.mxu0 %v5658_v62  ;;  %2686 = vmatprep.subr.bf16.mxu1 %v5668_v0 }
 0x65d   :  { %2646 = vmatpush1.bf16.msra.mxu0 %v5653_v61  ;;  %2687 = vmatpush1.bf16.msra.mxu1 %v5663_v63  ;;  %v2114_v61 = vld [vmem:[#allocation2 + $0x28] sm:$0x30] }
 0x65e   :  { %2647 = vmatprep.subr.bf16.mxu0 %v5673_v1  ;;  %2688 = vmatprep.subr.bf16.mxu1 %v5679_v8 }
 0x661   :  { %2648 = vmatpush1.bf16.msra.mxu0 %v5686_v12  ;;  %2689 = vmatpush1.bf16.msra.mxu1 %v5693_v14  ;;  %v2116_v14 = vld [vmem:[#allocation2 + $0x38] sm:$0x30] }
 0x662   :  { %2649 = vmatprep.subr.bf16.mxu0 %v5698_v15  ;;  %2690 = vmatprep.subr.bf16.mxu1 %v5704_v16 }
 0x665   :  { %2650 = vmatpush1.bf16.msra.mxu0 %v5710_v17  ;;  %2691 = vmatpush1.bf16.msra.mxu1 %v5717_v18  ;;  %v2115_v17 = vld [vmem:[#allocation2 + $0x30] sm:$0x30] }
 0x666   :  { %2651 = vmatprep.subr.bf16.mxu0 %v5722_v19  ;;  %2692 = vmatprep.subr.bf16.mxu1 %v5728_v20 }
 0x669   :  { %2652 = vmatpush1.bf16.msra.mxu0 %v5734_v21  ;;  %2693 = vmatpush1.bf16.msra.mxu1 %v5741_v22 }
 0x66a   :  { %2653 = vmatprep.subr.bf16.mxu0 %v5746_v23  ;;  %2694 = vmatprep.subr.bf16.mxu1 %v5752_v24 }
 0x66d   :  { %2654 = vmatpush1.bf16.msra.mxu0 %v5758_v25  ;;  %2695 = vmatpush1.bf16.msra.mxu1 %v5765_v26 }
 0x66e   :  { %2984 = vmatprep.subr.bf16.mxu0 %v4806_v29  ;;  %3027 = vmatprep.subr.bf16.mxu1 %v4809_v33 }
 0x723   :  { %v2345_v54 = vpop.f32.mrb[28].mxu0  ;;  %v2386_v55 = vpop.f32.mrb[28].mxu1 }
 0x724   :  { %v2397_v56 = vrot.slane %v2345_v54, 4  ;;  %v2347_v57 = vpop.f32.mrb[29].mxu0  ;;  %v2388_v51 = vpop.f32.mrb[29].mxu1  ;;  %v2399_v16 = vrot.slane %v2386_v55, 4  ;;  %v4830_v54 = vld [vmem:[%s6551_s4 + $0x84] ss:$16 sps:$4 sm:$0xff]  }
 0x725   :  { %v2398_v58 = vrot.slane %v2347_v57, 4  ;;  %v2349_v59 = vpop.f32.mrb[30].mxu0  ;;  %v2390_v50 = vpop.f32.mrb[30].mxu1  ;;  %v2400_v12 = vrot.slane %v2388_v51, 4  ;;  %v4833_v55 = vld [vmem:[%s6551_s4 + $0x8c] ss:$16 sps:$4 sm:$0xff]  }
 0x726   :  { %v2405_v60 = vadd.f32 %v2397_v56, %v2113_v52  ;;  %v2350_v62 = vpop.f32.mrb[31].mxu0  ;;  %v2391_v63 = vpop.f32.mrb[31].mxu1  ;;  %v2407_v19 = vadd.f32 %v2399_v16, %v2115_v17  ;;  %v4828_v56 = vld [vmem:[%s6551_s4 + $0x80] ss:$16 sps:$4 sm:$0xff]   ;;  %v4831_v57 = vld [vmem:[%s6551_s4 + $0x88] ss:$16 sps:$4 sm:$0xff]  }
 0x727   :  { %v2406_v0 = vadd.f32 %v2398_v58, %v2114_v61  ;;  %v2408_v15 = vadd.f32 %v2400_v12, %v2116_v14  ;;  %v4834_v51 = vld [vmem:[%s6551_s4 + $0xa0] ss:$16 sps:$4 sm:$0xff]   ;;  %v4836_v52 = vld [vmem:[%s6551_s4 + $0xa4] ss:$16 sps:$4 sm:$0xff]   ;;  %v4837_v58 = vld [vmem:[%s6551_s4 + $0xa8] ss:$16 sps:$4 sm:$0xff]  }
 0x728   :  { %v4574_v1 = vmul.f32 -1.442695, %v2405_v60  ;;  %v4839_v59 = vld [vmem:[%s6551_s4 + $0xac] ss:$16 sps:$4 sm:$0xff]   ;;  %v4842_v50 = vld [vmem:[%s6551_s4 + $0xc4] ss:$16 sps:$4 sm:$0xff]  }
 0x729   :  { %v4575_v8 = vmul.f32 -1.442695, %v2406_v0  ;;  %v4576_v18 = vmul.f32 -1.442695, %v2408_v15  ;;  %v4845_v60 = vld [vmem:[%s6551_s4 + $0xcc] ss:$16 sps:$4 sm:$0xff]  }
 0x72a   :  { %4996 = vpow2.f32 %v4574_v1  ;;  %v4840_v61 = vld [vmem:[%s6551_s4 + $0xc0] ss:$16 sps:$4 sm:$0xff]   ;;  %v4843_v62 = vld [vmem:[%s6551_s4 + $0xc8] ss:$16 sps:$4 sm:$0xff]   ;;  %v4848_v63 = vld [vmem:[%s6551_s4 + $0xe4] ss:$16 sps:$4 sm:$0xff]  }
 0x72b   :  { %4998 = vpow2.f32 %v4575_v8  ;;  %v4846_v0 = vld [vmem:[%s6551_s4 + $0xe0] ss:$16 sps:$4 sm:$0xff]   ;;  %v4851_v1 = vld [vmem:[%s6551_s4 + $0xec] ss:$16 sps:$4 sm:$0xff]   ;;  %v5986_v8 = vld [vmem:[%s6552_s5 + $0x4] ss:$16 sps:$4 sm:$0xff]  }
 0x72c   :  { %5000 = vpow2.f32 %v4576_v18  ;;  %v4849_v12 = vld [vmem:[%s6551_s4 + $0xe8] ss:$16 sps:$4 sm:$0xff]   ;;  %v5994_v14 = vld [vmem:[%s6552_s5 + $0xc] ss:$16 sps:$4 sm:$0xff]  }
 0x72d   :  { %5002 = vtanh.f32 %v2407_v19 }
 0x734   :  { %v4997_v20 = vpop.eup %4996 }
 0x735   :  { %v4999_v21 = vpop.eup %4998  ;;  %v2415_v22 = vadd.f32 1.0, %v4997_v20  ;;  %v2441_v20 = vld [vmem:[#allocation2 + $0x20] sm:$0xc0] }
 0x736   :  { %v2416_v23 = vadd.f32 1.0, %v4999_v21  ;;  %v5001_v24 = vpop.eup %5000 }
 0x737   :  { %5004 = vrcp.f32 %v2415_v22  ;;  %v5003_v25 = vpop.eup %5002  ;;  %v2425_v53 = vadd.f32 1.0, %v5001_v24 }
 0x738   :  { %5006 = vrcp.f32 %v2416_v23 }
 0x739   :  { %5008 = vrcp.f32 %v2425_v53 }
 0x741   :  { %v5005_v26 = vpop.eup %5004 }
 0x742   :  { %v5007_v3 = vpop.eup %5006  ;;  %v2432_v5 = vmul.f32 %v5005_v26, %v5003_v25  ;;  %v2442_v25 = vld [vmem:[#allocation2 + $0x28] sm:$0xc0] }
 0x743   :  { %v2431_v49 = vmul.f32 %v5007_v3, %v2429_v11  ;;  %v5009_v6 = vpop.eup %5008 }
 0x745   :  { %v5885_v9 = vadd.f32 %v2432_v5, %v2431_v49 }
 0x747   :  { %5010 = vtanh.f32 %v5885_v9 }
 0x751   :  { %v5011_v7 = vpop.eup %5010 }
 0x752   :  { %v2435_v4 = vmul.f32 %v5011_v7, %v5009_v6  ;;  %v2444_v6 = vld [vmem:[#allocation2 + $0x38] sm:$0xc0] }
 0x754   :  { %v2436_v42 = vpack.c.bf16 %v2435_v4, %v2435_v4 }
 0x756   :  { %v2438_v10 = vrot.slane %v2436_v42, 4  ;;  %v2477_v27 = vrot.slane %v2436_v42, 2  ;;  %v2443_v42 = vld [vmem:[#allocation2 + $0x30] sm:$0xc0] }
 0x758   :  { %2440 = vst [vmem:[#allocation3] sm:$0x40] %v2438_v10  ;;  %2672 = vmatmul.mubr.bf16.vlgmr.msra.gmra.mrb[32].mxu0 %v2477_v27  ;;  %2713 = vmatmul.mubr.bf16.vlgmr.msra.gmra.mrb[32].mxu1 %v2477_v27 }
 0x759   :  { %3016 = vmatprep.mubr.bf16.mxu0 %v5188_v2  ;;  %3059 = vmatprep.mubr.bf16.mxu1 %v5188_v2 }
 0x75a   :  { %2985 = vmatpush1.bf16.msra.mxu0 %v4804_v37  ;;  %3028 = vmatpush1.bf16.msra.mxu1 %v4807_v32 }
 0x75b   :  { %2986 = vmatprep.subr.bf16.mxu0 %v4812_v31  ;;  %3029 = vmatprep.subr.bf16.mxu1 %v4815_v34 }
 0x75e   :  { %2987 = vmatpush1.bf16.msra.mxu0 %v4810_v35  ;;  %3030 = vmatpush1.bf16.msra.mxu1 %v4813_v36  ;;  %v2757_v36 = vrot.slane %v5885_v9, 6  ;;  %v6007_v9 = vld [vmem:[%s6552_s5 + $0x8] ss:$16 sps:$4 sm:$0xff]  }
 0x75f   :  { %2988 = vmatprep.subr.bf16.mxu0 %v4818_v30  ;;  %3031 = vmatprep.subr.bf16.mxu1 %v4821_v28 }
 0x762   :  { %2989 = vmatpush1.bf16.msra.mxu0 %v4816_v38  ;;  %3032 = vmatpush1.bf16.msra.mxu1 %v4819_v39 }
 0x763   :  { %2990 = vmatprep.subr.bf16.mxu0 %v4824_v40  ;;  %3033 = vmatprep.subr.bf16.mxu1 %v4827_v41 }
 0x766   :  { %2991 = vmatpush1.bf16.msra.mxu0 %v4822_v46  ;;  %3034 = vmatpush1.bf16.msra.mxu1 %v4825_v13 }
 0x767   :  { %2992 = vmatprep.subr.bf16.mxu0 %v4830_v54  ;;  %3035 = vmatprep.subr.bf16.mxu1 %v4833_v55 }
 0x76a   :  { %2993 = vmatpush1.bf16.msra.mxu0 %v4828_v56  ;;  %3036 = vmatpush1.bf16.msra.mxu1 %v4831_v57  ;;  %v6002_v56 = vld [vmem:[%s6552_s5] ss:$16 sps:$4 sm:$0xff]   ;;  %v6012_v57 = vld [vmem:[%s6552_s5 + $0x24] ss:$16 sps:$4 sm:$0xff]  }
 0x76b   :  { %2994 = vmatprep.subr.bf16.mxu0 %v4836_v52  ;;  %3037 = vmatprep.subr.bf16.mxu1 %v4839_v59  ;;  %v6029_v59 = vld [vmem:[%s6552_s5 + $0x28] ss:$16 sps:$4 sm:$0xff]  }
 0x76e   :  { %2995 = vmatpush1.bf16.msra.mxu0 %v4834_v51  ;;  %3038 = vmatpush1.bf16.msra.mxu1 %v4837_v58  ;;  %v6017_v51 = vld [vmem:[%s6552_s5 + $0x2c] ss:$16 sps:$4 sm:$0xff]   ;;  %v6024_v58 = vld [vmem:[%s6552_s5 + $0x20] ss:$16 sps:$4 sm:$0xff]  }
 0x76f   :  { %2996 = vmatprep.subr.bf16.mxu0 %v4842_v50  ;;  %3039 = vmatprep.subr.bf16.mxu1 %v4845_v60  ;;  %v6036_v50 = vld [vmem:[%s6552_s5 + $0x44] ss:$16 sps:$4 sm:$0xff]   ;;  %v6041_v60 = vld [vmem:[%s6552_s5 + $0x4c] ss:$16 sps:$4 sm:$0xff]  }
 0x772   :  { %2997 = vmatpush1.bf16.msra.mxu0 %v4840_v61  ;;  %3040 = vmatpush1.bf16.msra.mxu1 %v4843_v62  ;;  %v6050_v61 = vld [vmem:[%s6552_s5 + $0x40] ss:$16 sps:$4 sm:$0xff]   ;;  %v6055_v62 = vld [vmem:[%s6552_s5 + $0x48] ss:$16 sps:$4 sm:$0xff]  }
 0x773   :  { %2998 = vmatprep.subr.bf16.mxu0 %v4848_v63  ;;  %3041 = vmatprep.subr.bf16.mxu1 %v4851_v1  ;;  %v6062_v63 = vld [vmem:[%s6552_s5 + $0x64] ss:$16 sps:$4 sm:$0xff]   ;;  %v6074_v1 = vld [vmem:[%s6552_s5 + $0x60] ss:$16 sps:$4 sm:$0xff]  }
 0x776   :  { %2999 = vmatpush1.bf16.msra.mxu0 %v4846_v0  ;;  %3042 = vmatpush1.bf16.msra.mxu1 %v4849_v12  ;;  %v6067_v0 = vld [vmem:[%s6552_s5 + $0x6c] ss:$16 sps:$4 sm:$0xff]   ;;  %v6079_v12 = vld [vmem:[%s6552_s5 + $0x68] ss:$16 sps:$4 sm:$0xff]  }
 0x777   :  { %3274 = vmatprep.subr.bf16.mxu0 %v5986_v8  ;;  %3315 = vmatprep.subr.bf16.mxu1 %v5994_v14 }
 0x82b   :  { %v2673_v15 = vpop.f32.mrb[32].mxu0  ;;  %v2714_v16 = vpop.f32.mrb[32].mxu1 }
 0x82c   :  { %v2725_v17 = vrot.slane %v2673_v15, 2  ;;  %v2675_v18 = vpop.f32.mrb[33].mxu0  ;;  %v2716_v19 = vpop.f32.mrb[33].mxu1  ;;  %v2727_v4 = vrot.slane %v2714_v16, 2  ;;  %v6086_v15 = vld [vmem:[%s6552_s5 + $0x84] ss:$16 sps:$4 sm:$0xff]  }
 0x82d   :  { %v2726_v21 = vrot.slane %v2675_v18, 2  ;;  %v2677_v22 = vpop.f32.mrb[34].mxu0  ;;  %v2718_v23 = vpop.f32.mrb[34].mxu1  ;;  %v2728_v49 = vrot.slane %v2716_v19, 2  ;;  %v6091_v16 = vld [vmem:[%s6552_s5 + $0x8c] ss:$16 sps:$4 sm:$0xff]  }
 0x82e   :  { %v2733_v24 = vadd.f32 %v2725_v17, %v2441_v20  ;;  %v2678_v26 = vpop.f32.mrb[35].mxu0  ;;  %v2719_v11 = vpop.f32.mrb[35].mxu1  ;;  %v2735_v27 = vadd.f32 %v2727_v4, %v2443_v42  ;;  %v6098_v17 = vld [vmem:[%s6552_s5 + $0x80] ss:$16 sps:$4 sm:$0xff]   ;;  %v6103_v18 = vld [vmem:[%s6552_s5 + $0x88] ss:$16 sps:$4 sm:$0xff]  }
 0x82f   :  { %v2734_v3 = vadd.f32 %v2726_v21, %v2442_v25  ;;  %v2736_v7 = vadd.f32 %v2728_v49, %v2444_v6  ;;  %v6110_v19 = vld [vmem:[%s6552_s5 + $0xa4] ss:$16 sps:$4 sm:$0xff]   ;;  %v6115_v20 = vld [vmem:[%s6552_s5 + $0xac] ss:$16 sps:$4 sm:$0xff]   ;;  %v6122_v21 = vld [vmem:[%s6552_s5 + $0xa0] ss:$16 sps:$4 sm:$0xff]  }
 0x830   :  { %v4609_v5 = vmul.f32 -1.442695, %v2733_v24  ;;  %v6127_v22 = vld [vmem:[%s6552_s5 + $0xa8] ss:$16 sps:$4 sm:$0xff]   ;;  %v6134_v23 = vld [vmem:[%s6552_s5 + $0xc4] ss:$16 sps:$4 sm:$0xff]  }
 0x831   :  { %v4610_v53 = vmul.f32 -1.442695, %v2734_v3  ;;  %v4611_v10 = vmul.f32 -1.442695, %v2736_v7  ;;  %v6139_v24 = vld [vmem:[%s6552_s5 + $0xcc] ss:$16 sps:$4 sm:$0xff]  }
 0x832   :  { %5012 = vpow2.f32 %v4609_v5  ;;  %v6146_v25 = vld [vmem:[%s6552_s5 + $0xc0] ss:$16 sps:$4 sm:$0xff]   ;;  %v6151_v26 = vld [vmem:[%s6552_s5 + $0xc8] ss:$16 sps:$4 sm:$0xff]   ;;  %v6158_v11 = vld [vmem:[%s6552_s5 + $0xe4] ss:$16 sps:$4 sm:$0xff]  }
 0x833   :  { %5014 = vpow2.f32 %v4610_v53  ;;  %v6163_v3 = vld [vmem:[%s6552_s5 + $0xec] ss:$16 sps:$4 sm:$0xff]   ;;  %v6170_v5 = vld [vmem:[%s6552_s5 + $0xe0] ss:$16 sps:$4 sm:$0xff]   ;;  %v6175_v53 = vld [vmem:[%s6552_s5 + $0xe8] ss:$16 sps:$4 sm:$0xff]  }
 0x834   :  { %5016 = vpow2.f32 %v4611_v10  ;;  %v2802_v49 = vld [vmem:[%s6553_s6] sm:$0xf] }
 0x835   :  { %5018 = vtanh.f32 %v2735_v27  ;;  %v2807_v6 = vrot.slane %v2802_v49, %v43_v44  ;;  %v2815_v7 = vrot.slane %v2802_v49, %v51_v45  ;;  %v2811_v4 = vrot.slane %v2802_v49, %v47_v47 }
 0x836   :  { %v2819_v42 = vrot.slane %v2802_v49, %v55_v48 }
 0x83c   :  { %v5013_v29 = vpop.eup %5012 }
 0x83d   :  { %v5015_v37 = vpop.eup %5014  ;;  %v2743_v32 = vadd.f32 1.0, %v5013_v29 }
 0x83e   :  { %v2744_v33 = vadd.f32 1.0, %v5015_v37  ;;  %v5017_v31 = vpop.eup %5016 }
 0x83f   :  { %5020 = vrcp.f32 %v2743_v32  ;;  %v5019_v34 = vpop.eup %5018  ;;  %v2753_v38 = vadd.f32 1.0, %v5017_v31 }
 0x840   :  { %5022 = vrcp.f32 %v2744_v33 }
 0x841   :  { %5024 = vrcp.f32 %v2753_v38 }
 0x849   :  { %v5021_v35 = vpop.eup %5020 }
 0x84a   :  { %v5023_v30 = vpop.eup %5022  ;;  %v2760_v28 = vmul.f32 %v5021_v35, %v5019_v34 }
 0x84b   :  { %v2759_v39 = vmul.f32 %v5023_v30, %v2757_v36  ;;  %v5025_v41 = vpop.eup %5024 }
 0x84d   :  { %v2761_v40 = vadd.f32 %v2760_v28, %v2759_v39 }
 0x84f   :  { %5026 = vtanh.f32 %v2761_v40 }
 0x859   :  { %v5027_v46 = vpop.eup %5026 }
 0x85a   :  { %v2763_v13 = vmul.f32 %v5027_v46, %v5025_v41 }
 0x85c   :  { %v2764_v54 = vpack.c.bf16 %v2763_v13, %v2763_v13 }
 0x85e   :  { %v2766_v55 = vrot.slane %v2764_v54, 4 }
 0x860   :  { %2768 = vst [vmem:[#allocation3] sm:$0x80] %v2766_v55 }
 0x867   :  { %v2769_v52 = vld [vmem:[#allocation3] sm:$0xff] }
 0x868   :  { %3017 = vmatmul.mubr.bf16.vlgmr.msra.gmra.mrb[36].mxu0 %v2769_v52  ;;  %3060 = vmatmul.mubr.bf16.vlgmr.msra.gmra.mrb[36].mxu1 %v2769_v52 }
 0x869   :  { %3275 = vmatpush1.bf16.msra.mxu0 %v6002_v56  ;;  %3316 = vmatpush1.bf16.msra.mxu1 %v6007_v9 }
 0x86a   :  { %3276 = vmatprep.subr.bf16.mxu0 %v6012_v57  ;;  %3317 = vmatprep.subr.bf16.mxu1 %v6017_v51 }
 0x86b   :  { %3306 = vmatprep.mubr.bf16.mxu0 %v5188_v2  ;;  %3347 = vmatprep.mubr.bf16.mxu1 %v5188_v2 }
 0x86d   :  { %3277 = vmatpush1.bf16.msra.mxu0 %v6024_v58  ;;  %3318 = vmatpush1.bf16.msra.mxu1 %v6029_v59 }
 0x86e   :  { %3278 = vmatprep.subr.bf16.mxu0 %v6036_v50  ;;  %3319 = vmatprep.subr.bf16.mxu1 %v6041_v60 }
 0x871   :  { %3279 = vmatpush1.bf16.msra.mxu0 %v6050_v61  ;;  %3320 = vmatpush1.bf16.msra.mxu1 %v6055_v62 }
 0x872   :  { %3280 = vmatprep.subr.bf16.mxu0 %v6062_v63  ;;  %3321 = vmatprep.subr.bf16.mxu1 %v6067_v0 }
 0x875   :  { %3281 = vmatpush1.bf16.msra.mxu0 %v6074_v1  ;;  %3322 = vmatpush1.bf16.msra.mxu1 %v6079_v12 }
 0x876   :  { %3282 = vmatprep.subr.bf16.mxu0 %v6086_v15  ;;  %3323 = vmatprep.subr.bf16.mxu1 %v6091_v16 }
 0x879   :  { %3283 = vmatpush1.bf16.msra.mxu0 %v6098_v17  ;;  %3324 = vmatpush1.bf16.msra.mxu1 %v6103_v18 }
 0x87a   :  { %3284 = vmatprep.subr.bf16.mxu0 %v6110_v19  ;;  %3325 = vmatprep.subr.bf16.mxu1 %v6115_v20 }
 0x87d   :  { %3285 = vmatpush1.bf16.msra.mxu0 %v6122_v21  ;;  %3326 = vmatpush1.bf16.msra.mxu1 %v6127_v22 }
 0x87e   :  { %3286 = vmatprep.subr.bf16.mxu0 %v6134_v23  ;;  %3327 = vmatprep.subr.bf16.mxu1 %v6139_v24 }
 0x881   :  { %3287 = vmatpush1.bf16.msra.mxu0 %v6146_v25  ;;  %3328 = vmatpush1.bf16.msra.mxu1 %v6151_v26 }
 0x882   :  { %3288 = vmatprep.subr.bf16.mxu0 %v6158_v11  ;;  %3329 = vmatprep.subr.bf16.mxu1 %v6163_v3 }
 0x885   :  { %3289 = vmatpush1.bf16.msra.mxu0 %v6170_v5  ;;  %3330 = vmatpush1.bf16.msra.mxu1 %v6175_v53 }
 0x886   :  { %3389 = vmatprep.subr.bf16.mxu0 %v5986_v8  ;;  %3430 = vmatprep.subr.bf16.mxu1 %v5994_v14 }
 0x888   :  { %3307 = vmatmul.mubr.bf16.vlgmr.msra.gmra.mrb[40].mxu0 %v5188_v2  ;;  %3348 = vmatmul.mubr.bf16.vlgmr.msra.gmra.mrb[40].mxu1 %v5188_v2 }
 0x889   :  { %3390 = vmatpush1.bf16.msra.mxu0 %v6002_v56  ;;  %3431 = vmatpush1.bf16.msra.mxu1 %v6007_v9 }
 0x88a   :  { %3391 = vmatprep.subr.bf16.mxu0 %v6012_v57  ;;  %3432 = vmatprep.subr.bf16.mxu1 %v6017_v51 }
 0x88b   :  { %3421 = vmatprep.mubr.bf16.mxu0 %v5188_v2  ;;  %3462 = vmatprep.mubr.bf16.mxu1 %v5188_v2 }
 0x88d   :  { %3392 = vmatpush1.bf16.msra.mxu0 %v6024_v58  ;;  %3433 = vmatpush1.bf16.msra.mxu1 %v6029_v59 }
 0x88e   :  { %3393 = vmatprep.subr.bf16.mxu0 %v6036_v50  ;;  %3434 = vmatprep.subr.bf16.mxu1 %v6041_v60 }
 0x891   :  { %3394 = vmatpush1.bf16.msra.mxu0 %v6050_v61  ;;  %3435 = vmatpush1.bf16.msra.mxu1 %v6055_v62 }
 0x892   :  { %3395 = vmatprep.subr.bf16.mxu0 %v6062_v63  ;;  %3436 = vmatprep.subr.bf16.mxu1 %v6067_v0 }
 0x895   :  { %3396 = vmatpush1.bf16.msra.mxu0 %v6074_v1  ;;  %3437 = vmatpush1.bf16.msra.mxu1 %v6079_v12 }
 0x896   :  { %3397 = vmatprep.subr.bf16.mxu0 %v6086_v15  ;;  %3438 = vmatprep.subr.bf16.mxu1 %v6091_v16 }
 0x899   :  { %3398 = vmatpush1.bf16.msra.mxu0 %v6098_v17  ;;  %3439 = vmatpush1.bf16.msra.mxu1 %v6103_v18 }
 0x89a   :  { %3399 = vmatprep.subr.bf16.mxu0 %v6110_v19  ;;  %3440 = vmatprep.subr.bf16.mxu1 %v6115_v20 }
 0x89d   :  { %3400 = vmatpush1.bf16.msra.mxu0 %v6122_v21  ;;  %3441 = vmatpush1.bf16.msra.mxu1 %v6127_v22 }
 0x89e   :  { %3401 = vmatprep.subr.bf16.mxu0 %v6134_v23  ;;  %3442 = vmatprep.subr.bf16.mxu1 %v6139_v24 }
 0x8a1   :  { %3402 = vmatpush1.bf16.msra.mxu0 %v6146_v25  ;;  %3443 = vmatpush1.bf16.msra.mxu1 %v6151_v26 }
 0x8a2   :  { %3403 = vmatprep.subr.bf16.mxu0 %v6158_v11  ;;  %3444 = vmatprep.subr.bf16.mxu1 %v6163_v3 }
 0x8a5   :  { %3404 = vmatpush1.bf16.msra.mxu0 %v6170_v5  ;;  %3445 = vmatpush1.bf16.msra.mxu1 %v6175_v53 }
 0x8a6   :  { %3522 = vmatprep.subr.bf16.mxu0 %v5986_v8  ;;  %3563 = vmatprep.subr.bf16.mxu1 %v5994_v14 }
 0x93b   :  { %v3018_v10 = vpop.f32.mrb[36].mxu0  ;;  %v3061_v27 = vpop.f32.mrb[36].mxu1 }
 0x93c   :  { %v3019_v29 = vadd.f32 %v3018_v10, %v2807_v6  ;;  %v3062_v37 = vadd.f32 %v3061_v27, %v2815_v7  ;;  %v3020_v32 = vpop.f32.mrb[37].mxu0  ;;  %v3063_v33 = vpop.f32.mrb[37].mxu1 }
 0x93d   :  { %v3021_v31 = vadd.f32 %v3020_v32, %v2811_v4  ;;  %v3064_v34 = vadd.f32 %v3063_v33, %v2819_v42  ;;  %v3022_v35 = vpop.f32.mrb[38].mxu0  ;;  %v3065_v36 = vpop.f32.mrb[38].mxu1 }
 0x93e   :  { %3070 = vst [vmem:[#allocation2] sm:$0xff] %v3019_v29  ;;  %3072 = vst [vmem:[#allocation2 + $0x10] sm:$0xff] %v3062_v37  ;;  %v3023_v44 = vadd.f32 %v3022_v35, %v2807_v6  ;;  %v3066_v45 = vadd.f32 %v3065_v36, %v2815_v7  ;;  %v3024_v30 = vpop.f32.mrb[39].mxu0  ;;  %v3067_v28 = vpop.f32.mrb[39].mxu1 }
 0x93f   :  { %3071 = vst [vmem:[#allocation2 + $0x8] sm:$0xff] %v3021_v31  ;;  %3073 = vst [vmem:[#allocation2 + $0x18] sm:$0xff] %v3064_v34  ;;  %v3025_v43 = vadd.f32 %v3024_v30, %v2811_v4  ;;  %v3068_v47 = vadd.f32 %v3067_v28, %v2819_v42 }
 0x940   :  { %3074 = vst [vmem:[#allocation2 + $0x20] sm:$0xff] %v3023_v44  ;;  %3076 = vst [vmem:[#allocation2 + $0x30] sm:$0xff] %v3066_v45 }
 0x941   :  { %3075 = vst [vmem:[#allocation2 + $0x28] sm:$0xff] %v3025_v43  ;;  %3077 = vst [vmem:[#allocation2 + $0x38] sm:$0xff] %v3068_v47 }
 0x945   :  { %v3078_v48 = vld [vmem:[#allocation2] sm:$0x3]  ;;  %v3080_v27 = vld [vmem:[#allocation2 + $0x10] sm:$0x3] }
 0x946   :  { %v3079_v41 = vld [vmem:[#allocation2 + $0x8] sm:$0x3]  ;;  %v3081_v4 = vld [vmem:[#allocation2 + $0x18] sm:$0x3] }
 0x95b   :  { %v3308_v38 = vpop.f32.mrb[40].mxu0  ;;  %v3349_v39 = vpop.f32.mrb[40].mxu1 }
 0x95c   :  { %v3356_v40 = vadd.f32 %v3308_v38, %v3078_v48  ;;  %v3310_v46 = vpop.f32.mrb[41].mxu0  ;;  %v3351_v13 = vpop.f32.mrb[41].mxu1  ;;  %v3358_v37 = vadd.f32 %v3349_v39, %v3080_v27 }
 0x95d   :  { %v3357_v54 = vadd.f32 %v3310_v46, %v3079_v41  ;;  %v3312_v55 = vpop.f32.mrb[42].mxu0  ;;  %v3353_v52 = vpop.f32.mrb[42].mxu1  ;;  %v3359_v42 = vadd.f32 %v3351_v13, %v3081_v4  ;;  %v3385_v4 = vld [vmem:[#allocation2 + $0x8] sm:$0xc] }
 0x95e   :  { %v4676_v49 = vmul.f32 -1.442695, %v3356_v40  ;;  %v3313_v6 = vpop.f32.mrb[43].mxu0  ;;  %v3354_v7 = vpop.f32.mrb[43].mxu1  ;;  %v3384_v52 = vld [vmem:[#allocation2] sm:$0xc] }
 0x95f   :  { %v4677_v10 = vmul.f32 -1.442695, %v3357_v54  ;;  %v4678_v29 = vmul.f32 -1.442695, %v3359_v42 }
 0x960   :  { %5028 = vpow2.f32 %v4676_v49 }
 0x961   :  { %5030 = vpow2.f32 %v4677_v10 }
 0x962   :  { %5032 = vpow2.f32 %v4678_v29 }
 0x963   :  { %5034 = vtanh.f32 %v3358_v37 }
 0x96a   :  { %v5029_v32 = vpop.eup %5028 }
 0x96b   :  { %v5031_v33 = vpop.eup %5030  ;;  %v3366_v31 = vadd.f32 1.0, %v5029_v32 }
 0x96c   :  { %v3367_v34 = vadd.f32 1.0, %v5031_v33  ;;  %v5033_v35 = vpop.eup %5032 }
 0x96d   :  { %5036 = vrcp.f32 %v3366_v31  ;;  %v5035_v36 = vpop.eup %5034  ;;  %v3376_v28 = vadd.f32 1.0, %v5033_v35  ;;  %v3387_v31 = vld [vmem:[#allocation2 + $0x18] sm:$0xc] }
 0x96e   :  { %5038 = vrcp.f32 %v3367_v34 }
 0x96f   :  { %5040 = vrcp.f32 %v3376_v28 }
 0x977   :  { %v5037_v44 = vpop.eup %5036 }
 0x978   :  { %v5039_v45 = vpop.eup %5038  ;;  %v3380_v30 = vmul.f32 %v5037_v44, %v5035_v36  ;;  %v3386_v36 = vld [vmem:[#allocation2 + $0x10] sm:$0xc] }
 0x979   :  { %v3379_v43 = vmul.f32 0.0, %v5039_v45  ;;  %v5041_v48 = vpop.eup %5040 }
 0x97b   :  { %v6230_v47 = vadd.f32 %v3380_v30, %v3379_v43 }
 0x97d   :  { %5042 = vtanh.f32 %v6230_v47 }
 0x987   :  { %v5043_v38 = vpop.eup %5042 }
 0x988   :  { %v3383_v39 = vmul.f32 %v5043_v38, %v5041_v48 }
 0x98a   :  { %v3388_v40 = vpack.c.bf16 %v3383_v39, %v3383_v39 }
 0x98c   :  { %3422 = vmatmul.mubr.bf16.vlgmr.msra.gmra.mrb[44].mxu0 %v3388_v40  ;;  %3463 = vmatmul.mubr.bf16.vlgmr.msra.gmra.mrb[44].mxu1 %v3388_v40 }
 0x98d   :  { %3523 = vmatpush1.bf16.msra.mxu0 %v6002_v56  ;;  %3564 = vmatpush1.bf16.msra.mxu1 %v6007_v9 }
 0x98e   :  { %3524 = vmatprep.subr.bf16.mxu0 %v6012_v57  ;;  %3565 = vmatprep.subr.bf16.mxu1 %v6017_v51 }
 0x98f   :  { %3554 = vmatprep.mubr.bf16.mxu0 %v5188_v2  ;;  %3595 = vmatprep.mubr.bf16.mxu1 %v5188_v2 }
 0x991   :  { %3525 = vmatpush1.bf16.msra.mxu0 %v6024_v58  ;;  %3566 = vmatpush1.bf16.msra.mxu1 %v6029_v59 }
 0x992   :  { %3526 = vmatprep.subr.bf16.mxu0 %v6036_v50  ;;  %3567 = vmatprep.subr.bf16.mxu1 %v6041_v60 }
 0x995   :  { %3527 = vmatpush1.bf16.msra.mxu0 %v6050_v61  ;;  %3568 = vmatpush1.bf16.msra.mxu1 %v6055_v62 }
 0x996   :  { %3528 = vmatprep.subr.bf16.mxu0 %v6062_v63  ;;  %3569 = vmatprep.subr.bf16.mxu1 %v6067_v0 }
 0x999   :  { %3529 = vmatpush1.bf16.msra.mxu0 %v6074_v1  ;;  %3570 = vmatpush1.bf16.msra.mxu1 %v6079_v12 }
 0x99a   :  { %3530 = vmatprep.subr.bf16.mxu0 %v6086_v15  ;;  %3571 = vmatprep.subr.bf16.mxu1 %v6091_v16 }
 0x99d   :  { %3531 = vmatpush1.bf16.msra.mxu0 %v6098_v17  ;;  %3572 = vmatpush1.bf16.msra.mxu1 %v6103_v18 }
 0x99e   :  { %3532 = vmatprep.subr.bf16.mxu0 %v6110_v19  ;;  %3573 = vmatprep.subr.bf16.mxu1 %v6115_v20 }
 0x9a1   :  { %3533 = vmatpush1.bf16.msra.mxu0 %v6122_v21  ;;  %3574 = vmatpush1.bf16.msra.mxu1 %v6127_v22 }
 0x9a2   :  { %3534 = vmatprep.subr.bf16.mxu0 %v6134_v23  ;;  %3575 = vmatprep.subr.bf16.mxu1 %v6139_v24 }
 0x9a5   :  { %3535 = vmatpush1.bf16.msra.mxu0 %v6146_v25  ;;  %3576 = vmatpush1.bf16.msra.mxu1 %v6151_v26 }
 0x9a6   :  { %3536 = vmatprep.subr.bf16.mxu0 %v6158_v11  ;;  %3577 = vmatprep.subr.bf16.mxu1 %v6163_v3 }
 0x9a9   :  { %3537 = vmatpush1.bf16.msra.mxu0 %v6170_v5  ;;  %3578 = vmatpush1.bf16.msra.mxu1 %v6175_v53 }
 0x9aa   :  { %3655 = vmatprep.subr.bf16.mxu0 %v5986_v8  ;;  %3696 = vmatprep.subr.bf16.mxu1 %v5994_v14 }
 0xa5f   :  { %v3423_v41 = vpop.f32.mrb[44].mxu0  ;;  %v3464_v46 = vpop.f32.mrb[44].mxu1 }
 0xa60   :  { %v3475_v13 = vrot.slane %v3423_v41, 6  ;;  %v3425_v54 = vpop.f32.mrb[45].mxu0  ;;  %v3466_v55 = vpop.f32.mrb[45].mxu1  ;;  %v3477_v35 = vrot.slane %v3464_v46, 6  ;;  %v3507_v41 = vrot.slane %v6230_v47, 6 }
 0xa61   :  { %v3476_v49 = vrot.slane %v3425_v54, 6  ;;  %v3427_v6 = vpop.f32.mrb[46].mxu0  ;;  %v3468_v7 = vpop.f32.mrb[46].mxu1  ;;  %v3478_v33 = vrot.slane %v3466_v55, 6 }
 0xa62   :  { %v3483_v10 = vadd.f32 %v3475_v13, %v3384_v52  ;;  %v3428_v42 = vpop.f32.mrb[47].mxu0  ;;  %v3469_v27 = vpop.f32.mrb[47].mxu1  ;;  %v3485_v45 = vadd.f32 %v3477_v35, %v3386_v36  ;;  %v3515_v36 = vld [vmem:[#allocation2 + $0x8] sm:$0x30] }
 0xa63   :  { %v3484_v29 = vadd.f32 %v3476_v49, %v3385_v4  ;;  %v3486_v34 = vadd.f32 %v3478_v33, %v3387_v31 }
 0xa64   :  { %v4679_v37 = vmul.f32 -1.442695, %v3483_v10 }
 0xa65   :  { %v4680_v32 = vmul.f32 -1.442695, %v3484_v29  ;;  %v4681_v44 = vmul.f32 -1.442695, %v3486_v34 }
 0xa66   :  { %5044 = vpow2.f32 %v4679_v37 }
 0xa67   :  { %5046 = vpow2.f32 %v4680_v32  ;;  %v3514_v32 = vld [vmem:[#allocation2] sm:$0x30] }
 0xa68   :  { %5048 = vpow2.f32 %v4681_v44 }
 0xa69   :  { %5050 = vtanh.f32 %v3485_v45 }
 0xa70   :  { %v5045_v30 = vpop.eup %5044 }
 0xa71   :  { %v5047_v28 = vpop.eup %5046  ;;  %v3493_v43 = vadd.f32 1.0, %v5045_v30 }
 0xa72   :  { %v3494_v48 = vadd.f32 1.0, %v5047_v28  ;;  %v5049_v38 = vpop.eup %5048 }
 0xa73   :  { %5052 = vrcp.f32 %v3493_v43  ;;  %v5051_v39 = vpop.eup %5050  ;;  %v3503_v55 = vadd.f32 1.0, %v5049_v38  ;;  %v3517_v38 = vld [vmem:[#allocation2 + $0x18] sm:$0x30] }
 0xa74   :  { %5054 = vrcp.f32 %v3494_v48 }
 0xa75   :  { %5056 = vrcp.f32 %v3503_v55 }
 0xa7d   :  { %v5053_v40 = vpop.eup %5052 }
 0xa7e   :  { %v5055_v13 = vpop.eup %5054  ;;  %v3510_v54 = vmul.f32 %v5053_v40, %v5051_v39 }
 0xa7f   :  { %v3509_v46 = vmul.f32 %v5055_v13, %v3507_v41  ;;  %v5057_v49 = vpop.eup %5056  ;;  %v3516_v41 = vld [vmem:[#allocation2 + $0x10] sm:$0x30] }
 0xa81   :  { %v6268_v52 = vadd.f32 %v3510_v54, %v3509_v46 }
 0xa83   :  { %5058 = vtanh.f32 %v6268_v52 }
 0xa8d   :  { %v5059_v6 = vpop.eup %5058 }
 0xa8e   :  { %v3513_v7 = vmul.f32 %v5059_v6, %v5057_v49 }
 0xa90   :  { %v3518_v10 = vpack.c.bf16 %v3513_v7, %v3513_v7 }
 0xa92   :  { %v3520_v4 = vrot.slane %v3518_v10, 1 }
 0xa94   :  { %3555 = vmatmul.mubr.bf16.vlgmr.msra.gmra.mrb[48].mxu0 %v3520_v4  ;;  %3596 = vmatmul.mubr.bf16.vlgmr.msra.gmra.mrb[48].mxu1 %v3520_v4 }
 0xa95   :  { %3656 = vmatpush1.bf16.msra.mxu0 %v6002_v56  ;;  %3697 = vmatpush1.bf16.msra.mxu1 %v6007_v9 }
 0xa96   :  { %3657 = vmatprep.subr.bf16.mxu0 %v6012_v57  ;;  %3698 = vmatprep.subr.bf16.mxu1 %v6017_v51 }
 0xa97   :  { %3687 = vmatprep.mubr.bf16.mxu0 %v5188_v2  ;;  %3728 = vmatprep.mubr.bf16.mxu1 %v5188_v2 }
 0xa99   :  { %3658 = vmatpush1.bf16.msra.mxu0 %v6024_v58  ;;  %3699 = vmatpush1.bf16.msra.mxu1 %v6029_v59 }
 0xa9a   :  { %3659 = vmatprep.subr.bf16.mxu0 %v6036_v50  ;;  %3700 = vmatprep.subr.bf16.mxu1 %v6041_v60 }
 0xa9d   :  { %3660 = vmatpush1.bf16.msra.mxu0 %v6050_v61  ;;  %3701 = vmatpush1.bf16.msra.mxu1 %v6055_v62 }
 0xa9e   :  { %3661 = vmatprep.subr.bf16.mxu0 %v6062_v63  ;;  %3702 = vmatprep.subr.bf16.mxu1 %v6067_v0 }
 0xaa1   :  { %3662 = vmatpush1.bf16.msra.mxu0 %v6074_v1  ;;  %3703 = vmatpush1.bf16.msra.mxu1 %v6079_v12 }
 0xaa2   :  { %3663 = vmatprep.subr.bf16.mxu0 %v6086_v15  ;;  %3704 = vmatprep.subr.bf16.mxu1 %v6091_v16 }
 0xaa5   :  { %3664 = vmatpush1.bf16.msra.mxu0 %v6098_v17  ;;  %3705 = vmatpush1.bf16.msra.mxu1 %v6103_v18 }
 0xaa6   :  { %3665 = vmatprep.subr.bf16.mxu0 %v6110_v19  ;;  %3706 = vmatprep.subr.bf16.mxu1 %v6115_v20 }
 0xaa9   :  { %3666 = vmatpush1.bf16.msra.mxu0 %v6122_v21  ;;  %3707 = vmatpush1.bf16.msra.mxu1 %v6127_v22 }
 0xaaa   :  { %3667 = vmatprep.subr.bf16.mxu0 %v6134_v23  ;;  %3708 = vmatprep.subr.bf16.mxu1 %v6139_v24 }
 0xaad   :  { %3668 = vmatpush1.bf16.msra.mxu0 %v6146_v25  ;;  %3709 = vmatpush1.bf16.msra.mxu1 %v6151_v26 }
 0xaae   :  { %3669 = vmatprep.subr.bf16.mxu0 %v6158_v11  ;;  %3710 = vmatprep.subr.bf16.mxu1 %v6163_v3 }
 0xab1   :  { %3670 = vmatpush1.bf16.msra.mxu0 %v6170_v5  ;;  %3711 = vmatpush1.bf16.msra.mxu1 %v6175_v53 }
 0xab2   :  { %3788 = vmatprep.subr.bf16.mxu0 %v5986_v8  ;;  %3829 = vmatprep.subr.bf16.mxu1 %v5994_v14 }
 0xb67   :  { %v3556_v47 = vpop.f32.mrb[48].mxu0  ;;  %v3597_v42 = vpop.f32.mrb[48].mxu1 }
 0xb68   :  { %v3608_v27 = vrot.slane %v3556_v47, 4  ;;  %v3558_v29 = vpop.f32.mrb[49].mxu0  ;;  %v3599_v37 = vpop.f32.mrb[49].mxu1  ;;  %v3610_v40 = vrot.slane %v3597_v42, 4  ;;  %v3640_v47 = vrot.slane %v6268_v52, 6 }
 0xb69   :  { %v3609_v33 = vrot.slane %v3558_v29, 4  ;;  %v3560_v31 = vpop.f32.mrb[50].mxu0  ;;  %v3601_v34 = vpop.f32.mrb[50].mxu1  ;;  %v3611_v48 = vrot.slane %v3599_v37, 4 }
 0xb6a   :  { %v3616_v35 = vadd.f32 %v3608_v27, %v3514_v32  ;;  %v3561_v44 = vpop.f32.mrb[51].mxu0  ;;  %v3602_v45 = vpop.f32.mrb[51].mxu1  ;;  %v3618_v54 = vadd.f32 %v3610_v40, %v3516_v41  ;;  %v3648_v41 = vld [vmem:[#allocation2 + $0x8] sm:$0xc0] }
 0xb6b   :  { %v3617_v30 = vadd.f32 %v3609_v33, %v3515_v36  ;;  %v3619_v39 = vadd.f32 %v3611_v48, %v3517_v38 }
 0xb6c   :  { %v4682_v28 = vmul.f32 -1.442695, %v3616_v35 }
 0xb6d   :  { %v4683_v43 = vmul.f32 -1.442695, %v3617_v30  ;;  %v4684_v13 = vmul.f32 -1.442695, %v3619_v39 }
 0xb6e   :  { %5060 = vpow2.f32 %v4682_v28 }
 0xb6f   :  { %5062 = vpow2.f32 %v4683_v43  ;;  %v3647_v43 = vld [vmem:[#allocation2] sm:$0xc0] }
 0xb70   :  { %5064 = vpow2.f32 %v4684_v13 }
 0xb71   :  { %5066 = vtanh.f32 %v3618_v54 }
 0xb78   :  { %v5061_v55 = vpop.eup %5060 }
 0xb79   :  { %v5063_v46 = vpop.eup %5062  ;;  %v3626_v49 = vadd.f32 1.0, %v5061_v55 }
 0xb7a   :  { %v3627_v6 = vadd.f32 1.0, %v5063_v46  ;;  %v5065_v7 = vpop.eup %5064 }
 0xb7b   :  { %5068 = vrcp.f32 %v3626_v49  ;;  %v5067_v10 = vpop.eup %5066  ;;  %v3636_v37 = vadd.f32 1.0, %v5065_v7 }
 0xb7c   :  { %5070 = vrcp.f32 %v3627_v6 }
 0xb7d   :  { %5072 = vrcp.f32 %v3636_v37 }
 0xb85   :  { %v5069_v4 = vpop.eup %5068 }
 0xb86   :  { %v5071_v27 = vpop.eup %5070  ;;  %v3643_v29 = vmul.f32 %v5069_v4, %v5067_v10  ;;  %v3649_v10 = vld [vmem:[#allocation2 + $0x10] sm:$0xc0] }
 0xb87   :  { %v3642_v42 = vmul.f32 %v5071_v27, %v3640_v47  ;;  %v5073_v33 = vpop.eup %5072 }
 0xb89   :  { %v6306_v32 = vadd.f32 %v3643_v29, %v3642_v42 }
 0xb8b   :  { %5074 = vtanh.f32 %v6306_v32 }
 0xb95   :  { %v5075_v31 = vpop.eup %5074 }
 0xb96   :  { %v3646_v34 = vmul.f32 %v5075_v31, %v5073_v33 }
 0xb98   :  { %v3651_v35 = vpack.c.bf16 %v3646_v34, %v3646_v34 }
 0xb9a   :  { %v3653_v36 = vrot.slane %v3651_v35, 2  ;;  %v3773_v35 = vrot.slane %v6306_v32, 6 }
 0xb9c   :  { %3688 = vmatmul.mubr.bf16.vlgmr.msra.gmra.mrb[52].mxu0 %v3653_v36  ;;  %3729 = vmatmul.mubr.bf16.vlgmr.msra.gmra.mrb[52].mxu1 %v3653_v36 }
 0xb9d   :  { %3789 = vmatpush1.bf16.msra.mxu0 %v6002_v56  ;;  %3830 = vmatpush1.bf16.msra.mxu1 %v6007_v9 }
 0xb9e   :  { %3790 = vmatprep.subr.bf16.mxu0 %v6012_v57  ;;  %3831 = vmatprep.subr.bf16.mxu1 %v6017_v51 }
 0xb9f   :  { %3820 = vmatprep.mubr.bf16.mxu0 %v5188_v2  ;;  %3861 = vmatprep.mubr.bf16.mxu1 %v5188_v2 }
 0xba1   :  { %3791 = vmatpush1.bf16.msra.mxu0 %v6024_v58  ;;  %3832 = vmatpush1.bf16.msra.mxu1 %v6029_v59 }
 0xba2   :  { %3792 = vmatprep.subr.bf16.mxu0 %v6036_v50  ;;  %3833 = vmatprep.subr.bf16.mxu1 %v6041_v60 }
 0xba5   :  { %3793 = vmatpush1.bf16.msra.mxu0 %v6050_v61  ;;  %3834 = vmatpush1.bf16.msra.mxu1 %v6055_v62 }
 0xba6   :  { %3794 = vmatprep.subr.bf16.mxu0 %v6062_v63  ;;  %3835 = vmatprep.subr.bf16.mxu1 %v6067_v0 }
 0xba9   :  { %3795 = vmatpush1.bf16.msra.mxu0 %v6074_v1  ;;  %3836 = vmatpush1.bf16.msra.mxu1 %v6079_v12 }
 0xbaa   :  { %3796 = vmatprep.subr.bf16.mxu0 %v6086_v15  ;;  %3837 = vmatprep.subr.bf16.mxu1 %v6091_v16 }
 0xbad   :  { %3797 = vmatpush1.bf16.msra.mxu0 %v6098_v17  ;;  %3838 = vmatpush1.bf16.msra.mxu1 %v6103_v18 }
 0xbae   :  { %3798 = vmatprep.subr.bf16.mxu0 %v6110_v19  ;;  %3839 = vmatprep.subr.bf16.mxu1 %v6115_v20 }
 0xbb1   :  { %3799 = vmatpush1.bf16.msra.mxu0 %v6122_v21  ;;  %3840 = vmatpush1.bf16.msra.mxu1 %v6127_v22 }
 0xbb2   :  { %3800 = vmatprep.subr.bf16.mxu0 %v6134_v23  ;;  %3841 = vmatprep.subr.bf16.mxu1 %v6139_v24 }
 0xbb5   :  { %3801 = vmatpush1.bf16.msra.mxu0 %v6146_v25  ;;  %3842 = vmatpush1.bf16.msra.mxu1 %v6151_v26 }
 0xbb6   :  { %3802 = vmatprep.subr.bf16.mxu0 %v6158_v11  ;;  %3843 = vmatprep.subr.bf16.mxu1 %v6163_v3 }
 0xbb9   :  { %3803 = vmatpush1.bf16.msra.mxu0 %v6170_v5  ;;  %3844 = vmatpush1.bf16.msra.mxu1 %v6175_v53 }
 0xbba   :  { %3906 = vmatprep.subr.bf16.mxu0 %v5986_v8  ;;  %3947 = vmatprep.subr.bf16.mxu1 %v5994_v14  ;;  %v3650_v8 = vld [vmem:[#allocation2 + $0x18] sm:$0xc0] }
 0xc6f   :  { %v3689_v52 = vpop.f32.mrb[52].mxu0  ;;  %v3730_v44 = vpop.f32.mrb[52].mxu1 }
 0xc70   :  { %v3741_v45 = vrot.slane %v3689_v52, 2  ;;  %v3691_v30 = vpop.f32.mrb[53].mxu0  ;;  %v3732_v28 = vpop.f32.mrb[53].mxu1  ;;  %v3743_v7 = vrot.slane %v3730_v44, 2 }
 0xc71   :  { %v3742_v48 = vrot.slane %v3691_v30, 2  ;;  %v3693_v38 = vpop.f32.mrb[54].mxu0  ;;  %v3734_v39 = vpop.f32.mrb[54].mxu1  ;;  %v3744_v6 = vrot.slane %v3732_v28, 2 }
 0xc72   :  { %v3749_v40 = vadd.f32 %v3741_v45, %v3647_v43  ;;  %v3694_v13 = vpop.f32.mrb[55].mxu0  ;;  %v3735_v54 = vpop.f32.mrb[55].mxu1  ;;  %v3751_v47 = vadd.f32 %v3743_v7, %v3649_v10  ;;  %v3783_v10 = vld [vmem:[#allocation2 + $0x38] sm:$0x3] }
 0xc73   :  { %v3750_v55 = vadd.f32 %v3742_v48, %v3648_v41  ;;  %v3752_v14 = vadd.f32 %v3744_v6, %v3650_v8  ;;  %v3781_v41 = vld [vmem:[#allocation2 + $0x28] sm:$0x3] }
 0xc74   :  { %v4685_v46 = vmul.f32 -1.442695, %v3749_v40 }
 0xc75   :  { %v4686_v49 = vmul.f32 -1.442695, %v3750_v55  ;;  %v4687_v4 = vmul.f32 -1.442695, %v3752_v14 }
 0xc76   :  { %5076 = vpow2.f32 %v4685_v46 }
 0xc77   :  { %5078 = vpow2.f32 %v4686_v49 }
 0xc78   :  { %5080 = vpow2.f32 %v4687_v4 }
 0xc79   :  { %5082 = vtanh.f32 %v3751_v47  ;;  %v3782_v47 = vld [vmem:[#allocation2 + $0x30] sm:$0x3] }
 0xc80   :  { %v5077_v27 = vpop.eup %5076 }
 0xc81   :  { %v5079_v29 = vpop.eup %5078  ;;  %v3759_v37 = vadd.f32 1.0, %v5077_v27 }
 0xc82   :  { %v3760_v42 = vadd.f32 1.0, %v5079_v29  ;;  %v5081_v33 = vpop.eup %5080 }
 0xc83   :  { %5084 = vrcp.f32 %v3759_v37  ;;  %v5083_v31 = vpop.eup %5082  ;;  %v3769_v45 = vadd.f32 1.0, %v5081_v33 }
 0xc84   :  { %5086 = vrcp.f32 %v3760_v42 }
 0xc85   :  { %5088 = vrcp.f32 %v3769_v45 }
 0xc8d   :  { %v5085_v34 = vpop.eup %5084 }
 0xc8e   :  { %v5087_v36 = vpop.eup %5086  ;;  %v3776_v52 = vmul.f32 %v5085_v34, %v5083_v31 }
 0xc8f   :  { %v3775_v44 = vmul.f32 %v5087_v36, %v3773_v35  ;;  %v5089_v28 = vpop.eup %5088 }
 0xc91   :  { %v6344_v30 = vadd.f32 %v3776_v52, %v3775_v44 }
 0xc93   :  { %5090 = vtanh.f32 %v6344_v30  ;;  %v3894_v52 = vrot.slane %v6344_v30, 6  ;;  %v6404_v30 = vld [vmem:[%s6552_s5 + $0x8] ss:$16 sps:$4 sm:$0xff]  }
 0xc9d   :  { %v5091_v43 = vpop.eup %5090 }
 0xc9e   :  { %v3779_v48 = vmul.f32 %v5091_v43, %v5089_v28 }
 0xca0   :  { %v3784_v38 = vpack.c.bf16 %v3779_v48, %v3779_v48 }
 0xca2   :  { %v3786_v39 = vrot.slane %v3784_v38, 3 }
 0xca4   :  { %3821 = vmatmul.mubr.bf16.vlgmr.msra.gmra.mrb[56].mxu0 %v3786_v39  ;;  %3862 = vmatmul.mubr.bf16.vlgmr.msra.gmra.mrb[56].mxu1 %v3786_v39 }
 0xca5   :  { %3907 = vmatpush1.bf16.msra.mxu0 %v6002_v56  ;;  %3948 = vmatpush1.bf16.msra.mxu1 %v6007_v9  ;;  %v6382_v56 = vld [vmem:[%s6552_s5 + $0x4] ss:$16 sps:$4 sm:$0xff]   ;;  %v6388_v9 = vld [vmem:[%s6552_s5 + $0xc] ss:$16 sps:$4 sm:$0xff]  }
 0xca6   :  { %3908 = vmatprep.subr.bf16.mxu0 %v6012_v57  ;;  %3949 = vmatprep.subr.bf16.mxu1 %v6017_v51  ;;  %v3780_v57 = vld [vmem:[#allocation2 + $0x20] sm:$0x3] }
 0xca7   :  { %3938 = vmatprep.mubr.bf16.mxu0 %v5188_v2  ;;  %3979 = vmatprep.mubr.bf16.mxu1 %v5188_v2 }
 0xca9   :  { %3909 = vmatpush1.bf16.msra.mxu0 %v6024_v58  ;;  %3950 = vmatpush1.bf16.msra.mxu1 %v6029_v59 }
 0xcaa   :  { %3910 = vmatprep.subr.bf16.mxu0 %v6036_v50  ;;  %3951 = vmatprep.subr.bf16.mxu1 %v6041_v60 }
 0xcad   :  { %3911 = vmatpush1.bf16.msra.mxu0 %v6050_v61  ;;  %3952 = vmatpush1.bf16.msra.mxu1 %v6055_v62 }
 0xcae   :  { %3912 = vmatprep.subr.bf16.mxu0 %v6062_v63  ;;  %3953 = vmatprep.subr.bf16.mxu1 %v6067_v0 }
 0xcb1   :  { %3913 = vmatpush1.bf16.msra.mxu0 %v6074_v1  ;;  %3954 = vmatpush1.bf16.msra.mxu1 %v6079_v12 }
 0xcb2   :  { %3914 = vmatprep.subr.bf16.mxu0 %v6086_v15  ;;  %3955 = vmatprep.subr.bf16.mxu1 %v6091_v16 }
 0xcb5   :  { %3915 = vmatpush1.bf16.msra.mxu0 %v6098_v17  ;;  %3956 = vmatpush1.bf16.msra.mxu1 %v6103_v18 }
 0xcb6   :  { %3916 = vmatprep.subr.bf16.mxu0 %v6110_v19  ;;  %3957 = vmatprep.subr.bf16.mxu1 %v6115_v20 }
 0xcb9   :  { %3917 = vmatpush1.bf16.msra.mxu0 %v6122_v21  ;;  %3958 = vmatpush1.bf16.msra.mxu1 %v6127_v22 }
 0xcba   :  { %3918 = vmatprep.subr.bf16.mxu0 %v6134_v23  ;;  %3959 = vmatprep.subr.bf16.mxu1 %v6139_v24 }
 0xcbd   :  { %3919 = vmatpush1.bf16.msra.mxu0 %v6146_v25  ;;  %3960 = vmatpush1.bf16.msra.mxu1 %v6151_v26 }
 0xcbe   :  { %3920 = vmatprep.subr.bf16.mxu0 %v6158_v11  ;;  %3961 = vmatprep.subr.bf16.mxu1 %v6163_v3 }
 0xcc1   :  { %3921 = vmatpush1.bf16.msra.mxu0 %v6170_v5  ;;  %3962 = vmatpush1.bf16.msra.mxu1 %v6175_v53 }
 0xcc2   :  { %4039 = vmatprep.subr.bf16.mxu0 %v6382_v56  ;;  %4080 = vmatprep.subr.bf16.mxu1 %v6388_v9 }
 0xd77   :  { %v3822_v51 = vpop.f32.mrb[56].mxu0  ;;  %v3863_v32 = vpop.f32.mrb[56].mxu1 }
 0xd78   :  { %v3870_v40 = vadd.f32 %v3822_v51, %v3780_v57  ;;  %v3824_v13 = vpop.f32.mrb[57].mxu0  ;;  %v3865_v54 = vpop.f32.mrb[57].mxu1  ;;  %v3872_v29 = vadd.f32 %v3863_v32, %v3782_v47  ;;  %v6398_v32 = vld [vmem:[%s6552_s5] ss:$16 sps:$4 sm:$0xff]  }
 0xd79   :  { %v3871_v55 = vadd.f32 %v3824_v13, %v3781_v41  ;;  %v3826_v46 = vpop.f32.mrb[58].mxu0  ;;  %v3867_v49 = vpop.f32.mrb[58].mxu1  ;;  %v3873_v4 = vadd.f32 %v3865_v54, %v3783_v10  ;;  %v6416_v41 = vld [vmem:[%s6552_s5 + $0x2c] ss:$16 sps:$4 sm:$0xff]  }
 0xd7a   :  { %v4688_v6 = vmul.f32 -1.442695, %v3870_v40  ;;  %v3827_v8 = vpop.f32.mrb[59].mxu0  ;;  %v3868_v14 = vpop.f32.mrb[59].mxu1  ;;  %v6410_v40 = vld [vmem:[%s6552_s5 + $0x24] ss:$16 sps:$4 sm:$0xff]  }
 0xd7b   :  { %v4689_v7 = vmul.f32 -1.442695, %v3871_v55  ;;  %v4690_v27 = vmul.f32 -1.442695, %v3873_v4 }
 0xd7c   :  { %5092 = vpow2.f32 %v4688_v6 }
 0xd7d   :  { %5094 = vpow2.f32 %v4689_v7 }
 0xd7e   :  { %5096 = vpow2.f32 %v4690_v27 }
 0xd7f   :  { %5098 = vtanh.f32 %v3872_v29  ;;  %v5162_v29 = vld [vmem:[%s6552_s5 + $0x20] ss:$16 sps:$4 sm:$0xff]  }
 0xd86   :  { %v5093_v37 = vpop.eup %5092 }
 0xd87   :  { %v5095_v42 = vpop.eup %5094  ;;  %v3880_v33 = vadd.f32 1.0, %v5093_v37  ;;  %v5163_v37 = vld [vmem:[%s6552_s5 + $0x28] ss:$16 sps:$4 sm:$0xff]  }
 0xd88   :  { %v3881_v31 = vadd.f32 1.0, %v5095_v42  ;;  %v5097_v34 = vpop.eup %5096  ;;  %v5164_v42 = vld [vmem:[%s6552_s5 + $0x44] ss:$16 sps:$4 sm:$0xff]  }
 0xd89   :  { %5100 = vrcp.f32 %v3880_v33  ;;  %v5099_v35 = vpop.eup %5098  ;;  %v3890_v28 = vadd.f32 1.0, %v5097_v34  ;;  %v5165_v33 = vld [vmem:[%s6552_s5 + $0x4c] ss:$16 sps:$4 sm:$0xff]   ;;  %v5168_v34 = vld [vmem:[%s6552_s5 + $0x64] ss:$16 sps:$4 sm:$0xff]  }
 0xd8a   :  { %5102 = vrcp.f32 %v3881_v31  ;;  %v5167_v31 = vld [vmem:[%s6552_s5 + $0x48] ss:$16 sps:$4 sm:$0xff]  }
 0xd8b   :  { %5104 = vrcp.f32 %v3890_v28  ;;  %v5174_v28 = vld [vmem:[%s6552_s5 + $0x80] ss:$16 sps:$4 sm:$0xff]  }
 0xd93   :  { %v5101_v36 = vpop.eup %5100 }
 0xd94   :  { %v5103_v45 = vpop.eup %5102  ;;  %v3897_v44 = vmul.f32 %v5101_v36, %v5099_v35  ;;  %v5169_v35 = vld [vmem:[%s6552_s5 + $0x6c] ss:$16 sps:$4 sm:$0xff]   ;;  %v5170_v36 = vld [vmem:[%s6552_s5 + $0x60] ss:$16 sps:$4 sm:$0xff]  }
 0xd95   :  { %v3896_v43 = vmul.f32 %v5103_v45, %v3894_v52  ;;  %v5105_v38 = vpop.eup %5104  ;;  %v5171_v52 = vld [vmem:[%s6552_s5 + $0x68] ss:$16 sps:$4 sm:$0xff]   ;;  %v5172_v45 = vld [vmem:[%s6552_s5 + $0x84] ss:$16 sps:$4 sm:$0xff]  }
 0xd97   :  { %v6392_v48 = vadd.f32 %v3897_v44, %v3896_v43  ;;  %v5173_v44 = vld [vmem:[%s6552_s5 + $0x8c] ss:$16 sps:$4 sm:$0xff]   ;;  %v5175_v43 = vld [vmem:[%s6552_s5 + $0x88] ss:$16 sps:$4 sm:$0xff]  }
 0xd99   :  { %5106 = vtanh.f32 %v6392_v48  ;;  %v4024_v55 = vrot.slane %v6392_v48, 6  ;;  %v5176_v48 = vld [vmem:[%s6552_s5 + $0xa4] ss:$16 sps:$4 sm:$0xff]  }
 0xda3   :  { %v5107_v39 = vpop.eup %5106 }
 0xda4   :  { %v3900_v57 = vmul.f32 %v5107_v39, %v5105_v38  ;;  %v5177_v38 = vld [vmem:[%s6552_s5 + $0xac] ss:$16 sps:$4 sm:$0xff]   ;;  %v5178_v39 = vld [vmem:[%s6552_s5 + $0xa0] ss:$16 sps:$4 sm:$0xff]  }
 0xda6   :  { %v3905_v51 = vpack.c.bf16 %v3900_v57, %v3900_v57  ;;  %v5179_v57 = vld [vmem:[%s6552_s5 + $0xa8] ss:$16 sps:$4 sm:$0xff]  }
 0xda8   :  { %3939 = vmatmul.mubr.bf16.vlgmr.msra.gmra.mrb[60].mxu0 %v3905_v51  ;;  %3980 = vmatmul.mubr.bf16.vlgmr.msra.gmra.mrb[60].mxu1 %v3905_v51  ;;  %v5180_v51 = vld [vmem:[%s6552_s5 + $0xc4] ss:$16 sps:$4 sm:$0xff]  }
 0xda9   :  { %4040 = vmatpush1.bf16.msra.mxu0 %v6398_v32  ;;  %4081 = vmatpush1.bf16.msra.mxu1 %v6404_v30 }
 0xdaa   :  { %4041 = vmatprep.subr.bf16.mxu0 %v6410_v40  ;;  %4082 = vmatprep.subr.bf16.mxu1 %v6416_v41 }
 0xdab   :  { %4071 = vmatprep.mubr.bf16.mxu0 %v5188_v2  ;;  %4112 = vmatprep.mubr.bf16.mxu1 %v5188_v2 }
 0xdad   :  { %4042 = vmatpush1.bf16.msra.mxu0 %v6024_v58  ;;  %4083 = vmatpush1.bf16.msra.mxu1 %v6029_v59 }
 0xdae   :  { %4043 = vmatprep.subr.bf16.mxu0 %v6036_v50  ;;  %4084 = vmatprep.subr.bf16.mxu1 %v6041_v60 }
 0xdb1   :  { %4044 = vmatpush1.bf16.msra.mxu0 %v6050_v61  ;;  %4085 = vmatpush1.bf16.msra.mxu1 %v6055_v62  ;;  %v3901_v62 = vld [vmem:[#allocation2 + $0x20] sm:$0xc] }
 0xdb2   :  { %4045 = vmatprep.subr.bf16.mxu0 %v6062_v63  ;;  %4086 = vmatprep.subr.bf16.mxu1 %v6067_v0 }
 0xdb5   :  { %4046 = vmatpush1.bf16.msra.mxu0 %v6074_v1  ;;  %4087 = vmatpush1.bf16.msra.mxu1 %v6079_v12 }
 0xdb6   :  { %4047 = vmatprep.subr.bf16.mxu0 %v6086_v15  ;;  %4088 = vmatprep.subr.bf16.mxu1 %v6091_v16  ;;  %v3902_v15 = vld [vmem:[#allocation2 + $0x28] sm:$0xc] }
 0xdb9   :  { %4048 = vmatpush1.bf16.msra.mxu0 %v6098_v17  ;;  %4089 = vmatpush1.bf16.msra.mxu1 %v6103_v18 }
 0xdba   :  { %4049 = vmatprep.subr.bf16.mxu0 %v6110_v19  ;;  %4090 = vmatprep.subr.bf16.mxu1 %v6115_v20 }
 0xdbd   :  { %4050 = vmatpush1.bf16.msra.mxu0 %v6122_v21  ;;  %4091 = vmatpush1.bf16.msra.mxu1 %v6127_v22  ;;  %v3904_v22 = vld [vmem:[#allocation2 + $0x38] sm:$0xc] }
 0xdbe   :  { %4051 = vmatprep.subr.bf16.mxu0 %v6134_v23  ;;  %4092 = vmatprep.subr.bf16.mxu1 %v6139_v24 }
 0xdc1   :  { %4052 = vmatpush1.bf16.msra.mxu0 %v6146_v25  ;;  %4093 = vmatpush1.bf16.msra.mxu1 %v6151_v26  ;;  %v3903_v25 = vld [vmem:[#allocation2 + $0x30] sm:$0xc] }
 0xdc2   :  { %4053 = vmatprep.subr.bf16.mxu0 %v6158_v11  ;;  %4094 = vmatprep.subr.bf16.mxu1 %v6163_v3 }
 0xdc5   :  { %4054 = vmatpush1.bf16.msra.mxu0 %v6170_v5  ;;  %4095 = vmatpush1.bf16.msra.mxu1 %v6175_v53 }
 0xdc6   :  { %4172 = vmatprep.subr.bf16.mxu0 %v6382_v56  ;;  %4213 = vmatprep.subr.bf16.mxu1 %v6388_v9 }
 0xe7b   :  { %v3940_v58 = vpop.f32.mrb[60].mxu0  ;;  %v3981_v59 = vpop.f32.mrb[60].mxu1 }
 0xe7c   :  { %v3992_v50 = vrot.slane %v3940_v58, 6  ;;  %v3942_v60 = vpop.f32.mrb[61].mxu0  ;;  %v3983_v61 = vpop.f32.mrb[61].mxu1  ;;  %v3994_v24 = vrot.slane %v3981_v59, 6  ;;  %v5185_v58 = vld [vmem:[%s6552_s5 + $0xec] ss:$16 sps:$4 sm:$0xff]  }
 0xe7d   :  { %v3993_v63 = vrot.slane %v3942_v60, 6  ;;  %v3944_v0 = vpop.f32.mrb[62].mxu0  ;;  %v3985_v1 = vpop.f32.mrb[62].mxu1  ;;  %v3995_v21 = vrot.slane %v3983_v61, 6  ;;  %v5186_v59 = vld [vmem:[%s6552_s5 + $0xe0] ss:$16 sps:$4 sm:$0xff]  }
 0xe7e   :  { %v4000_v12 = vadd.f32 %v3992_v50, %v3901_v62  ;;  %v3945_v16 = vpop.f32.mrb[63].mxu0  ;;  %v3986_v17 = vpop.f32.mrb[63].mxu1  ;;  %v4002_v11 = vadd.f32 %v3994_v24, %v3903_v25  ;;  %v5187_v50 = vld [vmem:[%s6552_s5 + $0xe8] ss:$16 sps:$4 sm:$0xff]   ;;  %v4031_v1 = vld [vmem:[#allocation2 + $0x20] sm:$0x30] }
 0xe7f   :  { %v4001_v18 = vadd.f32 %v3993_v63, %v3902_v15  ;;  %v4003_v23 = vadd.f32 %v3995_v21, %v3904_v22  ;;  %v4034_v25 = vld [vmem:[#allocation2 + $0x38] sm:$0x30] }
 0xe80   :  { %v4691_v19 = vmul.f32 -1.442695, %v4000_v12 }
 0xe81   :  { %v4692_v20 = vmul.f32 -1.442695, %v4001_v18  ;;  %v4693_v26 = vmul.f32 -1.442695, %v4003_v23  ;;  %v4032_v18 = vld [vmem:[#allocation2 + $0x28] sm:$0x30] }
 0xe82   :  { %5108 = vpow2.f32 %v4691_v19 }
 0xe83   :  { %5110 = vpow2.f32 %v4692_v20 }
 0xe84   :  { %5112 = vpow2.f32 %v4693_v26 }
 0xe85   :  { %5114 = vtanh.f32 %v4002_v11 }
 0xe8c   :  { %v5109_v3 = vpop.eup %5108 }
 0xe8d   :  { %v5111_v5 = vpop.eup %5110  ;;  %v4010_v53 = vadd.f32 1.0, %v5109_v3  ;;  %v4033_v3 = vld [vmem:[#allocation2 + $0x30] sm:$0x30] }
 0xe8e   :  { %v4011_v56 = vadd.f32 1.0, %v5111_v5  ;;  %v5113_v9 = vpop.eup %5112 }
 0xe8f   :  { %5116 = vrcp.f32 %v4010_v53  ;;  %v5115_v13 = vpop.eup %5114  ;;  %v4020_v6 = vadd.f32 1.0, %v5113_v9 }
 0xe90   :  { %5118 = vrcp.f32 %v4011_v56 }
 0xe91   :  { %5120 = vrcp.f32 %v4020_v6 }
 0xe99   :  { %v5117_v54 = vpop.eup %5116 }
 0xe9a   :  { %v5119_v46 = vpop.eup %5118  ;;  %v4027_v49 = vmul.f32 %v5117_v54, %v5115_v13 }
 0xe9b   :  { %v4026_v8 = vmul.f32 %v5119_v46, %v4024_v55  ;;  %v5121_v7 = vpop.eup %5120 }
 0xe9d   :  { %v6450_v14 = vadd.f32 %v4027_v49, %v4026_v8 }
 0xe9f   :  { %5122 = vtanh.f32 %v6450_v14  ;;  %v4157_v6 = vrot.slane %v6450_v14, 6 }
 0xea9   :  { %v5123_v10 = vpop.eup %5122 }
 0xeaa   :  { %v4030_v4 = vmul.f32 %v5123_v10, %v5121_v7 }
 0xeac   :  { %v4035_v47 = vpack.c.bf16 %v4030_v4, %v4030_v4 }
 0xeae   :  { %v4037_v27 = vrot.slane %v4035_v47, 1 }
 0xeb0   :  { %4072 = vmatmul.mubr.bf16.vlgmr.msra.gmra.mrb[64].mxu0 %v4037_v27  ;;  %4113 = vmatmul.mubr.bf16.vlgmr.msra.gmra.mrb[64].mxu1 %v4037_v27 }
 0xeb1   :  { %4173 = vmatpush1.bf16.msra.mxu0 %v6398_v32  ;;  %4214 = vmatpush1.bf16.msra.mxu1 %v6404_v30  ;;  %v5181_v32 = vld [vmem:[%s6552_s5 + $0xcc] ss:$16 sps:$4 sm:$0xff]   ;;  %v5182_v30 = vld [vmem:[%s6552_s5 + $0xc0] ss:$16 sps:$4 sm:$0xff]  }
 0xeb2   :  { %4174 = vmatprep.subr.bf16.mxu0 %v6410_v40  ;;  %4215 = vmatprep.subr.bf16.mxu1 %v6416_v41  ;;  %v5183_v40 = vld [vmem:[%s6552_s5 + $0xc8] ss:$16 sps:$4 sm:$0xff]   ;;  %v5184_v41 = vld [vmem:[%s6552_s5 + $0xe4] ss:$16 sps:$4 sm:$0xff]  }
 0xeb3   :  { %4204 = vmatprep.mubr.bf16.mxu0 %v5188_v2  ;;  %4245 = vmatprep.mubr.bf16.mxu1 %v5188_v2  ;;  %v5166_v2 = vld [vmem:[%s6552_s5 + $0x40] ss:$16 sps:$4 sm:$0xff]  }
 0xeb5   :  { %4175 = vmatpush1.bf16.msra.mxu0 %v5162_v29  ;;  %4216 = vmatpush1.bf16.msra.mxu1 %v5163_v37 }
 0xeb6   :  { %4176 = vmatprep.subr.bf16.mxu0 %v5164_v42  ;;  %4217 = vmatprep.subr.bf16.mxu1 %v5165_v33 }
 0xeb9   :  { %4177 = vmatpush1.bf16.msra.mxu0 %v5166_v2  ;;  %4218 = vmatpush1.bf16.msra.mxu1 %v5167_v31  ;;  %v14_v2 = vstv %s6554_s8 }
 0xeba   :  { %4178 = vmatprep.subr.bf16.mxu0 %v5168_v34  ;;  %4219 = vmatprep.subr.bf16.mxu1 %v5169_v35  ;;  %15 = vst [vmem:[#allocation4] sm:$0x1] %v14_v2 }
 0xebd   :  { %4179 = vmatpush1.bf16.msra.mxu0 %v5170_v36  ;;  %4220 = vmatpush1.bf16.msra.mxu1 %v5171_v52  ;;  %v4164_v52 = vld [vmem:[#allocation2 + $0x20] sm:$0xc0] }
 0xebe   :  { %4180 = vmatprep.subr.bf16.mxu0 %v5172_v45  ;;  %4221 = vmatprep.subr.bf16.mxu1 %v5173_v44 }
 0xec1   :  { %4181 = vmatpush1.bf16.msra.mxu0 %v5174_v28  ;;  %4222 = vmatpush1.bf16.msra.mxu1 %v5175_v43 }
 0xec2   :  { %4182 = vmatprep.subr.bf16.mxu0 %v5176_v48  ;;  %4223 = vmatprep.subr.bf16.mxu1 %v5177_v38  ;;  %v4165_v48 = vld [vmem:[#allocation2 + $0x28] sm:$0xc0] }
 0xec5   :  { %4183 = vmatpush1.bf16.msra.mxu0 %v5178_v39  ;;  %4224 = vmatpush1.bf16.msra.mxu1 %v5179_v57 }
 0xec6   :  { %4184 = vmatprep.subr.bf16.mxu0 %v5180_v51  ;;  %4225 = vmatprep.subr.bf16.mxu1 %v5181_v32 }
 0xec9   :  { %4185 = vmatpush1.bf16.msra.mxu0 %v5182_v30  ;;  %4226 = vmatpush1.bf16.msra.mxu1 %v5183_v40  ;;  %v4167_v40 = vld [vmem:[#allocation2 + $0x38] sm:$0xc0] }
 0xeca   :  { %4186 = vmatprep.subr.bf16.mxu0 %v5184_v41  ;;  %4227 = vmatprep.subr.bf16.mxu1 %v5185_v58 }
 0xecd   :  { %4187 = vmatpush1.bf16.msra.mxu0 %v5186_v59  ;;  %4228 = vmatpush1.bf16.msra.mxu1 %v5187_v50  ;;  %v4166_v59 = vld [vmem:[#allocation2 + $0x30] sm:$0xc0] }
 0xf83   :  { %v4073_v60 = vpop.f32.mrb[64].mxu0  ;;  %v4114_v61 = vpop.f32.mrb[64].mxu1 }
 0xf84   :  { %v4125_v62 = vrot.slane %v4073_v60, 4  ;;  %v4075_v63 = vpop.f32.mrb[65].mxu0  ;;  %v4116_v0 = vpop.f32.mrb[65].mxu1  ;;  %v4127_v11 = vrot.slane %v4114_v61, 4 }
 0xf85   :  { %v4126_v12 = vrot.slane %v4075_v63, 4  ;;  %v4077_v15 = vpop.f32.mrb[66].mxu0  ;;  %v4118_v16 = vpop.f32.mrb[66].mxu1  ;;  %v4128_v24 = vrot.slane %v4116_v0, 4 }
 0xf86   :  { %v4133_v17 = vadd.f32 %v4125_v62, %v4031_v1  ;;  %v4078_v19 = vpop.f32.mrb[67].mxu0  ;;  %v4119_v20 = vpop.f32.mrb[67].mxu1  ;;  %v4135_v53 = vadd.f32 %v4127_v11, %v4033_v3  ;;  %v4701_v3 = vld [vmem:[#allocation4] ss:$0 sm:$0xff] }
 0xf87   :  { %v4134_v21 = vadd.f32 %v4126_v12, %v4032_v18  ;;  %v4136_v26 = vadd.f32 %v4128_v24, %v4034_v25  ;;  %v4700_v24 = vld [vmem:[%s6555_s7] ss:$0 sm:$0xff] }
 0xf88   :  { %v4694_v22 = vmul.f32 -1.442695, %v4133_v17 }
 0xf89   :  { %v4695_v23 = vmul.f32 -1.442695, %v4134_v21  ;;  %v4696_v5 = vmul.f32 -1.442695, %v4136_v26 }
 0xf8a   :  { %5124 = vpow2.f32 %v4694_v22 }
 0xf8b   :  { %5126 = vpow2.f32 %v4695_v23 }
 0xf8c   :  { %5128 = vpow2.f32 %v4696_v5 }
 0xf8d   :  { %5130 = vtanh.f32 %v4135_v53 }
 0xf94   :  { %v5125_v56 = vpop.eup %5124 }
 0xf95   :  { %v5127_v9 = vpop.eup %5126  ;;  %v4143_v13 = vadd.f32 1.0, %v5125_v56 }
 0xf96   :  { %v4144_v54 = vadd.f32 1.0, %v5127_v9  ;;  %v5129_v55 = vpop.eup %5128 }
 0xf97   :  { %5132 = vrcp.f32 %v4143_v13  ;;  %v5131_v46 = vpop.eup %5130  ;;  %v4153_v10 = vadd.f32 1.0, %v5129_v55 }
 0xf98   :  { %5134 = vrcp.f32 %v4144_v54 }
 0xf99   :  { %5136 = vrcp.f32 %v4153_v10 }
 0xfa1   :  { %v5133_v49 = vpop.eup %5132 }
 0xfa2   :  { %v5135_v8 = vpop.eup %5134  ;;  %v4160_v7 = vmul.f32 %v5133_v49, %v5131_v46 }
 0xfa3   :  { %v4159_v4 = vmul.f32 %v5135_v8, %v4157_v6  ;;  %v5137_v27 = vpop.eup %5136 }
 0xfa5   :  { %v4161_v47 = vadd.f32 %v4160_v7, %v4159_v4 }
 0xfa7   :  { %5138 = vtanh.f32 %v4161_v47  ;;  %v4290_v16 = vrot.slane %v4161_v47, 6 }
 0xfb1   :  { %v5139_v29 = vpop.eup %5138 }
 0xfb2   :  { %v4163_v37 = vmul.f32 %v5139_v29, %v5137_v27 }
 0xfb4   :  { %v4168_v42 = vpack.c.bf16 %v4163_v37, %v4163_v37 }
 0xfb6   :  { %v4170_v33 = vrot.slane %v4168_v42, 2 }
 0xfb8   :  { %4205 = vmatmul.mubr.bf16.vlgmr.msra.gmra.mrb[68].mxu0 %v4170_v33  ;;  %4246 = vmatmul.mubr.bf16.vlgmr.msra.gmra.mrb[68].mxu1 %v4170_v33 }
0x108b   :  { %v4206_v14 = vpop.f32.mrb[68].mxu0  ;;  %v4247_v31 = vpop.f32.mrb[68].mxu1 }
0x108c   :  { %v4258_v34 = vrot.slane %v4206_v14, 2  ;;  %v4208_v35 = vpop.f32.mrb[69].mxu0  ;;  %v4249_v36 = vpop.f32.mrb[69].mxu1  ;;  %v4260_v58 = vrot.slane %v4247_v31, 2 }
0x108d   :  { %v4259_v45 = vrot.slane %v4208_v35, 2  ;;  %v4210_v44 = vpop.f32.mrb[70].mxu0  ;;  %v4251_v28 = vpop.f32.mrb[70].mxu1  ;;  %v4261_v30 = vrot.slane %v4249_v36, 2 }
0x108e   :  { %v4266_v43 = vadd.f32 %v4258_v34, %v4164_v52  ;;  %v4211_v38 = vpop.f32.mrb[71].mxu0  ;;  %v4252_v39 = vpop.f32.mrb[71].mxu1  ;;  %v4268_v60 = vadd.f32 %v4260_v58, %v4166_v59 }
0x108f   :  { %v4267_v57 = vadd.f32 %v4259_v45, %v4165_v48  ;;  %v4269_v41 = vadd.f32 %v4261_v30, %v4167_v40 }
0x1090   :  { %v4697_v51 = vmul.f32 -1.442695, %v4266_v43 }
0x1091   :  { %v4698_v32 = vmul.f32 -1.442695, %v4267_v57  ;;  %v4699_v50 = vmul.f32 -1.442695, %v4269_v41 }
0x1092   :  { %5140 = vpow2.f32 %v4697_v51 }
0x1093   :  { %5142 = vpow2.f32 %v4698_v32 }
0x1094   :  { %5144 = vpow2.f32 %v4699_v50 }
0x1095   :  { %5146 = vtanh.f32 %v4268_v60 }
0x109c   :  { %v5141_v61 = vpop.eup %5140 }
0x109d   :  { %v5143_v62 = vpop.eup %5142  ;;  %v4276_v63 = vadd.f32 1.0, %v5141_v61 }
0x109e   :  { %v4277_v0 = vadd.f32 1.0, %v5143_v62  ;;  %v5145_v1 = vpop.eup %5144 }
0x109f   :  { %5148 = vrcp.f32 %v4276_v63  ;;  %v5147_v12 = vpop.eup %5146  ;;  %v4286_v19 = vadd.f32 1.0, %v5145_v1 }
0x10a0   :  { %5150 = vrcp.f32 %v4277_v0 }
0x10a1   :  { %5152 = vrcp.f32 %v4286_v19 }
0x10a9   :  { %v5149_v15 = vpop.eup %5148 }
0x10aa   :  { %v5151_v17 = vpop.eup %5150  ;;  %v4293_v18 = vmul.f32 %v5149_v15, %v5147_v12 }
0x10ab   :  { %v4292_v20 = vmul.f32 %v5151_v17, %v4290_v16  ;;  %v5153_v22 = vpop.eup %5152 }
0x10ad   :  { %v4294_v21 = vadd.f32 %v4293_v18, %v4292_v20 }
0x10af   :  { %5154 = vtanh.f32 %v4294_v21 }
0x10b9   :  { %v5155_v23 = vpop.eup %5154 }
0x10ba   :  { %v4296_v25 = vmul.f32 %v5155_v23, %v5153_v22 }
0x10bc   :  { %v4304_v26 = vmul.f32 %v4700_v24, %v4296_v25 }
0x10be   :  { %v4306_v11 = vsel %vm4305_vm2, %v4304_v26, 0.0 }
0x10bf   :  { %4307 = vadd.xlane.f32.xlu0 %v4306_v11 }
0x114c   :  { %v4308_v5 = vpop.xlane.xlu0 %4307 }
0x114d   :  { %v4316_v53 = vadd.f32 %v4701_v3, %v4308_v5 }
0x114f   :  { %4318 = vst.msk [vmem:[%s6556_s9 - $0x6] sm:$0xc0] %vm4317_vm3, %v4316_v53 }

</bundles_post_ra>
